<compile_context>
chip_gen: v6e
topology: v6e:2x2x1
jax: 0.10.0
libtpu: 0.0.40
codegen_flags: <defaults>
</compile_context>

<pallas_src>
import functools

import jax
import jax.numpy as jnp
from jax.experimental import pallas as pl
from jax.experimental.pallas import tpu as pltpu


def _round_up(x, m):
    return (x + m - 1) // m * m


def _vmem_cap_bytes():
    """Generation-aware VMEM cap (v5e/v6e: 128 MiB, v7x: 64 MiB) with headroom."""
    cap = 64 * 1024 * 1024  # conservative (v7x-sized) fallback
    try:
        cap = int(pltpu.get_tpu_info().vmem_capacity_bytes)
    except Exception:
        pass
    return max(32 * 1024 * 1024, int(cap * 0.85))


def _bf16_elementwise_ok():
    """bf16 VPU/EUP exists on v6e/v7x; v5e and older would emulate it (slower)."""
    try:
        kind = jax.devices()[0].device_kind.lower()
    except Exception:
        return False
    return not any(old in kind for old in ("v2", "v3", "v4", "v5"))


# ---------------------------------------------------------------------------
# Kernel A: weights fully resident in VMEM (small H*D) -- single M grid axis.
# ---------------------------------------------------------------------------
def _residual_mlp_kernel_resident(x_ref, w1_ref, b1_ref, w2_ref, b2_ref, o_ref,
                                  *, ew_dtype):
    x = x_ref[...]                                                  # (tm, D)
    # Native-dtype MXU operands, f32 accumulation only.
    h = jnp.dot(x, w1_ref[...], preferred_element_type=jnp.float32)
    # Elementwise (bias + GELU) in ew_dtype: bf16 on v6e/v7x bf16 inputs,
    # f32 otherwise.
    h = h.astype(ew_dtype) + b1_ref[...].astype(ew_dtype)
    # TODO(synk): PyTorch nn.GELU defaults to exact erf; tanh approximation
    # is used here (the reference below matches it).
    h = jax.nn.gelu(h, approximate=True)
    y = jnp.dot(h.astype(w2_ref.dtype), w2_ref[...],
                preferred_element_type=jnp.float32)
    y = y + b2_ref[...].astype(jnp.float32) + x.astype(jnp.float32)  # residual
    o_ref[...] = y.astype(o_ref.dtype)


# ---------------------------------------------------------------------------
# Kernel B: H-tiled fallback (large H) -- (M, H) grid with f32 accumulator.
# ---------------------------------------------------------------------------
def _residual_mlp_kernel_tiled(x_ref, w1_ref, b1_ref, w2_ref, b2_ref, o_ref,
                               acc_ref, *, ew_dtype):
    h_step = pl.program_id(1)

    @pl.when(h_step == 0)
    def _init():
        # Seed the accumulator with residual + bias2 -> epilogue is just a
        # downcast store.
        acc_ref[...] = (x_ref[...].astype(jnp.float32)
                        + b2_ref[...].astype(jnp.float32))

    x = x_ref[...]
    h = jnp.dot(x, w1_ref[...], preferred_element_type=jnp.float32)
    h = h.astype(ew_dtype) + b1_ref[...].astype(ew_dtype)
    h = jax.nn.gelu(h, approximate=True)
    acc_ref[...] += jnp.dot(h.astype(w2_ref.dtype), w2_ref[...],
                            preferred_element_type=jnp.float32)

    @pl.when(h_step == pl.num_programs(1) - 1)
    def _finalize():
        o_ref[...] = acc_ref[...].astype(o_ref.dtype)


def residual_mlp(x, w1, b1, w2, b2, *, tile_m=512, tile_h=512,
                 max_resident_weight_bytes=8 * 1024 * 1024,
                 force_h_tiling=False):
    """out = (GELU(x @ w1 + b1) @ w2 + b2) + x, fused in one Pallas kernel.

    x: (B, N, D).  Tokens are tiled along M = B*N; only the weights are
    padded (along H, to a multiple of 128); the activation keeps its native
    last dim D (one HBM read + one HBM write, no host-side pad/slice).
    """
    B, N, D = x.shape
    H = w1.shape[1]
    M = B * N

    assert tile_m % 8 == 0 and tile_h % 128 == 0

    # Pad H to 128 only (padded w1 cols / b1 entries / w2 rows are zero, so
    # the padded hidden columns contribute exactly nothing to the output).
    h_pad = _round_up(H, 128)
    w1p = jnp.pad(w1, ((0, 0), (0, h_pad - H)))
    b1p = jnp.pad(b1.reshape(1, H), ((0, 0), (0, h_pad - H)))
    w2p = jnp.pad(w2, ((0, h_pad - H), (0, 0)))
    b2p = b2.reshape(1, D)

    x2 = x.reshape(M, D)

    # M tiling: big tiles to amortize per-step overhead, but keep >= 2 tiles
    # so the "parallel" axis can shard across v7x's two TensorCores.
    tm = min(tile_m, _round_up(M, 8))
    if M > 8 and pl.cdiv(M, tm) < 2:
        tm = _round_up(pl.cdiv(M, 2), 8)
    n_m = pl.cdiv(M, tm)
    # NOTE: if M % tm != 0 the ragged last x block contains garbage rows; the
    # corresponding output rows are dropped by Pallas store masking and
    # matmul rows are independent, so results are unaffected.

    in_bytes = jnp.dtype(x.dtype).itemsize
    w_bytes = jnp.dtype(w1.dtype).itemsize
    weight_bytes = (D * h_pad + h_pad * D + h_pad + D) * w_bytes

    ew_dtype = (jnp.bfloat16
                if (x.dtype == jnp.bfloat16 and _bf16_elementwise_ok())
                else jnp.float32)
    ew_bytes = jnp.dtype(ew_dtype).itemsize

    vmem_cap = _vmem_cap_bytes()
    use_resident = (weight_bytes <= max_resident_weight_bytes
                    and not force_h_tiling)

    if use_resident:
        # Weights fully resident (constant index_map -> DMA'd once), no H axis.
        est = (2 * tm * D * in_bytes            # x  (double-buffered)
               + 2 * tm * D * in_bytes          # out
               + 2 * weight_bytes               # resident weights
               + tm * h_pad * 4                 # f32 hidden (MXU output)
               + tm * h_pad * ew_bytes          # elementwise / cast copy
               + tm * D * 4)                    # f32 y before downcast
        vmem_limit = int(min(vmem_cap, max(2 * est, 32 * 1024 * 1024)))

        out2 = pl.pallas_call(
            functools.partial(_residual_mlp_kernel_resident, ew_dtype=ew_dtype),
            out_shape=jax.ShapeDtypeStruct((M, D), x.dtype),
            grid_spec=pltpu.PrefetchScalarGridSpec(
                num_scalar_prefetch=0,
                grid=(n_m,),
                in_specs=[
                    pl.BlockSpec((tm, D), lambda i: (i, 0)),       # x tile
                    pl.BlockSpec((D, h_pad), lambda i: (0, 0)),    # w1 (resident)
                    pl.BlockSpec((1, h_pad), lambda i: (0, 0)),    # b1
                    pl.BlockSpec((h_pad, D), lambda i: (0, 0)),    # w2 (resident)
                    pl.BlockSpec((1, D), lambda i: (0, 0)),        # b2
                ],
                out_specs=pl.BlockSpec((tm, D), lambda i: (i, 0)),
            ),
            compiler_params=pltpu.CompilerParams(
                dimension_semantics=("parallel",),
                vmem_limit_bytes=vmem_limit),
        )(x2, w1p, b1p, w2p, b2p)
    else:
        # Large-H fallback: H is an "arbitrary" reduction axis with an f32
        # accumulator.  Pick the largest tile_h (multiple of 128) dividing
        # h_pad so padding never exceeds 127 columns.
        th = _round_up(min(tile_h, h_pad), 128)
        while h_pad % th != 0:
            th -= 128
        grid = (n_m, h_pad // th)

        est = (2 * tm * D * in_bytes            # x
               + 2 * tm * D * in_bytes          # out
               + 2 * (D * th + th * D + th + D) * w_bytes
               + tm * D * 4                     # f32 accumulator
               + tm * th * 4                    # f32 hidden
               + tm * th * ew_bytes)            # elementwise / cast copy
        vmem_limit = int(min(vmem_cap, max(2 * est, 32 * 1024 * 1024)))

        out2 = pl.pallas_call(
            functools.partial(_residual_mlp_kernel_tiled, ew_dtype=ew_dtype),
            out_shape=jax.ShapeDtypeStruct((M, D), x.dtype),
            grid_spec=pltpu.PrefetchScalarGridSpec(
                num_scalar_prefetch=0,
                grid=grid,
                in_specs=[
                    pl.BlockSpec((tm, D), lambda i, h: (i, 0)),    # x tile
                    pl.BlockSpec((D, th), lambda i, h: (0, h)),    # w1 slice
                    pl.BlockSpec((1, th), lambda i, h: (0, h)),    # b1 slice
                    pl.BlockSpec((th, D), lambda i, h: (h, 0)),    # w2 slice
                    pl.BlockSpec((1, D), lambda i, h: (0, 0)),     # b2
                ],
                out_specs=pl.BlockSpec((tm, D), lambda i, h: (i, 0)),
                scratch_shapes=[pltpu.VMEM((tm, D), jnp.float32)],
            ),
            compiler_params=pltpu.CompilerParams(
                dimension_semantics=("parallel", "arbitrary"),
                vmem_limit_bytes=vmem_limit),
        )(x2, w1p, b1p, w2p, b2p)

    return out2.reshape(B, N, D)


def residual_mlp_ref(x, w1, b1, w2, b2):
    """Plain-JAX reference of fn(x) + x (f32 math, highest matmul precision)."""
    xf = x.astype(jnp.float32)
    h = jax.nn.gelu(
        jnp.einsum("bnd,dh->bnh", xf, w1.astype(jnp.float32),
                   precision=jax.lax.Precision.HIGHEST)
        + b1.astype(jnp.float32), approximate=True)
    y = jnp.einsum("bnh,hd->bnd", h, w2.astype(jnp.float32),
                   precision=jax.lax.Precision.HIGHEST) + b2.astype(jnp.float32)
    return (y + xf).astype(x.dtype)


if __name__ == "__main__":
    key = jax.random.PRNGKey(0)
    # M = B*N = 1024 tokens -> 2 M tiles at tile_m=512; D, H deliberately not
    # 128-aligned (H pads to 384, D stays 96 / unpadded).
    B, N, D, H = 2, 512, 96, 320

    kx, k1, kb1, k2, kb2 = jax.random.split(key, 5)
    x = jax.random.normal(kx, (B, N, D), dtype=jnp.float32)
    w1 = jax.random.normal(k1, (D, H), dtype=jnp.float32) * (1.0 / jnp.sqrt(D))
    b1 = jax.random.normal(kb1, (1, H), dtype=jnp.float32) * 0.1
    w2 = jax.random.normal(k2, (H, D), dtype=jnp.float32) * (1.0 / jnp.sqrt(H))
    b2 = jax.random.normal(kb2, (1, D), dtype=jnp.float32) * 0.1

    ref = residual_mlp_ref(x, w1, b1, w2, b2)

    # f32, resident-weight path — tight check.
    out = jax.block_until_ready(residual_mlp(x, w1, b1, w2, b2))
    assert out.shape == x.shape, (out.shape, x.shape)
    assert jnp.allclose(out, ref, atol=1e-3, rtol=1e-3), "f32 mismatch (resident path)"

    # f32, forced H-tiled fallback path — same tight check.
    out_t = jax.block_until_ready(
        residual_mlp(x, w1, b1, w2, b2, tile_h=128, force_h_tiling=True))
    assert jnp.allclose(out_t, ref, atol=1e-3, rtol=1e-3), "f32 mismatch (tiled path)"

    # bf16 path — native bf16 MXU operands, bf16 elementwise on v6e/v7x,
    # f32 accumulation; loose check.
    xb, w1b, b1b, w2b, b2b = (a.astype(jnp.bfloat16) for a in (x, w1, b1, w2, b2))
    out_bf = jax.block_until_ready(residual_mlp(xb, w1b, b1b, w2b, b2b))
    ref_bf = residual_mlp_ref(xb, w1b, b1b, w2b, b2b)
    assert out_bf.shape == x.shape
    max_err = jnp.max(jnp.abs(out_bf.astype(jnp.float32) - ref_bf.astype(jnp.float32)))
    assert max_err < 0.25, f"bf16 mismatch vs reference (max abs err {max_err})"

    print("KERNEL_OK")
</pallas_src>

<mosaic_0001>
module attributes {stable_mosaic.version = 11 : i64} {
  func.func @_residual_mlp_kernel_resident(%arg0: i32, %arg1: memref<512x96xf32, #tpu.memory_space<vmem>>, %arg2: memref<96x384xf32, #tpu.memory_space<vmem>>, %arg3: memref<1x384xf32, #tpu.memory_space<vmem>>, %arg4: memref<384x96xf32, #tpu.memory_space<vmem>>, %arg5: memref<1x96xf32, #tpu.memory_space<vmem>>, %arg6: memref<512x96xf32, #tpu.memory_space<vmem>>) attributes {dimension_semantics = [#tpu.dimension_semantics<parallel>], iteration_bounds = array<i64: 2>, scalar_prefetch = 0 : i64, scratch_operands = 0 : i64, tpu.core_type = #tpu.core_type<tc>, window_params = [{transform_indices = @transform_0, window_bounds = array<i64: 512, 96>}, {pipeline_mode = #tpu.pipeline_mode<synchronous>, transform_indices = @transform_1, window_bounds = array<i64: 96, 384>}, {pipeline_mode = #tpu.pipeline_mode<synchronous>, transform_indices = @transform_2, window_bounds = array<i64: 1, 384>}, {pipeline_mode = #tpu.pipeline_mode<synchronous>, transform_indices = @transform_3, window_bounds = array<i64: 384, 96>}, {pipeline_mode = #tpu.pipeline_mode<synchronous>, transform_indices = @transform_4, window_bounds = array<i64: 1, 96>}, {transform_indices = @transform_5, window_bounds = array<i64: 512, 96>}]} {
    %c0 = arith.constant 0 : index
    %c0_0 = arith.constant 0 : index
    %0 = vector.load %arg1[%c0, %c0_0] : memref<512x96xf32, #tpu.memory_space<vmem>>, vector<512x96xf32>
    %c0_1 = arith.constant 0 : index
    %c0_2 = arith.constant 0 : index
    %1 = vector.load %arg2[%c0_1, %c0_2] : memref<96x384xf32, #tpu.memory_space<vmem>>, vector<96x384xf32>
    %cst = arith.constant dense<0.000000e+00> : vector<512x384xf32>
    %2 = tpu.matmul %0, %1, %cst {dimension_numbers = #tpu.dot_dimension_numbers<[1], [0], [0], [1], [0, 0, 1, 1], [], []>} : vector<512x96xf32>, vector<96x384xf32>, vector<512x384xf32> -> vector<512x384xf32>
    %c0_3 = arith.constant 0 : index
    %c0_4 = arith.constant 0 : index
    %3 = vector.load %arg3[%c0_3, %c0_4] : memref<1x384xf32, #tpu.memory_space<vmem>>, vector<1x384xf32>
    %4 = vector.broadcast %3 : vector<1x384xf32> to vector<512x384xf32>
    %5 = arith.addf %2, %4 : vector<512x384xf32>
    %6 = arith.mulf %5, %5 : vector<512x384xf32>
    %7 = arith.mulf %5, %6 : vector<512x384xf32>
    %cst_5 = arith.constant 4.471500e-02 : f32
    %8 = vector.broadcast %cst_5 : f32 to vector<512x384xf32>
    %9 = arith.mulf %8, %7 : vector<512x384xf32>
    %10 = arith.addf %5, %9 : vector<512x384xf32>
    %cst_6 = arith.constant 0.797884583 : f32
    %11 = vector.broadcast %cst_6 : f32 to vector<512x384xf32>
    %12 = arith.mulf %11, %10 : vector<512x384xf32>
    %13 = math.tanh %12 : vector<512x384xf32>
    %cst_7 = arith.constant 1.000000e+00 : f32
    %14 = vector.broadcast %cst_7 : f32 to vector<512x384xf32>
    %15 = arith.addf %14, %13 : vector<512x384xf32>
    %cst_8 = arith.constant 5.000000e-01 : f32
    %16 = vector.broadcast %cst_8 : f32 to vector<512x384xf32>
    %17 = arith.mulf %16, %15 : vector<512x384xf32>
    %18 = arith.mulf %5, %17 : vector<512x384xf32>
    %c0_9 = arith.constant 0 : index
    %c0_10 = arith.constant 0 : index
    %19 = vector.load %arg4[%c0_9, %c0_10] : memref<384x96xf32, #tpu.memory_space<vmem>>, vector<384x96xf32>
    %cst_11 = arith.constant dense<0.000000e+00> : vector<512x96xf32>
    %20 = tpu.matmul %18, %19, %cst_11 {dimension_numbers = #tpu.dot_dimension_numbers<[1], [0], [0], [1], [0, 0, 1, 1], [], []>} : vector<512x384xf32>, vector<384x96xf32>, vector<512x96xf32> -> vector<512x96xf32>
    %c0_12 = arith.constant 0 : index
    %c0_13 = arith.constant 0 : index
    %21 = vector.load %arg5[%c0_12, %c0_13] : memref<1x96xf32, #tpu.memory_space<vmem>>, vector<1x96xf32>
    %22 = vector.broadcast %21 : vector<1x96xf32> to vector<512x96xf32>
    %23 = arith.addf %20, %22 : vector<512x96xf32>
    %24 = arith.addf %23, %0 : vector<512x96xf32>
    %c0_14 = arith.constant 0 : index
    %c0_15 = arith.constant 0 : index
    %25 = vector.load %arg6[%c0_14, %c0_15] : memref<512x96xf32, #tpu.memory_space<vmem>>, vector<512x96xf32>
    tpu.vector_store %arg6[%c0_14, %c0_15], %24 {strides = array<i32>} : memref<512x96xf32, #tpu.memory_space<vmem>>, vector<512x96xf32>,
    return
  }
  func.func @transform_0(%arg0: i32) -> (i32, i32) {
    %c0_i32 = arith.constant 0 : i32
    %c0_i32_0 = arith.constant 0 : i32
    return %arg0, %c0_i32 : i32, i32
  }
  func.func @transform_1(%arg0: i32) -> (i32, i32) {
    %c0_i32 = arith.constant 0 : i32
    %c0_i32_0 = arith.constant 0 : i32
    %c0_i32_1 = arith.constant 0 : i32
    return %c0_i32, %c0_i32_0 : i32, i32
  }
  func.func @transform_2(%arg0: i32) -> (i32, i32) {
    %c0_i32 = arith.constant 0 : i32
    %c0_i32_0 = arith.constant 0 : i32
    %c0_i32_1 = arith.constant 0 : i32
    return %c0_i32, %c0_i32_0 : i32, i32
  }
  func.func @transform_3(%arg0: i32) -> (i32, i32) {
    %c0_i32 = arith.constant 0 : i32
    %c0_i32_0 = arith.constant 0 : i32
    %c0_i32_1 = arith.constant 0 : i32
    return %c0_i32, %c0_i32_0 : i32, i32
  }
  func.func @transform_4(%arg0: i32) -> (i32, i32) {
    %c0_i32 = arith.constant 0 : i32
    %c0_i32_0 = arith.constant 0 : i32
    %c0_i32_1 = arith.constant 0 : i32
    return %c0_i32, %c0_i32_0 : i32, i32
  }
  func.func @transform_5(%arg0: i32) -> (i32, i32) {
    %c0_i32 = arith.constant 0 : i32
    %c0_i32_0 = arith.constant 0 : i32
    return %arg0, %c0_i32 : i32, i32
  }
}

</mosaic_0001>

<bundles_post_ra>
// kernel: tpu_custom_call.1
= control target key start
LH: loop header
LB: loop body
LE: loop exit
PB: predicated region body
PF: predicated region fallthrough
CT: control target
= control target key end

     0   :  { %s5150_s18 = smov 0   ;;  %s9029_s0 = inlined_call_operand.vmem [shape: f32[1024,96], index: 0, kind: input, shape index: {}]   ;;  %s9030_s1 = inlined_call_operand.vmem [shape: f32[96,384], index: 1, kind: input, shape index: {}]   ;;  %s9031_s2 = inlined_call_operand.vmem [shape: f32[1,384], index: 2, kind: input, shape index: {}]   ;;  %s9032_s3 = inlined_call_operand.vmem [shape: f32[384,96], index: 3, kind: input, shape index: {}]   ;;  %s9033_s4 = inlined_call_operand.vmem [shape: f32[1,96], index: 4, kind: input, shape index: {}]   ;;  %s9034_s5 = inlined_call_operand.vmem [shape: f32[1024,96], index: 5, kind: output, shape index: {}]  }
   0x1 LB: > { %s4109_s19 = sadd.s32 4294967295, %s5117_s18   ;;  %p4113_p0 = scmp.ge.s32.totalorder %s5117_s18, 1  ;;  %s5117_s18 = sphi %s5150_s18, %s15_s18  }
   0x2   : > { %p188_p1 = scmp.lt.s32.totalorder %s5117_s18, 3 }
   0x4   : > { %p189_p2 = pnand %p4113_p0, %p188_p1 }
   0x6   : > { %192 = sbr.rel (%p189_p2) target bundleno = 940 (0x3ac), region = 40 }
   0xb   : > { %v326_v0 = vld [vmem:[%s9030_s1 + $0x110] sm:$0xff]  ;;  %v325_v1 = vld [vmem:[%s9030_s1 + $0x108] sm:$0xff]  ;;  %v323_v2 = vld [vmem:[%s9030_s1 + $0xf8] sm:$0xff]  ;;  %v9035_v4 = vmov 0.0   ;;  %s4114_s11 = sshll.u32 %s4109_s19, 6  ;;  %vm345_vm0 = vcmask 785408  }
   0xc   : > { %546 = vmatprep.subr.mxu0 %v326_v0  ;;  %v322_v3 = vld [vmem:[%s9030_s1 + $0xf0] sm:$0xff]  ;;  %602 = vmatprep.mubr.f32.mxu0 %v9035_v4  ;;  %v320_v5 = vld [vmem:[%s9030_s1 + $0xe0] sm:$0xff]  ;;  %v319_v6 = vld [vmem:[%s9030_s1 + $0xd8] sm:$0xff]  ;;  %p217_p3 = scmp.lt.s32.totalorder %s4114_s11, 127 }
   0xd   : > { %547 = vmatpush1.msra.mxu0 %v325_v1  ;;  %v317_v7 = vld [vmem:[%s9030_s1 + $0xc8] sm:$0xff]  ;;  %v316_v8 = vld [vmem:[%s9030_s1 + $0xc0] sm:$0xff]  ;;  %v314_v9 = vld [vmem:[%s9030_s1 + $0xb0] sm:$0xff] }
   0xe   : > { %548 = vmatprep.subr.mxu0 %v323_v2  ;;  %v313_v10 = vld [vmem:[%s9030_s1 + $0xa8] sm:$0xff]  ;;  %v311_v11 = vld [vmem:[%s9030_s1 + $0x98] sm:$0xff]  ;;  %v310_v13 = vld [vmem:[%s9030_s1 + $0x90] sm:$0xff]  ;;  %s9626_s11 = smov (!%p217_p3, %s4114_s11), 127 }
   0xf   : > { %549 = vmatpush1.msra.mxu0 %v322_v3  ;;  %v327_v12 = vld [vmem:[%s9030_s1 + $0x118] sm:$0xff]  ;;  %v324_v14 = vld [vmem:[%s9030_s1 + $0x100] sm:$0xff]  ;;  %v321_v16 = vld [vmem:[%s9030_s1 + $0xe8] sm:$0xff]  ;;  %s4115_s22 = sshll.u32 %s9626_s11, 3 }
  0x10   : > { %550 = vmatprep.subr.mxu0 %v320_v5  ;;  %4405 = vmatprep.subr.mxu1 %v327_v12  ;;  %v308_v15 = vld [vmem:[%s9030_s1 + $0x80] sm:$0xff]  ;;  %v307_v17 = vld [vmem:[%s9030_s1 + $0x78] sm:$0xff]  ;;  %v305_v18 = vld [vmem:[%s9030_s1 + $0x68] sm:$0xff]  ;;  %s5255_s10 = scalar_lea.vmem %s9029_s0, %s4115_s22  ;;  %s8654_s25 = scalar_lea.vmem %s9034_s5, %s4115_s22 }
  0x11   : > { %551 = vmatpush1.msra.mxu0 %v319_v6  ;;  %4406 = vmatpush3.msra.mxu1 %v327_v12  ;;  %v318_v19 = vld [vmem:[%s9030_s1 + $0xd0] sm:$0xff]  ;;  %v304_v20 = vld [vmem:[%s9030_s1 + $0x60] sm:$0xff]  ;;  %v315_v22 = vld [vmem:[%s9030_s1 + $0xb8] sm:$0xff] }
  0x12   : > { %552 = vmatprep.subr.mxu0 %v317_v7  ;;  %4407 = vmatprep.subr.mxu1 %v324_v14  ;;  %v302_v21 = vld [vmem:[%s9030_s1 + $0x50] sm:$0xff]  ;;  %v301_v23 = vld [vmem:[%s9030_s1 + $0x48] sm:$0xff]  ;;  %v299_v24 = vld [vmem:[%s9030_s1 + $0x38] sm:$0xff] }
  0x13   : > { %553 = vmatpush1.msra.mxu0 %v316_v8  ;;  %4408 = vmatpush3.msra.mxu1 %v324_v14  ;;  %v312_v25 = vld [vmem:[%s9030_s1 + $0xa0] sm:$0xff]  ;;  %v298_v26 = vld [vmem:[%s9030_s1 + $0x30] sm:$0xff]  ;;  %v309_v28 = vld [vmem:[%s9030_s1 + $0x88] sm:$0xff] }
  0x14   : > { %554 = vmatprep.subr.mxu0 %v314_v9  ;;  %4409 = vmatprep.subr.mxu1 %v321_v16  ;;  %v296_v27 = vld [vmem:[%s9030_s1 + $0x20] sm:$0xff]  ;;  %v295_v29 = vld [vmem:[%s9030_s1 + $0x18] sm:$0xff]  ;;  %v293_v30 = vld [vmem:[%s9030_s1 + $0x8] sm:$0xff] }
  0x15   : > { %555 = vmatpush1.msra.mxu0 %v313_v10  ;;  %4410 = vmatpush3.msra.mxu1 %v321_v16  ;;  %v306_v31 = vld [vmem:[%s9030_s1 + $0x70] sm:$0xff]  ;;  %v292_v32 = vld [vmem:[%s9030_s1] sm:$0xff]  ;;  %v303_v34 = vld [vmem:[%s9030_s1 + $0x58] sm:$0xff] }
  0x16   : > { %556 = vmatprep.subr.mxu0 %v311_v11  ;;  %4411 = vmatprep.subr.mxu1 %v318_v19  ;;  %v228_v33 = vld [vmem:[%s5255_s10] sm:$0xff]  ;;  %v3147_v36 = vld [vmem:[%s9032_s3 + $0x178] sm:$0xff]  ;;  %v229_v37 = vld [vmem:[%s5255_s10 + $0x8] sm:$0xff] }
  0x17   : > { %557 = vmatpush1.msra.mxu0 %v310_v13  ;;  %4412 = vmatpush3.msra.mxu1 %v318_v19  ;;  %v300_v35 = vld [vmem:[%s9030_s1 + $0x40] sm:$0xff]  ;;  %v297_v38 = vld [vmem:[%s9030_s1 + $0x28] sm:$0xff]  ;;  %v294_v39 = vld [vmem:[%s9030_s1 + $0x10] sm:$0xff] }
  0x18   : > { %558 = vmatprep.subr.mxu0 %v308_v15  ;;  %4413 = vmatprep.subr.mxu1 %v315_v22  ;;  %v3146_v40 = vld [vmem:[%s9032_s3 + $0x170] sm:$0xff]  ;;  %v3115_v42 = vld [vmem:[%s9032_s3 + $0x78] sm:$0xff]  ;;  %v3145_v43 = vld [vmem:[%s9032_s3 + $0x168] sm:$0xff] }
  0x19   : > { %559 = vmatpush1.msra.mxu0 %v307_v17  ;;  %4414 = vmatpush3.msra.mxu1 %v315_v22  ;;  %v230_v41 = vld [vmem:[%s5255_s10 + $0x10] sm:$0xff]  ;;  %v231_v44 = vld [vmem:[%s5255_s10 + $0x18] sm:$0xff]  ;;  %v232_v45 = vld [vmem:[%s5255_s10 + $0x20] sm:$0xff] }
  0x1a   : > { %560 = vmatprep.subr.mxu0 %v305_v18  ;;  %4415 = vmatprep.subr.mxu1 %v312_v25  ;;  %v3114_v46 = vld [vmem:[%s9032_s3 + $0x70] sm:$0xff]  ;;  %v233_v47 = vld [vmem:[%s5255_s10 + $0x28] sm:$0xff]  ;;  %v3144_v50 = vld [vmem:[%s9032_s3 + $0x160] sm:$0xff] }
  0x1b   : > { %561 = vmatpush1.msra.mxu0 %v304_v20  ;;  %4416 = vmatpush3.msra.mxu1 %v312_v25  ;;  %v234_v48 = vld [vmem:[%s5255_s10 + $0x30] sm:$0xff]  ;;  %v3113_v49 = vld [vmem:[%s9032_s3 + $0x68] sm:$0xff]  ;;  %v235_v51 = vld [vmem:[%s5255_s10 + $0x38] sm:$0xff] }
  0x1c   : > { %562 = vmatprep.subr.mxu0 %v302_v21  ;;  %4417 = vmatprep.subr.mxu1 %v309_v28  ;;  %v236_v52 = vld [vmem:[%s5255_s10 + $0x40] sm:$0xff]  ;;  %v237_v54 = vld [vmem:[%s5255_s10 + $0x48] sm:$0xff]  ;;  %v238_v55 = vld [vmem:[%s5255_s10 + $0x50] sm:$0xff] }
  0x1d   : > { %563 = vmatpush1.msra.mxu0 %v301_v23  ;;  %4418 = vmatpush3.msra.mxu1 %v309_v28  ;;  %v3112_v53 = vld [vmem:[%s9032_s3 + $0x60] sm:$0xff]  ;;  %v3111_v56 = vld [vmem:[%s9032_s3 + $0x58] sm:$0xff]  ;;  %v3110_v59 = vld [vmem:[%s9032_s3 + $0x50] sm:$0xff] }
  0x1e   : > { %564 = vmatprep.subr.mxu0 %v299_v24  ;;  %4419 = vmatprep.subr.mxu1 %v306_v31  ;;  %v239_v57 = vld [vmem:[%s5255_s10 + $0x58] sm:$0xff]  ;;  %v240_v58 = vld [vmem:[%s5255_s10 + $0x60] sm:$0xff]  ;;  %v241_v60 = vld [vmem:[%s5255_s10 + $0x68] sm:$0xff] }
  0x1f   : > { %565 = vmatpush1.msra.mxu0 %v298_v26  ;;  %4420 = vmatpush3.msra.mxu1 %v306_v31  ;;  %v5357_v61 = vld [vmem:[%s5255_s10 + $0x70] sm:$0xff]  ;;  %v3109_v62 = vld [vmem:[%s9032_s3 + $0x48] sm:$0xff]  ;;  %v5369_v63 = vld [vmem:[%s5255_s10 + $0x78] sm:$0xff] }
  0x20   : > { %566 = vmatprep.subr.mxu0 %v296_v27  ;;  %4421 = vmatprep.subr.mxu1 %v303_v34  ;;  %v3143_v0 = vld [vmem:[%s9032_s3 + $0x158] sm:$0xff]  ;;  %v5375_v1 = vld [vmem:[%s5255_s10 + $0x80] sm:$0xff]  ;;  %v5388_v3 = vld [vmem:[%s5255_s10 + $0x88] sm:$0xff] }
  0x21   : > { %567 = vmatpush1.msra.mxu0 %v295_v29  ;;  %4422 = vmatpush3.msra.mxu1 %v303_v34  ;;  %v3108_v2 = vld [vmem:[%s9032_s3 + $0x40] sm:$0xff]  ;;  %v5391_v5 = vld [vmem:[%s5255_s10 + $0x90] sm:$0xff]  ;;  %v3107_v6 = vld [vmem:[%s9032_s3 + $0x38] sm:$0xff] }
  0x22   : > { %568 = vmatprep.subr.mxu0 %v293_v30  ;;  %4423 = vmatprep.subr.mxu1 %v300_v35  ;;  %v5404_v7 = vld [vmem:[%s5255_s10 + $0x98] sm:$0xff]  ;;  %v5407_v8 = vld [vmem:[%s5255_s10 + $0xa0] sm:$0xff]  ;;  %v3106_v9 = vld [vmem:[%s9032_s3 + $0x30] sm:$0xff] }
  0x23   : > { %569 = vmatpush1.msra.mxu0 %v292_v32  ;;  %4429 = vmatprep.mubr.msk.f32.mxu1 %vm345_vm0, %v228_v33  ;;  %v5420_v10 = vld [vmem:[%s5255_s10 + $0xa8] sm:$0xff]  ;;  %v5423_v11 = vld [vmem:[%s5255_s10 + $0xb0] sm:$0xff]  ;;  %v5436_v13 = vld [vmem:[%s5255_s10 + $0xb8] sm:$0xff] }
  0x24   : > { %4118 = vmatmul.mubr.msk.f32.vlgmr.msra.gmra.mxu0 %vm345_vm0, %v228_v33  ;;  %4424 = vmatpush3.msra.mxu1 %v300_v35  ;;  %v3105_v12 = vld [vmem:[%s9032_s3 + $0x28] sm:$0xff]  ;;  %v3142_v14 = vld [vmem:[%s9032_s3 + $0x150] sm:$0xff]  ;;  %v5442_v15 = vld [vmem:[%s5255_s10 + $0xc0] sm:$0xff] }
  0x25   : > { %608 = vmatprep.mubr.f32.mxu0 %v9035_v4  ;;  %4525 = vmatprep.subr.mxu0 %v3147_v36  ;;  %v3104_v16 = vld [vmem:[%s9032_s3 + $0x20] sm:$0xff]  ;;  %v5455_v17 = vld [vmem:[%s5255_s10 + $0xc8] sm:$0xff]  ;;  %v5458_v18 = vld [vmem:[%s5255_s10 + $0xd0] sm:$0xff] }
  0x26   : > { %4425 = vmatprep.subr.mxu1 %v297_v38  ;;  %4526 = vmatpush3.msra.mxu0 %v3147_v36  ;;  %v3103_v19 = vld [vmem:[%s9032_s3 + $0x18] sm:$0xff]  ;;  %v5475_v21 = vld [vmem:[%s5255_s10 + $0xe0] sm:$0xff]  ;;  %v3102_v22 = vld [vmem:[%s9032_s3 + $0x10] sm:$0xff] }
  0x27   : > { %4426 = vmatpush3.msra.mxu1 %v297_v38  ;;  %4527 = vmatprep.subr.mxu0 %v3146_v40  ;;  %v5472_v20 = vld [vmem:[%s5255_s10 + $0xd8] sm:$0xff]  ;;  %v5489_v23 = vld [vmem:[%s5255_s10 + $0xe8] sm:$0xff]  ;;  %v5492_v24 = vld [vmem:[%s5255_s10 + $0xf0] sm:$0xff] }
  0x28   : > { %4119 = vmatmul.mubr.msk.f32.gmra.mxu0 %vm345_vm0, %v229_v37  ;;  %4427 = vmatprep.subr.mxu1 %v294_v39  ;;  %v3101_v25 = vld [vmem:[%s9032_s3 + $0x8] sm:$0xff]  ;;  %v5506_v26 = vld [vmem:[%s5255_s10 + $0xf8] sm:$0xff]  ;;  %v5509_v27 = vld [vmem:[%s5255_s10 + $0x100] sm:$0xff] }
  0x29   : > { %614 = vmatprep.mubr.f32.mxu0 %v9035_v4  ;;  %4428 = vmatpush3.msra.mxu1 %v294_v39  ;;  %v3100_v28 = vld [vmem:[%s9032_s3] sm:$0xff]  ;;  %v5523_v29 = vld [vmem:[%s5255_s10 + $0x108] sm:$0xff]  ;;  %v5526_v30 = vld [vmem:[%s5255_s10 + $0x110] sm:$0xff] }
  0x2a   : > { %4430 = vmatmul.mubr.msk.f32.vlgmr.msra.gmra.mxu1 %vm345_vm0, %v229_v37  ;;  %3155 = vmatprep.subr.mxu1 %v9035_v4  ;;  %v3131_v31 = vld [vmem:[%s9032_s3 + $0xf8] sm:$0xff]  ;;  %v5543_v33 = vld [vmem:[%s5255_s10 + $0x120] sm:$0xff]  ;;  %v3130_v34 = vld [vmem:[%s9032_s3 + $0xf0] sm:$0xff] }
  0x2b   : > { %4432 = vmatprep.mubr.msk.f32.mxu1 %vm345_vm0, %v230_v41  ;;  %4528 = vmatpush3.msra.mxu0 %v3146_v40  ;;  %v5540_v32 = vld [vmem:[%s5255_s10 + $0x118] sm:$0xff]  ;;  %v5557_v35 = vld [vmem:[%s5255_s10 + $0x128] sm:$0xff]  ;;  %v5560_v36 = vld [vmem:[%s5255_s10 + $0x130] sm:$0xff] }
  0x2c   : > { %4120 = vmatmul.mubr.msk.f32.gmra.mxu0 %vm345_vm0, %v230_v41  ;;  %3156 = vmatpush1.msra.mxu1 %v3115_v42  ;;  %v3129_v37 = vld [vmem:[%s9032_s3 + $0xe8] sm:$0xff]  ;;  %v5574_v38 = vld [vmem:[%s5255_s10 + $0x138] sm:$0xff]  ;;  %v5577_v39 = vld [vmem:[%s5255_s10 + $0x140] sm:$0xff] }
  0x2d   : > { %620 = vmatprep.mubr.f32.mxu0 %v9035_v4  ;;  %4529 = vmatprep.subr.mxu0 %v3145_v43  ;;  %v3128_v40 = vld [vmem:[%s9032_s3 + $0xe0] sm:$0xff]  ;;  %v5591_v41 = vld [vmem:[%s5255_s10 + $0x148] sm:$0xff]  ;;  %v5594_v42 = vld [vmem:[%s5255_s10 + $0x150] sm:$0xff] }
  0x2e   : > { %4433 = vmatmul.mubr.msk.f32.gmra.mxu1 %vm345_vm0, %v231_v44  ;;  %3157 = vmatprep.subr.mxu1 %v9035_v4 }
  0x2f   : > { %4435 = vmatprep.mubr.msk.f32.mxu1 %vm345_vm0, %v232_v45  ;;  %4530 = vmatpush3.msra.mxu0 %v3145_v43  ;;  %v3127_v43 = vld [vmem:[%s9032_s3 + $0xd8] sm:$0xff] }
  0x30   : > { %4121 = vmatmul.mubr.msk.f32.gmra.mxu0 %vm345_vm0, %v231_v44  ;;  %3158 = vmatpush1.msra.mxu1 %v3114_v46  ;;  %v5608_v44 = vld [vmem:[%s5255_s10 + $0x158] sm:$0xff]  ;;  %v3126_v46 = vld [vmem:[%s9032_s3 + $0xd0] sm:$0xff] }
  0x31   : > { %626 = vmatprep.mubr.f32.mxu0 %v9035_v4  ;;  %3159 = vmatprep.subr.mxu1 %v9035_v4 }
  0x32   : > { %4436 = vmatmul.mubr.msk.f32.gmra.mxu1 %vm345_vm0, %v233_v47  ;;  %4531 = vmatprep.subr.mxu0 %v3144_v50 }
  0x33   : > { %4438 = vmatprep.mubr.msk.f32.mxu1 %vm345_vm0, %v234_v48  ;;  %3160 = vmatpush1.msra.mxu1 %v3113_v49  ;;  %v3141_v49 = vld [vmem:[%s9032_s3 + $0x148] sm:$0xff] }
  0x34   : > { %4122 = vmatmul.mubr.msk.f32.gmra.mxu0 %vm345_vm0, %v232_v45  ;;  %3161 = vmatprep.subr.mxu1 %v9035_v4  ;;  %v5611_v45 = vld [vmem:[%s5255_s10 + $0x160] sm:$0xff] }
  0x35   : > { %632 = vmatprep.mubr.f32.mxu0 %v9035_v4  ;;  %4532 = vmatpush3.msra.mxu0 %v3144_v50  ;;  %v3125_v50 = vld [vmem:[%s9032_s3 + $0xc8] sm:$0xff] }
  0x36   : > { %4439 = vmatmul.mubr.msk.f32.gmra.mxu1 %vm345_vm0, %v235_v51  ;;  %4533 = vmatprep.subr.mxu0 %v3143_v0 }
  0x37   : > { %4441 = vmatprep.mubr.msk.f32.mxu1 %vm345_vm0, %v236_v52  ;;  %3162 = vmatpush1.msra.mxu1 %v3112_v53  ;;  %v3140_v53 = vld [vmem:[%s9032_s3 + $0x140] sm:$0xff] }
  0x38   : > { %4123 = vmatmul.mubr.msk.f32.gmra.mxu0 %vm345_vm0, %v233_v47  ;;  %3163 = vmatprep.subr.mxu1 %v9035_v4  ;;  %v5625_v47 = vld [vmem:[%s5255_s10 + $0x168] sm:$0xff] }
  0x39   : > { %638 = vmatprep.mubr.f32.mxu0 %v9035_v4  ;;  %3164 = vmatpush1.msra.mxu1 %v3111_v56  ;;  %v5668_v56 = vld [vmem:[%s5255_s10 + $0x190] sm:$0xff] }
  0x3a   : > { %4442 = vmatmul.mubr.msk.f32.gmra.mxu1 %vm345_vm0, %v237_v54  ;;  %3165 = vmatprep.subr.mxu1 %v9035_v4 }
  0x3b   : > { %4444 = vmatprep.mubr.msk.f32.mxu1 %vm345_vm0, %v238_v55  ;;  %3166 = vmatpush1.msra.mxu1 %v3110_v59  ;;  %v5685_v59 = vld [vmem:[%s5255_s10 + $0x1a0] sm:$0xff] }
  0x3c   : > { %4124 = vmatmul.mubr.msk.f32.gmra.mxu0 %vm345_vm0, %v234_v48  ;;  %3167 = vmatprep.subr.mxu1 %v9035_v4  ;;  %v5628_v48 = vld [vmem:[%s5255_s10 + $0x170] sm:$0xff] }
  0x3d   : > { %644 = vmatprep.mubr.f32.mxu0 %v9035_v4  ;;  %3168 = vmatpush1.msra.mxu1 %v3109_v62  ;;  %v5702_v62 = vld [vmem:[%s5255_s10 + $0x1b0] sm:$0xff] }
  0x3e   : > { %4445 = vmatmul.mubr.msk.f32.gmra.mxu1 %vm345_vm0, %v239_v57  ;;  %4534 = vmatpush3.msra.mxu0 %v3143_v0  ;;  %v5716_v0 = vld [vmem:[%s5255_s10 + $0x1b8] sm:$0xff] }
  0x3f   : > { %4447 = vmatprep.mubr.msk.f32.mxu1 %vm345_vm0, %v240_v58  ;;  %3169 = vmatprep.subr.mxu1 %v9035_v4 }
  0x40   : > { %4125 = vmatmul.mubr.msk.f32.gmra.mxu0 %vm345_vm0, %v235_v51  ;;  %3170 = vmatpush1.msra.mxu1 %v3108_v2  ;;  %v5645_v51 = vld [vmem:[%s5255_s10 + $0x178] sm:$0xff]  ;;  %v3120_v2 = vld [vmem:[%s9032_s3 + $0xa0] sm:$0xff] }
  0x41   : > { %650 = vmatprep.mubr.f32.mxu0 %v9035_v4  ;;  %3171 = vmatprep.subr.mxu1 %v9035_v4 }
  0x42   : > { %4448 = vmatmul.mubr.msk.f32.gmra.mxu1 %vm345_vm0, %v241_v60  ;;  %4535 = vmatprep.subr.mxu0 %v3142_v14 }
  0x43   : > { %4450 = vmatprep.mubr.msk.f32.mxu1 %vm345_vm0, %v5357_v61  ;;  %3172 = vmatpush1.msra.mxu1 %v3107_v6  ;;  %v3119_v6 = vld [vmem:[%s9032_s3 + $0x98] sm:$0xff] }
  0x44   : > { %4126 = vmatmul.mubr.msk.f32.gmra.mxu0 %vm345_vm0, %v236_v52  ;;  %3173 = vmatprep.subr.mxu1 %v9035_v4  ;;  %v5648_v52 = vld [vmem:[%s5255_s10 + $0x180] sm:$0xff] }
  0x45   : > { %656 = vmatprep.mubr.f32.mxu0 %v9035_v4  ;;  %3174 = vmatpush1.msra.mxu1 %v3106_v9  ;;  %v3118_v9 = vld [vmem:[%s9032_s3 + $0x90] sm:$0xff] }
  0x46   : > { %4451 = vmatmul.mubr.msk.f32.gmra.mxu1 %vm345_vm0, %v5369_v63  ;;  %3175 = vmatprep.subr.mxu1 %v9035_v4 }
  0x47   : > { %4453 = vmatprep.mubr.msk.f32.mxu1 %vm345_vm0, %v5375_v1  ;;  %3176 = vmatpush1.msra.mxu1 %v3105_v12  ;;  %v5773_v12 = vld [vmem:[%s5255_s10 + $0x1f0] sm:$0xff] }
  0x48   : > { %4127 = vmatmul.mubr.msk.f32.gmra.mxu0 %vm345_vm0, %v237_v54  ;;  %3177 = vmatprep.subr.mxu1 %v9035_v4  ;;  %v3124_v54 = vld [vmem:[%s9032_s3 + $0xc0] sm:$0xff] }
  0x49   : > { %662 = vmatprep.mubr.f32.mxu0 %v9035_v4  ;;  %4536 = vmatpush3.msra.mxu0 %v3142_v14  ;;  %v5787_v14 = vld [vmem:[%s5255_s10 + $0x1f8] sm:$0xff] }
  0x4a   : > { %4454 = vmatmul.mubr.msk.f32.gmra.mxu1 %vm345_vm0, %v5388_v3  ;;  %4537 = vmatprep.subr.mxu0 %v3141_v49 }
  0x4b   : > { %4456 = vmatprep.mubr.msk.f32.mxu1 %vm345_vm0, %v5391_v5  ;;  %3178 = vmatpush1.msra.mxu1 %v3104_v16  ;;  %v3138_v16 = vld [vmem:[%s9032_s3 + $0x130] sm:$0xff] }
  0x4c   : > { %4128 = vmatmul.mubr.msk.f32.gmra.mxu0 %vm345_vm0, %v238_v55  ;;  %3179 = vmatprep.subr.mxu1 %v9035_v4  ;;  %v5665_v55 = vld [vmem:[%s5255_s10 + $0x188] sm:$0xff] }
  0x4d   : > { %668 = vmatprep.mubr.f32.mxu0 %v9035_v4  ;;  %3180 = vmatpush1.msra.mxu1 %v3103_v19  ;;  %v3135_v19 = vld [vmem:[%s9032_s3 + $0x118] sm:$0xff] }
  0x4e   : > { %4457 = vmatmul.mubr.msk.f32.gmra.mxu1 %vm345_vm0, %v5404_v7  ;;  %3181 = vmatprep.subr.mxu1 %v9035_v4 }
  0x4f   : > { %4459 = vmatprep.mubr.msk.f32.mxu1 %vm345_vm0, %v5407_v8  ;;  %3182 = vmatpush1.msra.mxu1 %v3102_v22  ;;  %v3132_v22 = vld [vmem:[%s9032_s3 + $0x100] sm:$0xff] }
  0x50   : > { %4129 = vmatmul.mubr.msk.f32.gmra.mxu0 %vm345_vm0, %v239_v57  ;;  %3183 = vmatprep.subr.mxu1 %v9035_v4  ;;  %v3123_v57 = vld [vmem:[%s9032_s3 + $0xb8] sm:$0xff] }
  0x51   : > { %674 = vmatprep.mubr.f32.mxu0 %v9035_v4  ;;  %3184 = vmatpush1.msra.mxu1 %v3101_v25 }
  0x52   : > { %4460 = vmatmul.mubr.msk.f32.gmra.mxu1 %vm345_vm0, %v5420_v10  ;;  %3185 = vmatprep.subr.mxu1 %v9035_v4 }
  0x53   : > { %4462 = vmatprep.mubr.msk.f32.mxu1 %vm345_vm0, %v5423_v11  ;;  %3186 = vmatpush1.msra.mxu1 %v3100_v28 }
  0x54   : > { %4130 = vmatmul.mubr.msk.f32.gmra.mxu0 %vm345_vm0, %v240_v58  ;;  %3187 = vmatprep.subr.mxu1 %v9035_v4  ;;  %v5682_v58 = vld [vmem:[%s5255_s10 + $0x198] sm:$0xff] }
  0x55   : > { %680 = vmatprep.mubr.f32.mxu0 %v9035_v4  ;;  %3188 = vmatpush2.msra.mxu1 %v3131_v31 }
  0x56   : > { %4463 = vmatmul.mubr.msk.f32.gmra.mxu1 %vm345_vm0, %v5436_v13  ;;  %3189 = vmatprep.subr.mxu1 %v9035_v4 }
  0x57   : > { %4465 = vmatprep.mubr.msk.f32.mxu1 %vm345_vm0, %v5442_v15  ;;  %3190 = vmatpush2.msra.mxu1 %v3130_v34 }
  0x58   : > { %4131 = vmatmul.mubr.msk.f32.gmra.mxu0 %vm345_vm0, %v241_v60  ;;  %3191 = vmatprep.subr.mxu1 %v9035_v4  ;;  %v3122_v60 = vld [vmem:[%s9032_s3 + $0xb0] sm:$0xff] }
  0x59   : > { %686 = vmatprep.mubr.f32.mxu0 %v9035_v4  ;;  %3192 = vmatpush2.msra.mxu1 %v3129_v37 }
  0x5a   : > { %4466 = vmatmul.mubr.msk.f32.gmra.mxu1 %vm345_vm0, %v5455_v17  ;;  %3193 = vmatprep.subr.mxu1 %v9035_v4 }
  0x5b   : > { %4468 = vmatprep.mubr.msk.f32.mxu1 %vm345_vm0, %v5458_v18  ;;  %3194 = vmatpush2.msra.mxu1 %v3128_v40 }
  0x5c   : > { %4132 = vmatmul.mubr.msk.f32.gmra.mxu0 %vm345_vm0, %v5357_v61  ;;  %3195 = vmatprep.subr.mxu1 %v9035_v4  ;;  %v5699_v61 = vld [vmem:[%s5255_s10 + $0x1a8] sm:$0xff] }
  0x5d   : > { %692 = vmatprep.mubr.f32.mxu0 %v9035_v4  ;;  %3196 = vmatpush2.msra.mxu1 %v3127_v43 }
  0x5e   : > { %4469 = vmatmul.mubr.msk.f32.gmra.mxu1 %vm345_vm0, %v5472_v20  ;;  %3197 = vmatprep.subr.mxu1 %v9035_v4 }
  0x5f   : > { %4471 = vmatprep.mubr.msk.f32.mxu1 %vm345_vm0, %v5475_v21  ;;  %3198 = vmatpush2.msra.mxu1 %v3126_v46 }
  0x60   : > { %4133 = vmatmul.mubr.msk.f32.gmra.mxu0 %vm345_vm0, %v5369_v63  ;;  %3199 = vmatprep.subr.mxu1 %v9035_v4  ;;  %v3121_v63 = vld [vmem:[%s9032_s3 + $0xa8] sm:$0xff] }
  0x61   : > { %698 = vmatprep.mubr.f32.mxu0 %v9035_v4  ;;  %3200 = vmatpush2.msra.mxu1 %v3125_v50 }
  0x62   : > { %4472 = vmatmul.mubr.msk.f32.gmra.mxu1 %vm345_vm0, %v5489_v23  ;;  %4538 = vmatpush3.msra.mxu0 %v3141_v49 }
  0x63   : > { %4474 = vmatprep.mubr.msk.f32.mxu1 %vm345_vm0, %v5492_v24  ;;  %3201 = vmatprep.subr.mxu1 %v9035_v4 }
  0x64   : > { %4134 = vmatmul.mubr.msk.f32.gmra.mxu0 %vm345_vm0, %v5375_v1  ;;  %4539 = vmatprep.subr.mxu0 %v3140_v53  ;;  %v5719_v1 = vld [vmem:[%s5255_s10 + $0x1c0] sm:$0xff] }
  0x65   : > { %704 = vmatprep.mubr.f32.mxu0 %v9035_v4  ;;  %3202 = vmatpush2.msra.mxu1 %v3124_v54 }
  0x66   : > { %4475 = vmatmul.mubr.msk.f32.gmra.mxu1 %vm345_vm0, %v5506_v26  ;;  %4540 = vmatpush3.msra.mxu0 %v3140_v53 }
  0x67   : > { %4477 = vmatprep.mubr.msk.f32.mxu1 %vm345_vm0, %v5509_v27  ;;  %3203 = vmatprep.subr.mxu1 %v9035_v4 }
  0x68   : > { %4135 = vmatmul.mubr.msk.f32.gmra.mxu0 %vm345_vm0, %v5388_v3  ;;  %3204 = vmatpush2.msra.mxu1 %v3123_v57  ;;  %v5733_v3 = vld [vmem:[%s5255_s10 + $0x1c8] sm:$0xff] }
  0x69   : > { %710 = vmatprep.mubr.f32.mxu0 %v9035_v4  ;;  %3205 = vmatprep.subr.mxu1 %v9035_v4 }
  0x6a   : > { %4478 = vmatmul.mubr.msk.f32.gmra.mxu1 %vm345_vm0, %v5523_v29 }
  0x6b   : > { %4480 = vmatprep.mubr.msk.f32.mxu1 %vm345_vm0, %v5526_v30  ;;  %3206 = vmatpush2.msra.mxu1 %v3122_v60 }
  0x6c   : > { %4136 = vmatmul.mubr.msk.f32.gmra.mxu0 %vm345_vm0, %v5391_v5  ;;  %3207 = vmatprep.subr.mxu1 %v9035_v4  ;;  %v5736_v5 = vld [vmem:[%s5255_s10 + $0x1d0] sm:$0xff] }
  0x6d   : > { %716 = vmatprep.mubr.f32.mxu0 %v9035_v4  ;;  %3208 = vmatpush2.msra.mxu1 %v3121_v63 }
  0x6e   : > { %4481 = vmatmul.mubr.msk.f32.gmra.mxu1 %vm345_vm0, %v5540_v32  ;;  %3209 = vmatprep.subr.mxu1 %v9035_v4 }
  0x6f   : > { %4483 = vmatprep.mubr.msk.f32.mxu1 %vm345_vm0, %v5543_v33  ;;  %3210 = vmatpush2.msra.mxu1 %v3120_v2 }
  0x70   : > { %4137 = vmatmul.mubr.msk.f32.gmra.mxu0 %vm345_vm0, %v5404_v7  ;;  %v5750_v7 = vld [vmem:[%s5255_s10 + $0x1d8] sm:$0xff]  ;;  %3211 = vmatprep.subr.mxu1 %v9035_v4 }
  0x71   : > { %722 = vmatprep.mubr.f32.mxu0 %v9035_v4  ;;  %3212 = vmatpush2.msra.mxu1 %v3119_v6 }
  0x72   : > { %4484 = vmatmul.mubr.msk.f32.gmra.mxu1 %vm345_vm0, %v5557_v35  ;;  %3213 = vmatprep.subr.mxu1 %v9035_v4 }
  0x73   : > { %4486 = vmatprep.mubr.msk.f32.mxu1 %vm345_vm0, %v5560_v36  ;;  %3214 = vmatpush2.msra.mxu1 %v3118_v9 }
  0x74   : > { %4138 = vmatmul.mubr.msk.f32.gmra.mxu0 %vm345_vm0, %v5407_v8  ;;  %v5753_v8 = vld [vmem:[%s5255_s10 + $0x1e0] sm:$0xff]  ;;  %3215 = vmatprep.subr.mxu1 %v9035_v4 }
  0x75   : > { %728 = vmatprep.mubr.f32.mxu0 %v9035_v4 }
  0x76   : > { %4487 = vmatmul.mubr.msk.f32.gmra.mxu1 %vm345_vm0, %v5574_v38 }
  0x77   : > { %4489 = vmatprep.mubr.msk.f32.mxu1 %vm345_vm0, %v5577_v39 }
  0x78   : > { %4139 = vmatmul.mubr.msk.f32.gmra.mxu0 %vm345_vm0, %v5420_v10  ;;  %v3139_v10 = vld [vmem:[%s9032_s3 + $0x138] sm:$0xff] }
  0x79   : > { %734 = vmatprep.mubr.f32.mxu0 %v9035_v4  ;;  %4541 = vmatprep.subr.mxu0 %v3139_v10 }
  0x7a   : > { %4490 = vmatmul.mubr.msk.f32.gmra.mxu1 %vm345_vm0, %v5591_v41  ;;  %4542 = vmatpush3.msra.mxu0 %v3139_v10 }
  0x7b   : > { %4492 = vmatprep.mubr.msk.f32.mxu1 %vm345_vm0, %v5594_v42  ;;  %4543 = vmatprep.subr.mxu0 %v3138_v16 }
  0x7c   : > { %4140 = vmatmul.mubr.msk.f32.gmra.mxu0 %vm345_vm0, %v5423_v11  ;;  %v5770_v11 = vld [vmem:[%s5255_s10 + $0x1e8] sm:$0xff] }
  0x7d   : > { %740 = vmatprep.mubr.f32.mxu0 %v9035_v4  ;;  %4544 = vmatpush3.msra.mxu0 %v3138_v16 }
  0x7e   : > { %4493 = vmatmul.mubr.msk.f32.gmra.mxu1 %vm345_vm0, %v5608_v44 }
  0x7f   : > { %4495 = vmatprep.mubr.msk.f32.mxu1 %vm345_vm0, %v5611_v45 }
  0x80   : > { %4141 = vmatmul.mubr.msk.f32.gmra.mxu0 %vm345_vm0, %v5436_v13  ;;  %v3117_v13 = vld [vmem:[%s9032_s3 + $0x88] sm:$0xff] }
  0x81   : > { %746 = vmatprep.mubr.f32.mxu0 %v9035_v4  ;;  %3216 = vmatpush2.msra.mxu1 %v3117_v13 }
  0x82   : > { %4496 = vmatmul.mubr.msk.f32.gmra.mxu1 %vm345_vm0, %v5625_v47  ;;  %3217 = vmatprep.subr.mxu1 %v9035_v4 }
  0x83   : > { %4498 = vmatprep.mubr.msk.f32.mxu1 %vm345_vm0, %v5628_v48 }
  0x84   : > { %4142 = vmatmul.mubr.msk.f32.gmra.mxu0 %vm345_vm0, %v5442_v15  ;;  %v3116_v15 = vld [vmem:[%s9032_s3 + $0x80] sm:$0xff] }
  0x85   : > { %752 = vmatprep.mubr.f32.mxu0 %v9035_v4  ;;  %3218 = vmatpush2.msra.mxu1 %v3116_v15 }
  0x86   : > { %4499 = vmatmul.mubr.msk.f32.gmra.mxu1 %vm345_vm0, %v5645_v51 }
  0x87   : > { %4501 = vmatprep.mubr.msk.f32.mxu1 %vm345_vm0, %v5648_v52 }
  0x88   : > { %4143 = vmatmul.mubr.msk.f32.gmra.mxu0 %vm345_vm0, %v5455_v17  ;;  %v3137_v17 = vld [vmem:[%s9032_s3 + $0x128] sm:$0xff] }
  0x89   : > { %758 = vmatprep.mubr.f32.mxu0 %v9035_v4  ;;  %4545 = vmatprep.subr.mxu0 %v3137_v17 }
  0x8a   : > { %4502 = vmatmul.mubr.msk.f32.gmra.mxu1 %vm345_vm0, %v5665_v55  ;;  %4546 = vmatpush3.msra.mxu0 %v3137_v17 }
  0x8b   : > { %4504 = vmatprep.mubr.msk.f32.mxu1 %vm345_vm0, %v5668_v56 }
  0x8c   : > { %4144 = vmatmul.mubr.msk.f32.gmra.mxu0 %vm345_vm0, %v5458_v18  ;;  %v3136_v18 = vld [vmem:[%s9032_s3 + $0x120] sm:$0xff] }
  0x8d   : > { %764 = vmatprep.mubr.f32.mxu0 %v9035_v4  ;;  %4547 = vmatprep.subr.mxu0 %v3136_v18 }
  0x8e   : > { %4505 = vmatmul.mubr.msk.f32.gmra.mxu1 %vm345_vm0, %v5682_v58  ;;  %4548 = vmatpush3.msra.mxu0 %v3136_v18 }
  0x8f   : > { %4507 = vmatprep.mubr.msk.f32.mxu1 %vm345_vm0, %v5685_v59  ;;  %4549 = vmatprep.subr.mxu0 %v3135_v19 }
  0x90   : > { %4145 = vmatmul.mubr.msk.f32.gmra.mxu0 %vm345_vm0, %v5472_v20  ;;  %v3134_v20 = vld [vmem:[%s9032_s3 + $0x110] sm:$0xff] }
  0x91   : > { %770 = vmatprep.mubr.f32.mxu0 %v9035_v4  ;;  %4550 = vmatpush3.msra.mxu0 %v3135_v19 }
  0x92   : > { %4508 = vmatmul.mubr.msk.f32.gmra.mxu1 %vm345_vm0, %v5699_v61  ;;  %4551 = vmatprep.subr.mxu0 %v3134_v20 }
  0x93   : > { %4510 = vmatprep.mubr.msk.f32.mxu1 %vm345_vm0, %v5702_v62  ;;  %4552 = vmatpush3.msra.mxu0 %v3134_v20 }
  0x94   : > { %4146 = vmatmul.mubr.msk.f32.gmra.mxu0 %vm345_vm0, %v5475_v21  ;;  %v3133_v21 = vld [vmem:[%s9032_s3 + $0x108] sm:$0xff] }
  0x95   : > { %776 = vmatprep.mubr.f32.mxu0 %v9035_v4  ;;  %4553 = vmatprep.subr.mxu0 %v3133_v21 }
  0x96   : > { %4511 = vmatmul.mubr.msk.f32.gmra.mxu1 %vm345_vm0, %v5716_v0  ;;  %4554 = vmatpush3.msra.mxu0 %v3133_v21 }
  0x97   : > { %4513 = vmatprep.mubr.msk.f32.mxu1 %vm345_vm0, %v5719_v1  ;;  %4555 = vmatprep.subr.mxu0 %v3132_v22 }
  0x98   : > { %4147 = vmatmul.mubr.msk.f32.gmra.mxu0 %vm345_vm0, %v5489_v23  ;;  %v330_v23 = vlaneseq }
  0x99   : > { %782 = vmatprep.mubr.f32.mxu0 %v9035_v4  ;;  %4556 = vmatpush3.msra.mxu0 %v3132_v22 }
  0x9a   : > { %4514 = vmatmul.mubr.msk.f32.gmra.mxu1 %vm345_vm0, %v5733_v3 }
  0x9b   : > { %4516 = vmatprep.mubr.msk.f32.mxu1 %vm345_vm0, %v5736_v5 }
  0x9c   : > { %4148 = vmatmul.mubr.msk.f32.gmra.mxu0 %vm345_vm0, %v5492_v24  ;;  %v331_v24 = vshrl.u32 %v330_v23, 7 }
  0x9d   : > { %788 = vmatprep.mubr.f32.mxu0 %v9035_v4 }
  0x9e   : > { %4517 = vmatmul.mubr.msk.f32.gmra.mxu1 %vm345_vm0, %v5750_v7  ;;  %v332_v25 = vsub.s32 0, %v331_v24 }
  0x9f   : > { %4519 = vmatprep.mubr.msk.f32.mxu1 %vm345_vm0, %v5753_v8 }
  0xa0   : > { %4149 = vmatmul.mubr.msk.f32.gmra.mxu0 %vm345_vm0, %v5506_v26  ;;  %v328_v26 = vld [vmem:[%s9031_s2] sm:$0x7] }
  0xa1   : > { %794 = vmatprep.mubr.f32.mxu0 %v9035_v4  ;;  %v5865_v28 = vrot.slane %v328_v26, %v332_v25 }
  0xa2   : > { %4520 = vmatmul.mubr.msk.f32.gmra.mxu1 %vm345_vm0, %v5770_v11 }
  0xa3   : > { %4522 = vmatprep.mubr.msk.f32.mxu1 %vm345_vm0, %v5773_v12 }
  0xa4   : > { %4150 = vmatmul.mubr.msk.f32.gmra.mxu0 %vm345_vm0, %v5509_v27  ;;  %v336_v27 = vsub.s32 1, %v331_v24 }
  0xa5   : > { %800 = vmatprep.mubr.f32.mxu0 %v9035_v4 }
  0xa6   : > { %4523 = vmatmul.mubr.msk.f32.gmra.mxu1 %vm345_vm0, %v5787_v14 }
  0xa8   : > { %4151 = vmatmul.mubr.msk.f32.gmra.mxu0 %vm345_vm0, %v5523_v29  ;;  %v5867_v29 = vrot.slane %v328_v26, %v336_v27 }
  0xa9   : > { %806 = vmatprep.mubr.f32.mxu0 %v9035_v4 }
  0xac   : > { %4152 = vmatmul.mubr.msk.f32.gmra.mxu0 %vm345_vm0, %v5526_v30 }
  0xad   : > { %812 = vmatprep.mubr.f32.mxu0 %v9035_v4 }
  0xb0   : > { %4153 = vmatmul.mubr.msk.f32.gmra.mxu0 %vm345_vm0, %v5540_v32 }
  0xb1   : > { %818 = vmatprep.mubr.f32.mxu0 %v9035_v4 }
  0xb4   : > { %4154 = vmatmul.mubr.msk.f32.gmra.mxu0 %vm345_vm0, %v5543_v33  ;;  %v340_v33 = vsub.s32 2, %v331_v24 }
  0xb5   : > { %824 = vmatprep.mubr.f32.mxu0 %v9035_v4 }
  0xb8   : > { %4155 = vmatmul.mubr.msk.f32.gmra.mxu0 %vm345_vm0, %v5557_v35 }
  0xb9   : > { %830 = vmatprep.mubr.f32.mxu0 %v9035_v4 }
  0xbc   : > { %4156 = vmatmul.mubr.msk.f32.gmra.mxu0 %vm345_vm0, %v5560_v36 }
  0xbd   : > { %836 = vmatprep.mubr.f32.mxu0 %v9035_v4 }
  0xc0   : > { %4157 = vmatmul.mubr.msk.f32.gmra.mxu0 %vm345_vm0, %v5574_v38 }
  0xc1   : > { %842 = vmatprep.mubr.f32.mxu0 %v9035_v4 }
  0xc4   : > { %4158 = vmatmul.mubr.msk.f32.gmra.mxu0 %vm345_vm0, %v5577_v39 }
  0xc5   : > { %848 = vmatprep.mubr.f32.mxu0 %v9035_v4 }
  0xc8   : > { %4159 = vmatmul.mubr.msk.f32.gmra.mxu0 %vm345_vm0, %v5591_v41  ;;  %v5889_v41 = vrot.slane %v328_v26, %v340_v33 }
  0xc9   : > { %854 = vmatprep.mubr.f32.mxu0 %v9035_v4 }
  0xcc   : > { %4160 = vmatmul.mubr.msk.f32.gmra.mxu0 %vm345_vm0, %v5594_v42 }
  0xcd   : > { %860 = vmatprep.mubr.f32.mxu0 %v9035_v4 }
  0xd0   : > { %4161 = vmatmul.mubr.msk.f32.gmra.mxu0 %vm345_vm0, %v5608_v44 }
  0xd1   : > { %866 = vmatprep.mubr.f32.mxu0 %v9035_v4 }
  0xd4   : > { %4162 = vmatmul.mubr.msk.f32.gmra.mxu0 %vm345_vm0, %v5611_v45 }
  0xd5   : > { %872 = vmatprep.mubr.f32.mxu0 %v9035_v4 }
  0xd8   : > { %4163 = vmatmul.mubr.msk.f32.gmra.mxu0 %vm345_vm0, %v5625_v47 }
  0xd9   : > { %878 = vmatprep.mubr.f32.mxu0 %v9035_v4 }
  0xdc   : > { %4164 = vmatmul.mubr.msk.f32.gmra.mxu0 %vm345_vm0, %v5628_v48 }
  0xdd   : > { %884 = vmatprep.mubr.f32.mxu0 %v9035_v4 }
  0xe0   : > { %4165 = vmatmul.mubr.msk.f32.gmra.mxu0 %vm345_vm0, %v5645_v51 }
  0xe1   : > { %890 = vmatprep.mubr.f32.mxu0 %v9035_v4 }
  0xe4   : > { %v604_v30 = vpop.f32.mrf.mxu0  ;;  %4166 = vmatmul.mubr.msk.f32.gmra.mxu0 %vm345_vm0, %v5648_v52 }
  0xe5   : > { %v5872_v31 = vadd.f32 %v604_v30, %v5865_v28  ;;  %896 = vmatprep.mubr.f32.mxu0 %v9035_v4 }
  0xe6   : > { %v606_v32 = vpop.f32.mrf.mxu0 }
  0xe7   : > { %v1372_v34 = vmul.f32 %v5872_v31, %v5872_v31  ;;  %v5878_v35 = vadd.f32 %v606_v32, %v5867_v29 }
  0xe8   : > { %v610_v36 = vpop.f32.mrf.mxu0  ;;  %4167 = vmatmul.mubr.msk.f32.gmra.mxu0 %vm345_vm0, %v5665_v55 }
  0xe9   : > { %v1564_v37 = vmul.f32 %v1372_v34, %v5872_v31  ;;  %v1373_v38 = vmul.f32 %v5878_v35, %v5878_v35  ;;  %v5886_v39 = vadd.f32 %v610_v36, %v5865_v28  ;;  %902 = vmatprep.mubr.f32.mxu0 %v9035_v4 }
  0xea   : > { %v612_v40 = vpop.f32.mrf.mxu0  ;;  %v4431_v47 = vpop.f32.mrf.mxu1 }
  0xeb   : > { %v1756_v42 = vmul.f32 0.044715, %v1564_v37  ;;  %v1565_v43 = vmul.f32 %v1373_v38, %v5878_v35  ;;  %v1375_v44 = vmul.f32 %v5886_v39, %v5886_v39  ;;  %v5895_v45 = vadd.f32 %v612_v40, %v5867_v29 }
  0xec   : > { %v616_v46 = vpop.f32.mrf.mxu0  ;;  %4168 = vmatmul.mubr.msk.f32.gmra.mxu0 %vm345_vm0, %v5668_v56  ;;  %v5908_v54 = vadd.f32 %v4431_v47, %v5889_v41  ;;  %v1053_v55 = vpop.f32.mrf.mxu1 }
  0xed   : > { %v1948_v48 = vadd.f32 %v1756_v42, %v5872_v31  ;;  %v1757_v49 = vmul.f32 0.044715, %v1565_v43  ;;  %v1567_v50 = vmul.f32 %v1375_v44, %v5886_v39  ;;  %v1376_v51 = vmul.f32 %v5895_v45, %v5895_v45  ;;  %908 = vmatprep.mubr.f32.mxu0 %v9035_v4 }
  0xee   : > { %v5905_v52 = vadd.f32 %v616_v46, %v5865_v28  ;;  %v618_v53 = vpop.f32.mrf.mxu0  ;;  %v1377_v10 = vmul.f32 %v5908_v54, %v5908_v54  ;;  %v5922_v13 = vadd.f32 %v1053_v55, %v5889_v41 }
  0xef   : > { %v2140_v56 = vmul.f32 0.7978846, %v1948_v48  ;;  %v1949_v57 = vadd.f32 %v1757_v49, %v5878_v35  ;;  %v1759_v60 = vmul.f32 0.044715, %v1567_v50  ;;  %v1568_v63 = vmul.f32 %v1376_v51, %v5895_v45 }
  0xf0   : > { %v1378_v2 = vmul.f32 %v5905_v52, %v5905_v52  ;;  %v5915_v6 = vadd.f32 %v618_v53, %v5867_v29  ;;  %v622_v9 = vpop.f32.mrf.mxu0  ;;  %4169 = vmatmul.mubr.msk.f32.gmra.mxu0 %vm345_vm0, %v5682_v58  ;;  %9152 = vst [vmem:[#allocation2_spill] sm:$0xff] %v5922_v13  ;;  %v1569_v20 = vmul.f32 %v1377_v10, %v5908_v54 }
  0xf1   : > { %4662 = vtanh.f32 %v2140_v56  ;;  %v1951_v15 = vadd.f32 %v1759_v60, %v5886_v39  ;;  %v1760_v16 = vmul.f32 0.044715, %v1568_v63  ;;  %914 = vmatprep.mubr.f32.mxu0 %v9035_v4  ;;  %v5930_v19 = vadd.f32 %v622_v9, %v5865_v28 }
  0xf2   : > { %v1570_v17 = vmul.f32 %v1378_v2, %v5905_v52  ;;  %v1379_v18 = vmul.f32 %v5915_v6, %v5915_v6  ;;  %v624_v58 = vpop.f32.mrf.mxu0  ;;  %v5933_v21 = vmul.f32 0.7978846, %v1949_v57  ;;  %v1374_v24 = vmul.f32 %v5922_v13, %v5922_v13 }
  0xf3   : > { %v2143_v22 = vmul.f32 0.7978846, %v1951_v15  ;;  %v5936_v23 = vadd.f32 %v624_v58, %v5867_v29  ;;  %v1381_v27 = vmul.f32 %v5930_v19, %v5930_v19  ;;  %v1761_v32 = vmul.f32 0.044715, %v1569_v20 }
  0xf4   : > { %v1762_v25 = vmul.f32 0.044715, %v1570_v17  ;;  %v1571_v26 = vmul.f32 %v1379_v18, %v5915_v6  ;;  %v628_v30 = vpop.f32.mrf.mxu0  ;;  %4170 = vmatmul.mubr.msk.f32.gmra.mxu0 %vm345_vm0, %v5685_v59  ;;  %v1952_v33 = vadd.f32 %v1760_v16, %v5895_v45  ;;  %v1566_v47 = vmul.f32 %v1374_v24, %v5922_v13 }
  0xf5   : > { %4664 = vtanh.f32 %v2143_v22  ;;  %v1382_v34 = vmul.f32 %v5936_v23, %v5936_v23  ;;  %v5949_v36 = vadd.f32 %v628_v30, %v5865_v28  ;;  %920 = vmatprep.mubr.f32.mxu0 %v9035_v4  ;;  %v1573_v40 = vmul.f32 %v1381_v27, %v5930_v19 }
  0xf6   : > { %v1954_v37 = vadd.f32 %v1762_v25, %v5905_v52  ;;  %v1763_v38 = vmul.f32 0.044715, %v1571_v26  ;;  %v630_v42 = vpop.f32.mrf.mxu0  ;;  %v1953_v59 = vadd.f32 %v1761_v32, %v5908_v54  ;;  %v5972_v63 = vmul.f32 0.7978846, %v1952_v33 }
  0xf7   : > { %v1574_v43 = vmul.f32 %v1382_v34, %v5936_v23  ;;  %v1384_v44 = vmul.f32 %v5949_v36, %v5949_v36  ;;  %v5959_v46 = vadd.f32 %v630_v42, %v5867_v29  ;;  %v1765_v50 = vmul.f32 0.044715, %v1573_v40 }
  0xf8   : > { %v2146_v48 = vmul.f32 0.7978846, %v1954_v37  ;;  %v1955_v49 = vadd.f32 %v1763_v38, %v5915_v6  ;;  %v634_v51 = vpop.f32.mrf.mxu0  ;;  %4171 = vmatmul.mubr.msk.f32.gmra.mxu0 %vm345_vm0, %v5699_v61  ;;  %v2145_v53 = vmul.f32 0.7978846, %v1953_v59  ;;  %v1758_v10 = vmul.f32 0.044715, %v1566_v47  ;;  %v4434_v59 = vpop.f32.mrf.mxu1 }
  0xf9   : > { %v1766_v55 = vmul.f32 0.044715, %v1574_v43  ;;  %v1576_v56 = vmul.f32 %v1384_v44, %v5949_v36  ;;  %v1385_v57 = vmul.f32 %v5959_v46, %v5959_v46  ;;  %v5969_v60 = vadd.f32 %v634_v51, %v5865_v28  ;;  %926 = vmatprep.mubr.f32.mxu0 %v9035_v4 }
  0xfa   : > { %4666 = vtanh.f32 %v2146_v48  ;;  %v1957_v2 = vadd.f32 %v1765_v50, %v5930_v19  ;;  %v636_v9 = vpop.f32.mrf.mxu0  ;;  %v5979_v18 = vmul.f32 0.7978846, %v1955_v49  ;;  %v1950_v27 = vadd.f32 %v1758_v10, %v5922_v13 }
  0xfb   : > { %v1958_v61 = vadd.f32 %v1766_v55, %v5936_v23  ;;  %v1768_v15 = vmul.f32 0.044715, %v1576_v56  ;;  %v1577_v16 = vmul.f32 %v1385_v57, %v5959_v46  ;;  %v1387_v17 = vmul.f32 %v5969_v60, %v5969_v60 }
  0xfc   : > { %v2149_v58 = vmul.f32 0.7978846, %v1957_v2  ;;  %v5982_v20 = vadd.f32 %v636_v9, %v5867_v29  ;;  %v640_v22 = vpop.f32.mrf.mxu0  ;;  %4172 = vmatmul.mubr.msk.f32.gmra.mxu0 %vm345_vm0, %v5702_v62  ;;  %4668 = vtanh.f32 %v2145_v53  ;;  %v6007_v49 = vadd.f32 %v4434_v59, %v5889_v41 }
  0xfd   : > { %v1960_v24 = vadd.f32 %v1768_v15, %v5949_v36  ;;  %v1769_v25 = vmul.f32 0.044715, %v1577_v16  ;;  %v1579_v26 = vmul.f32 %v1387_v17, %v5969_v60  ;;  %932 = vmatprep.mubr.f32.mxu0 %v9035_v4  ;;  %v5990_v32 = vmul.f32 0.7978846, %v1958_v61 }
  0xfe   : > { %v4663_v30 = vpop.eup %4662  ;;  %4670 = vtanh.f32 %v2149_v58  ;;  %v1388_v33 = vmul.f32 %v5982_v20, %v5982_v20  ;;  %v5995_v34 = vadd.f32 %v640_v22, %v5865_v28  ;;  %v642_v62 = vpop.f32.mrf.mxu0  ;;  %9154 = vst [vmem:[#allocation4_spill] sm:$0xff] %v6007_v49  ;;  %v6010_v53 = vmul.f32 0.7978846, %v1950_v27 }
  0xff   : > { %v2524_v37 = vadd.f32 1.0, %v4663_v30  ;;  %v2152_v38 = vmul.f32 0.7978846, %v1960_v24  ;;  %v1961_v40 = vadd.f32 %v1769_v25, %v5959_v46  ;;  %v1771_v42 = vmul.f32 0.044715, %v1579_v26 }
 0x100   : > { %v1580_v43 = vmul.f32 %v1388_v33, %v5982_v20  ;;  %v1390_v44 = vmul.f32 %v5995_v34, %v5995_v34  ;;  %v6002_v47 = vadd.f32 %v642_v62, %v5867_v29  ;;  %v646_v48 = vpop.f32.mrf.mxu0  ;;  %4173 = vmatmul.mubr.msk.f32.gmra.mxu0 %vm345_vm0, %v5716_v0  ;;  %v1383_v16 = vmul.f32 %v6007_v49, %v6007_v49  ;;  %v1063_v33 = vpop.f32.mrf.mxu1 }
 0x101   : > { %v2716_v50 = vmul.f32 0.5, %v2524_v37  ;;  %4672 = vtanh.f32 %v2152_v38  ;;  %v1963_v51 = vadd.f32 %v1771_v42, %v5969_v60  ;;  %938 = vmatprep.mubr.f32.mxu0 %v9035_v4  ;;  %v6019_v0 = vadd.f32 %v646_v48, %v5865_v28 }
 0x102   : > { %9153 = vst [vmem:[#allocation3_spill] sm:$0xff] %v6002_v47  ;;  %v6013_v55 = vpop.eup %4664  ;;  %v1772_v56 = vmul.f32 0.044715, %v1580_v43  ;;  %v1582_v57 = vmul.f32 %v1390_v44, %v5995_v34  ;;  %v1391_v2 = vmul.f32 %v6002_v47, %v6002_v47  ;;  %v648_v9 = vpop.f32.mrf.mxu0  ;;  %v6021_v10 = vmul.f32 0.7978846, %v1961_v40 }
 0x103   : > { %v2155_v61 = vmul.f32 0.7978846, %v1963_v51  ;;  %v6024_v15 = vadd.f32 %v648_v9, %v5867_v29  ;;  %v6029_v17 = vmul.f32 %v2716_v50, %v5872_v31  ;;  %v1393_v24 = vmul.f32 %v6019_v0, %v6019_v0 }
 0x104   : > { %v1774_v58 = vmul.f32 0.044715, %v1582_v57  ;;  %v1583_v22 = vmul.f32 %v1391_v2, %v6002_v47  ;;  %v652_v25 = vpop.f32.mrf.mxu0  ;;  %4174 = vmatmul.mubr.msk.f32.gmra.mxu0 %vm345_vm0, %v5719_v1  ;;  %v1964_v26 = vadd.f32 %v1772_v56, %v5982_v20  ;;  %v1575_v31 = vmul.f32 %v1383_v16, %v6007_v49 }
 0x105   : > { %9155 = vst [vmem:[#allocation5_spill] sm:$0xff] %v6024_v15  ;;  %v1394_v27 = vmul.f32 %v6024_v15, %v6024_v15  ;;  %v6040_v30 = vadd.f32 %v652_v25, %v5865_v28  ;;  %944 = vmatprep.mubr.f32.mxu0 %v9035_v4  ;;  %4674 = vtanh.f32 %v2155_v61  ;;  %v1585_v38 = vmul.f32 %v1393_v24, %v6019_v0 }
 0x106   : > { %v1966_v62 = vadd.f32 %v1774_v58, %v5995_v34  ;;  %v1775_v37 = vmul.f32 0.044715, %v1583_v22  ;;  %v654_v1 = vpop.f32.mrf.mxu0  ;;  %v1767_v43 = vmul.f32 0.044715, %v1575_v31  ;;  %v6056_v56 = vadd.f32 %v1063_v33, %v5889_v41  ;;  %v4437_v22 = vpop.f32.mrf.mxu1 }
 0x107   : > { %9156 = vst [vmem:[#allocation6_spill] sm:$0xff] %v6040_v30  ;;  %v6046_v40 = vpop.eup %4666  ;;  %v1586_v42 = vmul.f32 %v1394_v27, %v6024_v15  ;;  %v1396_v59 = vmul.f32 %v6040_v30, %v6040_v30  ;;  %v6052_v44 = vadd.f32 %v654_v1, %v5867_v29  ;;  %v1777_v51 = vmul.f32 0.044715, %v1585_v38 }
 0x108   : > { %v2158_v48 = vmul.f32 0.7978846, %v1966_v62  ;;  %v1967_v50 = vadd.f32 %v1775_v37, %v6002_v47  ;;  %9158 = vst [vmem:[#allocation8_spill] sm:$0xff] %v6056_v56  ;;  %v658_v57 = vpop.f32.mrf.mxu0  ;;  %4175 = vmatmul.mubr.msk.f32.gmra.mxu0 %vm345_vm0, %v5733_v3  ;;  %v1959_v16 = vadd.f32 %v1767_v43, %v6007_v49  ;;  %v6065_v24 = vmul.f32 0.7978846, %v1964_v26 }
 0x109   : > { %9157 = vst [vmem:[#allocation7_spill] sm:$0xff] %v6052_v44  ;;  %v4669_v2 = vpop.eup %4668  ;;  %v1778_v9 = vmul.f32 0.044715, %v1586_v42  ;;  %v1588_v61 = vmul.f32 %v1396_v59, %v6040_v30  ;;  %v1397_v58 = vmul.f32 %v6052_v44, %v6052_v44  ;;  %950 = vmatprep.mubr.f32.mxu0 %v9035_v4  ;;  %v1969_v25 = vadd.f32 %v1777_v51, %v6019_v0 }
 0x10a   : > { %4676 = vtanh.f32 %v2158_v48  ;;  %v2529_v27 = vadd.f32 1.0, %v4669_v2  ;;  %v660_v31 = vpop.f32.mrf.mxu0  ;;  %v2151_v37 = vmul.f32 0.7978846, %v1959_v16  ;;  %v6072_v1 = vmul.f32 0.7978846, %v1967_v50  ;;  %v1073_v2 = vpop.f32.mrf.mxu1 }
 0x10b   : > { %v6068_v3 = vpop.eup %4670  ;;  %v1970_v33 = vadd.f32 %v1778_v9, %v6024_v15  ;;  %v1780_v62 = vmul.f32 0.044715, %v1588_v61  ;;  %v1589_v38 = vmul.f32 %v1397_v58, %v6052_v44  ;;  %v2161_v42 = vmul.f32 0.7978846, %v1969_v25 }
 0x10c   : > { %v1380_v26 = vmul.f32 %v6056_v56, %v6056_v56  ;;  %4678 = vtanh.f32 %v5933_v21  ;;  %v664_v59 = vpop.f32.mrf.mxu0  ;;  %4176 = vmatmul.mubr.msk.f32.gmra.mxu0 %vm345_vm0, %v5736_v5  ;;  %v2721_v43 = vmul.f32 0.5, %v2529_v27  ;;  %v6087_v21 = vadd.f32 %v658_v57, %v5865_v28 }
 0x10d   : > { %v1972_v48 = vadd.f32 %v1780_v62, %v6040_v30  ;;  %4680 = vtanh.f32 %v2151_v37  ;;  %v1781_v51 = vmul.f32 0.044715, %v1589_v38  ;;  %956 = vmatprep.mubr.f32.mxu0 %v9035_v4  ;;  %v6083_v9 = vmul.f32 0.7978846, %v1970_v33 }
 0x10e   : > { %v6081_v50 = vpop.eup %4672  ;;  %4682 = vtanh.f32 %v2161_v42  ;;  %v1572_v61 = vmul.f32 %v1380_v26, %v6056_v56  ;;  %9159 = vst [vmem:[#allocation9_spill] sm:$0xff] %v6087_v21  ;;  %v666_v16 = vpop.f32.mrf.mxu0  ;;  %v6091_v25 = vadd.f32 %v4437_v22, %v5889_v41  ;;  %v6094_v27 = vadd.f32 %v660_v31, %v5867_v29 }
 0x10f   : > { %v2164_v5 = vmul.f32 0.7978846, %v1972_v48  ;;  %v1973_v58 = vadd.f32 %v1781_v51, %v6052_v44  ;;  %v1399_v33 = vmul.f32 %v6087_v21, %v6087_v21  ;;  %v6099_v37 = vadd.f32 %v1073_v2, %v5889_v41 }
 0x110   : > { %9160 = vst [vmem:[#allocation10_spill] sm:$0xff] %v6094_v27  ;;  %v1764_v62 = vmul.f32 0.044715, %v1572_v61  ;;  %4684 = vtanh.f32 %v5972_v63  ;;  %v6102_v57 = vpop.f32.mrf.mxu0  ;;  %4177 = vmatmul.mubr.msk.f32.gmra.mxu0 %vm345_vm0, %v5750_v7  ;;  %v6107_v22 = vmul.f32 %v2721_v43, %v5908_v54  ;;  %v1389_v31 = vmul.f32 %v6091_v25, %v6091_v25  ;;  %v4440_v54 = vpop.f32.mrf.mxu1 }
 0x111   : > { %9161 = vst [vmem:[#allocation11_spill] sm:$0xff] %v6099_v37  ;;  %4686 = vtanh.f32 %v2164_v5  ;;  %v1400_v38 = vmul.f32 %v6094_v27, %v6094_v27  ;;  %962 = vmatprep.mubr.f32.mxu0 %v9035_v4  ;;  %v1591_v63 = vmul.f32 %v1399_v33, %v6087_v21  ;;  %v1386_v26 = vmul.f32 %v6099_v37, %v6099_v37 }
 0x112   : > { %9162 = vst [vmem:[#allocation12_spill] sm:$0xff] %v6107_v22  ;;  %v1956_v42 = vadd.f32 %v1764_v62, %v6056_v56  ;;  %v6119_v7 = vadd.f32 %v664_v59, %v5865_v28  ;;  %v6121_v43 = vpop.f32.mrf.mxu0  ;;  %v6123_v48 = vpop.eup %4674  ;;  %v1581_v51 = vmul.f32 %v1389_v31, %v6091_v25  ;;  %v6128_v61 = vadd.f32 %v4440_v54, %v5889_v41 }
 0x113   : > { %v1592_v2 = vmul.f32 %v1400_v38, %v6094_v27  ;;  %v2527_v5 = vadd.f32 1.0, %v6013_v55  ;;  %v6131_v62 = vmul.f32 0.7978846, %v1973_v58  ;;  %v1783_v33 = vmul.f32 0.044715, %v1591_v63  ;;  %v1083_v49 = vpop.f32.mrf.mxu1 }
 0x114   : > { %9163 = vst [vmem:[#allocation13_spill] sm:$0xff] %v6119_v7  ;;  %9164 = vst [vmem:[#allocation14_spill] sm:$0xff] %v6128_v61  ;;  %v1578_v59 = vmul.f32 %v1386_v26, %v6099_v37  ;;  %v1402_v4 = vmul.f32 %v6119_v7, %v6119_v7  ;;  %v6136_v56 = vpop.f32.mrf.mxu0  ;;  %4178 = vmatmul.mubr.msk.f32.gmra.mxu0 %vm345_vm0, %v5753_v8  ;;  %v1773_v31 = vmul.f32 0.044715, %v1581_v51  ;;  %v9165_v55 = vmov 0.0  }
 0x115   : > { %v1784_v38 = vmul.f32 0.044715, %v1592_v2  ;;  %v1395_v54 = vmul.f32 %v6128_v61, %v6128_v61  ;;  %v2719_v44 = vmul.f32 0.5, %v2527_v5  ;;  %968 = vmatprep.mubr.f32.mxu0 %v9165_v55  ;;  %v1975_v58 = vadd.f32 %v1783_v33, %v6087_v21 }
 0x116   : > { %v1770_v63 = vmul.f32 0.044715, %v1578_v59  ;;  %v1594_v26 = vmul.f32 %v1402_v4, %v6119_v7  ;;  %v6146_v22 = vadd.f32 %v666_v16, %v5867_v29  ;;  %v6148_v13 = vpop.f32.mrf.mxu0  ;;  %v6152_v51 = vmul.f32 0.7978846, %v1956_v42 }
 0x117   : > { %v6150_v8 = vpop.eup %4676  ;;  %v1965_v2 = vadd.f32 %v1773_v31, %v6091_v25  ;;  %v1976_v5 = vadd.f32 %v1784_v38, %v6094_v27  ;;  %v1587_v15 = vmul.f32 %v1395_v54, %v6128_v61  ;;  %v2167_v33 = vmul.f32 0.7978846, %v1975_v58 }
 0x118   : > { %9166 = vst [vmem:[#allocation15_spill] sm:$0xff] %v6146_v22  ;;  %v1962_v59 = vadd.f32 %v1770_v63, %v6099_v37  ;;  %v1786_v4 = vmul.f32 0.044715, %v1594_v26  ;;  %v1403_v16 = vmul.f32 %v6146_v22, %v6146_v22  ;;  %v6160_v21 = vpop.f32.mrf.mxu0  ;;  %4179 = vmatmul.mubr.msk.f32.gmra.mxu0 %vm345_vm0, %v5770_v11  ;;  %v6165_v31 = vmul.f32 %v2719_v44, %v5886_v39  ;;  %v4443_v11 = vpop.f32.mrf.mxu1 }
 0x119   : > { %v4679_v42 = vpop.eup %4678  ;;  %v2157_v30 = vmul.f32 0.7978846, %v1965_v2  ;;  %v1779_v47 = vmul.f32 0.044715, %v1587_v15  ;;  %v6168_v38 = vadd.f32 %v1083_v49, %v5889_v41  ;;  %974 = vmatprep.mubr.f32.mxu0 %v9165_v55  ;;  %4688 = vtanh.f32 %v2167_v33 }
 0x11a   : > { %v6171_v54 = vpop.eup %4680  ;;  %v2525_v58 = vadd.f32 1.0, %v4679_v42  ;;  %v6173_v63 = vmul.f32 0.7978846, %v1976_v5  ;;  %v1978_v26 = vadd.f32 %v1786_v4, %v6119_v7  ;;  %v6176_v37 = vpop.f32.mrf.mxu0  ;;  %v6180_v39 = vmul.f32 0.7978846, %v1962_v59 }
 0x11b   : > { %9167 = vst [vmem:[#allocation16_spill] sm:$0xff] %v6168_v38  ;;  %v6178_v15 = vpop.eup %4682  ;;  %v1971_v49 = vadd.f32 %v1779_v47, %v6128_v61  ;;  %v1595_v44 = vmul.f32 %v1403_v16, %v6146_v22  ;;  %v1392_v2 = vmul.f32 %v6168_v38, %v6168_v38  ;;  %4690 = vtanh.f32 %v5979_v18 }
 0x11c   : > { %v2717_v42 = vmul.f32 0.5, %v2525_v58  ;;  %v2170_v33 = vmul.f32 0.7978846, %v1978_v26  ;;  %v6189_v5 = vadd.f32 %v6102_v57, %v5865_v28  ;;  %v6191_v4 = vpop.f32.mrf.mxu0  ;;  %4180 = vmatmul.mubr.msk.f32.gmra.mxu0 %vm345_vm0, %v5773_v12  ;;  %v6197_v61 = vadd.f32 %v4443_v11, %v5889_v41  ;;  %v1093_v12 = vpop.f32.mrf.mxu1 }
 0x11d   : > { %v4685_v59 = vpop.eup %4684  ;;  %v2163_v47 = vmul.f32 0.7978846, %v1971_v49  ;;  %v1787_v27 = vmul.f32 0.044715, %v1595_v44  ;;  %v1584_v16 = vmul.f32 %v1392_v2, %v6168_v38  ;;  %980 = vmatprep.mubr.f32.mxu0 %v9165_v55  ;;  %4692 = vtanh.f32 %v2157_v30 }
 0x11e   : > { %9168 = vst [vmem:[#allocation17_spill] sm:$0xff] %v6189_v5  ;;  %9169 = vst [vmem:[#allocation18_spill] sm:$0xff] %v6197_v61  ;;  %v6200_v18 = vpop.eup %4686  ;;  %v2909_v57 = vmul.f32 %v2717_v42, %v5878_v35  ;;  %v2528_v58 = vadd.f32 1.0, %v4685_v59  ;;  %v1405_v26 = vmul.f32 %v6189_v5, %v6189_v5  ;;  %v6205_v7 = vpop.f32.mrf.mxu0  ;;  %4694 = vtanh.f32 %v2170_v33 }
 0x11f   : > { %v1979_v49 = vadd.f32 %v1787_v27, %v6146_v22  ;;  %v1776_v44 = vmul.f32 0.044715, %v1584_v16  ;;  %v1401_v11 = vmul.f32 %v6197_v61, %v6197_v61  ;;  %v2530_v35 = vadd.f32 1.0, %v6046_v40 }
 0x120   : > { %3219 = vmatprep.mubr.f32.mxu1 %v2909_v57  ;;  %v2720_v55 = vmul.f32 0.5, %v2528_v58  ;;  %v1597_v2 = vmul.f32 %v1405_v26, %v6189_v5  ;;  %v6214_v30 = vadd.f32 %v6121_v43, %v5867_v29  ;;  %v6216_v42 = vpop.f32.mrf.mxu0  ;;  %4181 = vmatmul.mubr.msk.f32.gmra.mxu0 %vm345_vm0, %v5787_v14  ;;  %4696 = vtanh.f32 %v2163_v47  ;;  %v4446_v26 = vpop.f32.mrf.mxu1 }
 0x121   : > { %3220 = vmatmul.mubr.f32.vlgmr.msra.gmra.mxu1 %v6029_v17  ;;  %v1968_v27 = vadd.f32 %v1776_v44, %v6168_v38  ;;  %v1593_v33 = vmul.f32 %v1401_v11, %v6197_v61  ;;  %v6224_v59 = vadd.f32 %v1093_v12, %v5889_v41  ;;  %v6227_v16 = vmul.f32 0.7978846, %v1979_v49 }
 0x122   : > { %9170 = vst [vmem:[#allocation19_spill] sm:$0xff] %v6214_v30  ;;  %v2912_v40 = vmul.f32 %v2720_v55, %v5895_v45  ;;  %v1789_v43 = vmul.f32 0.044715, %v1597_v2  ;;  %v1406_v57 = vmul.f32 %v6214_v30, %v6214_v30  ;;  %v6231_v58 = vpop.f32.mrf.mxu0  ;;  %v2722_v17 = vmul.f32 0.5, %v2530_v35 }
 0x123   : > { %9171 = vst [vmem:[#allocation20_spill] sm:$0xff] %v6224_v59  ;;  %v1785_v14 = vmul.f32 0.044715, %v1593_v33  ;;  %v1398_v47 = vmul.f32 %v6224_v59, %v6224_v59  ;;  %4698 = vtanh.f32 %v5990_v32  ;;  %v6236_v12 = vmul.f32 0.7978846, %v1968_v27 }
 0x124   : > { %3224 = vmatprep.mubr.f32.mxu1 %v2912_v40  ;;  %v1981_v45 = vadd.f32 %v1789_v43, %v6189_v5  ;;  %v1598_v49 = vmul.f32 %v1406_v57, %v6214_v30  ;;  %v6242_v44 = vadd.f32 %v6136_v56, %v5865_v28  ;;  %v6244_v11 = vpop.f32.mrf.mxu0  ;;  %v6250_v2 = vadd.f32 %v4446_v26, %v5889_v41 }
 0x125   : > { %9172 = vst [vmem:[#allocation21_spill] sm:$0xff] %v6236_v12  ;;  %3225 = vmatmul.mubr.f32.gmra.mxu1 %v6165_v31  ;;  %v1977_v55 = vadd.f32 %v1785_v14, %v6197_v61  ;;  %v1590_v32 = vmul.f32 %v1398_v47, %v6224_v59  ;;  %v2533_v35 = vadd.f32 1.0, %v6068_v3  ;;  %v6257_v56 = vadd.f32 %v6148_v13, %v5867_v29  ;;  %v1103_v3 = vpop.f32.mrf.mxu1 }
 0x126   : > { %9173 = vst [vmem:[#allocation22_spill] sm:$0xff] %v6242_v44  ;;  %9174 = vst [vmem:[#allocation23_spill] sm:$0xff] %v6250_v2  ;;  %v2173_v27 = vmul.f32 0.7978846, %v1981_v45  ;;  %v1790_v33 = vmul.f32 0.044715, %v1598_v49  ;;  %v1408_v40 = vmul.f32 %v6242_v44, %v6242_v44  ;;  %v6259_v43 = vpop.f32.mrf.mxu0  ;;  %v6261_v31 = vpop.eup %4688  ;;  %v1407_v47 = vmul.f32 %v6250_v2, %v6250_v2 }
 0x127   : > { %9175 = vst [vmem:[#allocation24_spill] sm:$0xff] %v6257_v56  ;;  %v2169_v57 = vmul.f32 0.7978846, %v1977_v55  ;;  %v1782_v14 = vmul.f32 0.044715, %v1590_v32  ;;  %v2725_v26 = vmul.f32 0.5, %v2533_v35  ;;  %v1409_v13 = vmul.f32 %v6257_v56, %v6257_v56 }
 0x128   : > { %4700 = vtanh.f32 %v2173_v27  ;;  %v1982_v45 = vadd.f32 %v1790_v33, %v6214_v30  ;;  %v1600_v49 = vmul.f32 %v1408_v40, %v6242_v44  ;;  %v6269_v61 = vpop.f32.mrf.mxu0  ;;  %v4691_v38 = vpop.eup %4690  ;;  %v2914_v55 = vmul.f32 %v2722_v17, %v5905_v52 }
 0x129   : > { %4702 = vtanh.f32 %v2169_v57  ;;  %v1974_v32 = vadd.f32 %v1782_v14, %v6224_v59  ;;  %v1599_v22 = vmul.f32 %v1407_v47, %v6250_v2  ;;  %v2531_v35 = vadd.f32 1.0, %v4691_v38  ;;  %v4449_v17 = vpop.f32.mrf.mxu1 }
 0x12a   : > { %v1792_v5 = vmul.f32 0.044715, %v1600_v49  ;;  %v6275_v27 = vmul.f32 %v2725_v26, %v5930_v19  ;;  %v1601_v33 = vmul.f32 %v1409_v13, %v6257_v56  ;;  %v6278_v40 = vpop.f32.mrf.mxu0  ;;  %v6280_v30 = vpop.eup %4692  ;;  %v6282_v12 = vmul.f32 0.7978846, %v1982_v45 }
 0x12b   : > { %v1791_v57 = vmul.f32 0.044715, %v1599_v22  ;;  %v6285_v52 = vadd.f32 %v1103_v3, %v5889_v41  ;;  %4704 = vtanh.f32 %v6021_v10  ;;  %v6288_v38 = vpop.eup %4694  ;;  %v2723_v14 = vmul.f32 0.5, %v2531_v35 }
 0x12c   : > { %9176 = vst [vmem:[#allocation25_spill] sm:$0xff] %v6282_v12  ;;  %v1984_v19 = vadd.f32 %v1792_v5, %v6242_v44  ;;  %v1793_v47 = vmul.f32 0.044715, %v1601_v33  ;;  %v6293_v26 = vadd.f32 %v6160_v21, %v5865_v28  ;;  %v6295_v49 = vpop.f32.mrf.mxu0  ;;  %v6301_v10 = vadd.f32 %v4449_v17, %v5889_v41  ;;  %v1113_v44 = vpop.f32.mrf.mxu1 }
 0x12d   : > { %9177 = vst [vmem:[#allocation26_spill] sm:$0xff] %v6285_v52  ;;  %v1983_v22 = vadd.f32 %v1791_v57, %v6250_v2  ;;  %v1404_v3 = vmul.f32 %v6285_v52, %v6285_v52  ;;  %v2536_v45 = vadd.f32 1.0, %v6081_v50  ;;  %v6304_v13 = vpop.eup %4696  ;;  %v2915_v5 = vmul.f32 %v2723_v14, %v5915_v6 }
 0x12e   : > { %9178 = vst [vmem:[#allocation27_spill] sm:$0xff] %v6293_v26  ;;  %9179 = vst [vmem:[#allocation28_spill] sm:$0xff] %v6301_v10  ;;  %v2176_v35 = vmul.f32 0.7978846, %v1984_v19  ;;  %v1985_v21 = vadd.f32 %v1793_v47, %v6257_v56  ;;  %v1411_v33 = vmul.f32 %v6293_v26, %v6293_v26  ;;  %v6310_v59 = vpop.f32.mrf.mxu0  ;;  %v6312_v57 = vmul.f32 0.7978846, %v1974_v32 }
 0x12f   : > { %v2175_v2 = vmul.f32 0.7978846, %v1983_v22  ;;  %v1596_v17 = vmul.f32 %v1404_v3, %v6285_v52  ;;  %v1413_v50 = vmul.f32 %v6301_v10, %v6301_v10  ;;  %3229 = vmatprep.mubr.f32.mxu1 %v2915_v5  ;;  %v2728_v14 = vmul.f32 0.5, %v2536_v45 }
 0x130   : > { %9180 = vst [vmem:[#allocation29_spill] sm:$0xff] %v6312_v57  ;;  %v4699_v12 = vpop.eup %4698  ;;  %4706 = vtanh.f32 %v2176_v35  ;;  %v1603_v6 = vmul.f32 %v1411_v33, %v6293_v26  ;;  %v6320_v19 = vadd.f32 %v6176_v37, %v5867_v29  ;;  %v6322_v47 = vpop.f32.mrf.mxu0  ;;  %3230 = vmatmul.mubr.f32.gmra.mxu1 %v2914_v55  ;;  %v6324_v22 = vmul.f32 0.7978846, %v1985_v21 }
 0x131   : > { %v2534_v32 = vadd.f32 1.0, %v4699_v12  ;;  %v1788_v3 = vmul.f32 0.044715, %v1596_v17  ;;  %v1605_v56 = vmul.f32 %v1413_v50, %v6301_v10  ;;  %4708 = vtanh.f32 %v2175_v2 }
 0x132   : > { %9181 = vst [vmem:[#allocation30_spill] sm:$0xff] %v6320_v19  ;;  %9182 = vst [vmem:[#allocation31_spill] sm:$0xff] %v6324_v22  ;;  %v1795_v57 = vmul.f32 0.044715, %v1603_v6  ;;  %v1412_v5 = vmul.f32 %v6320_v19, %v6320_v19  ;;  %v6330_v45 = vadd.f32 %v1113_v44, %v5889_v41  ;;  %v6332_v35 = vpop.f32.mrf.mxu0  ;;  %4710 = vtanh.f32 %v6065_v24  ;;  %v4452_v44 = vpop.f32.mrf.mxu1 }
 0x133   : > { %v2726_v37 = vmul.f32 0.5, %v2534_v32  ;;  %v1980_v33 = vadd.f32 %v1788_v3, %v6285_v52  ;;  %v1797_v55 = vmul.f32 0.044715, %v1605_v56  ;;  %v6342_v17 = vadd.f32 %v6191_v4, %v5865_v28 }
 0x134   : > { %9183 = vst [vmem:[#allocation32_spill] sm:$0xff] %v6330_v45  ;;  %v1987_v12 = vadd.f32 %v1795_v57, %v6293_v26  ;;  %v1604_v21 = vmul.f32 %v1412_v5, %v6320_v19  ;;  %v1410_v2 = vmul.f32 %v6330_v45, %v6330_v45  ;;  %v6344_v50 = vpop.f32.mrf.mxu0  ;;  %v2920_v57 = vmul.f32 %v2728_v14, %v5949_v36 }
 0x135   : > { %9184 = vst [vmem:[#allocation33_spill] sm:$0xff] %v6342_v17  ;;  %v6346_v6 = vpop.eup %4700  ;;  %v2918_v56 = vmul.f32 %v2726_v37, %v5936_v23  ;;  %v1989_v24 = vadd.f32 %v1797_v55, %v6301_v10  ;;  %v6352_v32 = vadd.f32 %v4452_v44, %v5889_v41  ;;  %v1414_v26 = vmul.f32 %v6342_v17, %v6342_v17 }
 0x136   : > { %v6354_v3 = vpop.eup %4702  ;;  %v2179_v5 = vmul.f32 0.7978846, %v1987_v12  ;;  %v1796_v52 = vmul.f32 0.044715, %v1604_v21  ;;  %v1602_v4 = vmul.f32 %v1410_v2, %v6330_v45  ;;  %v6359_v22 = vpop.f32.mrf.mxu0  ;;  %v2539_v36 = vadd.f32 1.0, %v6123_v48 }
 0x137   : > { %9185 = vst [vmem:[#allocation34_spill] sm:$0xff] %v6352_v32  ;;  %9186 = vst [vmem:[#allocation35_spill] sm:$0xff] %v6354_v3  ;;  %3234 = vmatprep.mubr.f32.mxu1 %v2918_v56  ;;  %v2181_v23 = vmul.f32 0.7978846, %v1989_v24  ;;  %v1419_v37 = vmul.f32 %v6352_v32, %v6352_v32  ;;  %v6366_v14 = vadd.f32 %v6205_v7, %v5867_v29  ;;  %v6369_v12 = vmul.f32 0.7978846, %v1980_v33  ;;  %v1123_v56 = vpop.f32.mrf.mxu1 }
 0x138   : > { %9187 = vst [vmem:[#allocation36_spill] sm:$0xff] %v6359_v22  ;;  %v4705_v55 = vpop.eup %4704  ;;  %3235 = vmatmul.mubr.f32.gmra.mxu1 %v6275_v27  ;;  %v1988_v21 = vadd.f32 %v1796_v52, %v6320_v19  ;;  %v1794_v2 = vmul.f32 0.044715, %v1602_v4  ;;  %v1606_v44 = vmul.f32 %v1414_v26, %v6342_v17  ;;  %v6373_v24 = vpop.f32.mrf.mxu0  ;;  %4712 = vtanh.f32 %v2179_v5 }
 0x139   : > { %9188 = vst [vmem:[#allocation37_spill] sm:$0xff] %v6366_v14  ;;  %v2537_v10 = vadd.f32 1.0, %v4705_v55  ;;  %v1611_v48 = vmul.f32 %v1419_v37, %v6352_v32  ;;  %v2731_v22 = vmul.f32 0.5, %v2539_v36  ;;  %4714 = vtanh.f32 %v2181_v23 }
 0x13a   : > { %v6376_v7 = vmul.f32 0.7978846, %v1988_v21  ;;  %v1798_v3 = vmul.f32 0.044715, %v1606_v44  ;;  %v1415_v27 = vmul.f32 %v6366_v14, %v6366_v14  ;;  %v6380_v33 = vpop.f32.mrf.mxu0  ;;  %v1986_v26 = vadd.f32 %v1794_v2, %v6330_v45 }
 0x13b   : > { %v2729_v52 = vmul.f32 0.5, %v2537_v10  ;;  %v1803_v4 = vmul.f32 0.044715, %v1611_v48  ;;  %v6384_v19 = vadd.f32 %v1123_v56, %v5889_v41  ;;  %v2923_v37 = vmul.f32 %v2731_v22, %v5969_v60 }
 0x13c   : > { %v1990_v5 = vadd.f32 %v1798_v3, %v6342_v17  ;;  %v1607_v23 = vmul.f32 %v1415_v27, %v6366_v14  ;;  %4716 = vtanh.f32 %v6072_v1  ;;  %v6390_v36 = vpop.f32.mrf.mxu0  ;;  %v6400_v3 = vadd.f32 %v6216_v42, %v5865_v28 }
 0x13d   : > { %9189 = vst [vmem:[#allocation38_spill] sm:$0xff] %v6384_v19  ;;  %v6392_v55 = vpop.eup %4706  ;;  %v2921_v10 = vmul.f32 %v2729_v52, %v5959_v46  ;;  %v1995_v21 = vadd.f32 %v1803_v4, %v6352_v32  ;;  %v1416_v2 = vmul.f32 %v6384_v19, %v6384_v19  ;;  %v2542_v44 = vadd.f32 1.0, %v6150_v8 }
 0x13e   : > { %9190 = vst [vmem:[#allocation39_spill] sm:$0xff] %v6400_v3  ;;  %v2182_v60 = vmul.f32 0.7978846, %v1990_v5  ;;  %v1799_v22 = vmul.f32 0.044715, %v1607_v23  ;;  %v6405_v1 = vadd.f32 %v6231_v58, %v5867_v29  ;;  %v6407_v56 = vpop.f32.mrf.mxu0  ;;  %v6409_v46 = vpop.eup %4708  ;;  %v1417_v42 = vmul.f32 %v6400_v3, %v6400_v3 }
 0x13f   : > { %3239 = vmatprep.mubr.f32.mxu1 %v2921_v10  ;;  %v2187_v48 = vmul.f32 0.7978846, %v1995_v21  ;;  %v1608_v27 = vmul.f32 %v1416_v2, %v6384_v19  ;;  %4718 = vtanh.f32 %v6083_v9  ;;  %v4711_v52 = vpop.eup %4710  ;;  %v2734_v58 = vmul.f32 0.5, %v2542_v44  ;;  %v4455_v5 = vpop.f32.mrf.mxu1 }
 0x140   : > { %9191 = vst [vmem:[#allocation40_spill] sm:$0xff] %v6405_v1  ;;  %3240 = vmatmul.mubr.f32.gmra.mxu1 %v2920_v57  ;;  %4720 = vtanh.f32 %v2182_v60  ;;  %v1991_v8 = vadd.f32 %v1799_v22, %v6366_v14  ;;  %v1418_v4 = vmul.f32 %v6405_v1, %v6405_v1  ;;  %v6418_v23 = vpop.f32.mrf.mxu0  ;;  %v2540_v10 = vadd.f32 1.0, %v4711_v52 }
 0x141   : > { %4722 = vtanh.f32 %v2187_v48  ;;  %v1800_v21 = vmul.f32 0.044715, %v1608_v27  ;;  %v1609_v2 = vmul.f32 %v1417_v42, %v6400_v3  ;;  %v6421_v32 = vmul.f32 0.7978846, %v1986_v26 }
 0x142   : > { %v6423_v9 = vmul.f32 0.7978846, %v1991_v8  ;;  %v1610_v57 = vmul.f32 %v1418_v4, %v6405_v1  ;;  %4724 = vtanh.f32 %v6010_v53  ;;  %v6427_v60 = vpop.f32.mrf.mxu0  ;;  %v2732_v22 = vmul.f32 0.5, %v2540_v10  ;;  %v1133_v53 = vpop.f32.mrf.mxu1 }
 0x143   : > { %v1992_v44 = vadd.f32 %v1800_v21, %v6384_v19  ;;  %v1801_v14 = vmul.f32 0.044715, %v1609_v2  ;;  %v6432_v48 = vadd.f32 %v6244_v11, %v5865_v28  ;;  %v6435_v26 = vadd.f32 %v4455_v5, %v5889_v41 }
 0x144   : > { %v1802_v27 = vmul.f32 0.044715, %v1610_v57  ;;  %v2545_v42 = vadd.f32 1.0, %v6178_v15  ;;  %v6440_v52 = vadd.f32 %v6259_v43, %v5867_v29  ;;  %v6442_v8 = vpop.f32.mrf.mxu0  ;;  %v2924_v4 = vmul.f32 %v2732_v22, %v5982_v20 }
 0x145   : > { %9192 = vst [vmem:[#allocation41_spill] sm:$0xff] %v6432_v48  ;;  %9193 = vst [vmem:[#allocation42_spill] sm:$0xff] %v6435_v26  ;;  %v1993_v10 = vadd.f32 %v1801_v14, %v6400_v3  ;;  %v2926_v11 = vmul.f32 %v2734_v58, %v5995_v34  ;;  %v1420_v21 = vmul.f32 %v6432_v48, %v6432_v48  ;;  %v6449_v5 = vpop.eup %4712  ;;  %v6460_v34 = vmul.f32 0.7978846, %v1992_v44 }
 0x146   : > { %9194 = vst [vmem:[#allocation43_spill] sm:$0xff] %v6440_v52  ;;  %v1994_v15 = vadd.f32 %v1802_v27, %v6405_v1  ;;  %v1425_v43 = vmul.f32 %v6435_v26, %v6435_v26  ;;  %v2737_v2 = vmul.f32 0.5, %v2545_v42  ;;  %v1421_v57 = vmul.f32 %v6440_v52, %v6440_v52  ;;  %v6456_v19 = vpop.f32.mrf.mxu0  ;;  %v6458_v20 = vpop.eup %4714  ;;  %3244 = vmatprep.mubr.f32.mxu1 %v2924_v4 }
 0x147   : > { %9195 = vst [vmem:[#allocation44_spill] sm:$0xff] %v6456_v19  ;;  %v1612_v14 = vmul.f32 %v1420_v21, %v6432_v48  ;;  %v6464_v58 = vadd.f32 %v1133_v53, %v5889_v41  ;;  %4726 = vtanh.f32 %v6131_v62  ;;  %3245 = vmatmul.mubr.f32.gmra.mxu1 %v2923_v37  ;;  %v2185_v22 = vmul.f32 0.7978846, %v1993_v10 }
 0x148   : > { %v6467_v27 = vmul.f32 0.7978846, %v1994_v15  ;;  %v1617_v42 = vmul.f32 %v1425_v43, %v6435_v26  ;;  %v1613_v1 = vmul.f32 %v1421_v57, %v6440_v52  ;;  %v6471_v3 = vpop.f32.mrf.mxu0  ;;  %v2929_v45 = vmul.f32 %v2737_v2, %v6019_v0 }
 0x149   : > { %9196 = vst [vmem:[#allocation45_spill] sm:$0xff] %v6471_v3  ;;  %v4717_v4 = vpop.eup %4716  ;;  %v1804_v44 = vmul.f32 0.044715, %v1612_v14  ;;  %v1422_v53 = vmul.f32 %v6464_v58, %v6464_v58  ;;  %v6478_v62 = vadd.f32 %v6269_v61, %v5865_v28  ;;  %4728 = vtanh.f32 %v6152_v51 }
 0x14a   : > { %v2543_v37 = vadd.f32 1.0, %v4717_v4  ;;  %v1809_v10 = vmul.f32 0.044715, %v1617_v42  ;;  %v1805_v21 = vmul.f32 0.044715, %v1613_v1  ;;  %v6481_v15 = vpop.f32.mrf.mxu0  ;;  %v2548_v2 = vadd.f32 1.0, %v6200_v18 }
 0x14b   : > { %9197 = vst [vmem:[#allocation46_spill] sm:$0xff] %v6481_v15  ;;  %v1996_v43 = vadd.f32 %v1804_v44, %v6432_v48  ;;  %v1614_v57 = vmul.f32 %v1422_v53, %v6464_v58  ;;  %v1423_v0 = vmul.f32 %v6478_v62, %v6478_v62  ;;  %v2535_v1 = vadd.f32 1.0, %v6171_v54  ;;  %v9199_v18 = vld [vmem:[#allocation3_spill] sm:$0xff] }
 0x14c   : > { %v4719_v14 = vpop.eup %4718  ;;  %v2735_v3 = vmul.f32 0.5, %v2543_v37  ;;  %v2001_v61 = vadd.f32 %v1809_v10, %v6435_v26  ;;  %v1997_v42 = vadd.f32 %v1805_v21, %v6440_v52  ;;  %v6491_v51 = vpop.f32.mrf.mxu0  ;;  %4730 = vtanh.f32 %v2185_v22 }
 0x14d   : > { %9198 = vst [vmem:[#allocation47_spill] sm:$0xff] %v6491_v51  ;;  %v6493_v4 = vpop.eup %4720  ;;  %v2546_v44 = vadd.f32 1.0, %v4719_v14  ;;  %v2188_v48 = vmul.f32 0.7978846, %v1996_v43  ;;  %v1806_v53 = vmul.f32 0.044715, %v1614_v57  ;;  %v1615_v15 = vmul.f32 %v1423_v0, %v6478_v62 }
 0x14e   : > { %v6496_v19 = vpop.eup %4722  ;;  %v2927_v17 = vmul.f32 %v2735_v3, %v9199_v18  ;;  %v2193_v37 = vmul.f32 0.7978846, %v2001_v61  ;;  %v2740_v10 = vmul.f32 0.5, %v2548_v2  ;;  %v6499_v26 = vpop.f32.mrf.mxu0  ;;  %v6502_v57 = vmul.f32 0.7978846, %v1997_v42  ;;  %v9200_v0 = vld [vmem:[#allocation6_spill] sm:$0xff] }
 0x14f   : > { %v4725_v21 = vpop.eup %4724  ;;  %v2738_v54 = vmul.f32 0.5, %v2546_v44  ;;  %4732 = vtanh.f32 %v2188_v48  ;;  %v1998_v52 = vadd.f32 %v1806_v53, %v6464_v58  ;;  %v1807_v51 = vmul.f32 0.044715, %v1615_v15  ;;  %v4458_v3 = vpop.f32.mrf.mxu1  ;;  %v9201_v2 = vld [vmem:[#allocation5_spill] sm:$0xff] }
 0x150   : > { %3249 = vmatprep.mubr.f32.mxu1 %v2927_v17  ;;  %v2526_v43 = vadd.f32 1.0, %v4725_v21  ;;  %4734 = vtanh.f32 %v2193_v37  ;;  %v6505_v14 = vmul.f32 %v2740_v10, %v9200_v0  ;;  %v6507_v22 = vpop.f32.mrf.mxu0  ;;  %v2727_v48 = vmul.f32 0.5, %v2535_v1  ;;  %v9206_v0 = vld [vmem:[#allocation4_spill] sm:$0xff] }
 0x151   : > { %3250 = vmatmul.mubr.f32.gmra.mxu1 %v2926_v11  ;;  %v2930_v61 = vmul.f32 %v2738_v54, %v9201_v2  ;;  %v1999_v44 = vadd.f32 %v1807_v51, %v6478_v62  ;;  %v6513_v15 = vadd.f32 %v6278_v40, %v5867_v29  ;;  %v6515_v53 = vmul.f32 0.7978846, %v1998_v52  ;;  %v9204_v51 = vld [vmem:[#allocation2_spill] sm:$0xff]  ;;  %v1143_v21 = vpop.f32.mrf.mxu1 }
 0x152   : > { %v2718_v17 = vmul.f32 0.5, %v2526_v43  ;;  %4736 = vtanh.f32 %v6173_v63  ;;  %v6520_v42 = vadd.f32 %v6295_v49, %v5865_v28  ;;  %v6522_v18 = vpop.f32.mrf.mxu0  ;;  %v6528_v40 = vadd.f32 %v4458_v3, %v5889_v41 }
 0x153   : > { %9202 = vst [vmem:[#allocation3_spill] sm:$0xff] %v6522_v18  ;;  %3254 = vmatprep.mubr.f32.mxu1 %v2930_v61  ;;  %v2191_v11 = vmul.f32 0.7978846, %v1999_v44  ;;  %v1424_v1 = vmul.f32 %v6513_v15, %v6513_v15  ;;  %4738 = vtanh.f32 %v6180_v39  ;;  %v2551_v49 = vadd.f32 1.0, %v6261_v31 }
 0x154   : > { %9203 = vst [vmem:[#allocation6_spill] sm:$0xff] %v6528_v40  ;;  %v4727_v52 = vpop.eup %4726  ;;  %v2910_v37 = vmul.f32 %v2718_v17, %v9204_v51  ;;  %v1426_v63 = vmul.f32 %v6520_v42, %v6520_v42  ;;  %v2541_v10 = vadd.f32 1.0, %v6280_v30  ;;  %v6535_v54 = vpop.f32.mrf.mxu0  ;;  %v2919_v39 = vmul.f32 %v2727_v48, %v9206_v0 }
 0x155   : > { %9205 = vst [vmem:[#allocation5_spill] sm:$0xff] %v6535_v54  ;;  %3255 = vmatmul.mubr.f32.gmra.mxu1 %v2929_v45  ;;  %v2549_v43 = vadd.f32 1.0, %v4727_v52  ;;  %v1616_v3 = vmul.f32 %v1424_v1, %v6513_v15  ;;  %v1431_v2 = vmul.f32 %v6528_v40, %v6528_v40  ;;  %v2743_v44 = vmul.f32 0.5, %v2551_v49  ;;  %v9209_v52 = vld [vmem:[#allocation12_spill] sm:$0xff]  ;;  %v9211_v49 = vld [vmem:[#allocation9_spill] sm:$0xff] }
 0x156   : > { %4557 = vmatprep.mubr.f32.mxu0 %v2910_v37  ;;  %v1618_v61 = vmul.f32 %v1426_v63, %v6520_v42  ;;  %v2733_v17 = vmul.f32 0.5, %v2541_v10  ;;  %v6544_v30 = vadd.f32 %v6310_v59, %v5867_v29  ;;  %v6546_v31 = vpop.f32.mrf.mxu0  ;;  %v4729_v45 = vpop.eup %4728  ;;  %v6551_v0 = vadd.f32 %v1143_v21, %v5889_v41  ;;  %v9212_v59 = vld [vmem:[#allocation7_spill] sm:$0xff] }
 0x157   : > { %9208 = vst [vmem:[#allocation4_spill] sm:$0xff] %v6546_v31  ;;  %4558 = vmatmul.mubr.f32.vlgmr.msra.gmra.mxu0 %v9209_v52  ;;  %v2741_v48 = vmul.f32 0.5, %v2549_v43  ;;  %v1808_v51 = vmul.f32 0.044715, %v1616_v3  ;;  %v1623_v1 = vmul.f32 %v1431_v2, %v6528_v40  ;;  %v2532_v37 = vadd.f32 1.0, %v4729_v45 }
 0x158   : > { %9207 = vst [vmem:[#allocation2_spill] sm:$0xff] %v6544_v30  ;;  %9210 = vst [vmem:[#allocation12_spill] sm:$0xff] %v6551_v0  ;;  %4740 = vtanh.f32 %v2191_v11  ;;  %v1810_v63 = vmul.f32 0.044715, %v1618_v61  ;;  %v6554_v10 = vmul.f32 %v2743_v44, %v9211_v49  ;;  %v1427_v43 = vmul.f32 %v6544_v30, %v6544_v30  ;;  %v6564_v11 = vpop.f32.mrf.mxu0 }
 0x159   : > { %v2933_v54 = vmul.f32 %v2741_v48, %v9212_v59  ;;  %v2000_v31 = vadd.f32 %v1808_v51, %v6513_v15  ;;  %v1815_v18 = vmul.f32 0.044715, %v1623_v1  ;;  %v2724_v3 = vmul.f32 0.5, %v2532_v37  ;;  %9213 = vst [vmem:[#allocation9_spill] sm:$0xff] %v6564_v11  ;;  %v6566_v61 = vpop.eup %4730  ;;  %v9214_v48 = vld [vmem:[#allocation21_spill] sm:$0xff]  ;;  %v9215_v1 = vld [vmem:[#allocation8_spill] sm:$0xff] }
 0x15a   : > { %v2002_v2 = vadd.f32 %v1810_v63, %v6520_v42  ;;  %v1428_v21 = vmul.f32 %v6551_v0, %v6551_v0  ;;  %4742 = vtanh.f32 %v6227_v16  ;;  %v6570_v45 = vmul.f32 %v2733_v17, %v6091_v25  ;;  %v9222_v11 = vld [vmem:[#allocation25_spill] sm:$0xff] }
 0x15b   : > { %3259 = vmatprep.mubr.f32.mxu1 %v2933_v54  ;;  %v2007_v44 = vadd.f32 %v1815_v18, %v6528_v40  ;;  %v1619_v52 = vmul.f32 %v1427_v43, %v6544_v30  ;;  %4744 = vtanh.f32 %v9214_v48  ;;  %v2916_v37 = vmul.f32 %v2724_v3, %v9215_v1  ;;  %v9230_v40 = vld [vmem:[#allocation17_spill] sm:$0xff] }
 0x15c   : > { %v6574_v51 = vpop.eup %4732  ;;  %3260 = vmatmul.mubr.f32.gmra.mxu1 %v6505_v14  ;;  %v2194_v16 = vmul.f32 0.7978846, %v2002_v2  ;;  %v1620_v63 = vmul.f32 %v1428_v21, %v6551_v0  ;;  %v6581_v54 = vadd.f32 %v6322_v47, %v5865_v28  ;;  %v2554_v49 = vadd.f32 1.0, %v6288_v38  ;;  %v6595_v47 = vpop.f32.mrf.mxu0 }
 0x15d   : > { %v6583_v18 = vpop.eup %4734  ;;  %v2199_v25 = vmul.f32 0.7978846, %v2007_v44  ;;  %v1811_v17 = vmul.f32 0.044715, %v1619_v52  ;;  %v2547_v59 = vadd.f32 1.0, %v6304_v13  ;;  %4560 = vmatprep.mubr.f32.mxu0 %v2916_v37  ;;  %v6593_v2 = vadd.f32 %v6332_v35, %v5867_v29  ;;  %9218 = vst [vmem:[#allocation8_spill] sm:$0xff] %v6595_v47  ;;  %v4461_v37 = vpop.f32.mrf.mxu1 }
 0x15e   : > { %9216 = vst [vmem:[#allocation7_spill] sm:$0xff] %v6581_v54  ;;  %v6587_v43 = vmul.f32 0.7978846, %v2000_v31  ;;  %v1812_v3 = vmul.f32 0.044715, %v1620_v63  ;;  %v1429_v14 = vmul.f32 %v6581_v54, %v6581_v54  ;;  %4561 = vmatmul.mubr.f32.gmra.mxu0 %v2919_v39  ;;  %4746 = vtanh.f32 %v2194_v16  ;;  %v9219_v39 = vld [vmem:[#allocation13_spill] sm:$0xff] }
 0x15f   : > { %9217 = vst [vmem:[#allocation21_spill] sm:$0xff] %v6593_v2  ;;  %v4737_v21 = vpop.eup %4736  ;;  %v2003_v38 = vadd.f32 %v1811_v17, %v6544_v30  ;;  %v2746_v44 = vmul.f32 0.5, %v2554_v49  ;;  %v2739_v13 = vmul.f32 0.5, %v2547_v59  ;;  %4748 = vtanh.f32 %v2199_v25  ;;  %v9220_v59 = vld [vmem:[#allocation14_spill] sm:$0xff] }
 0x160   : > { %v4739_v52 = vpop.eup %4738  ;;  %v2552_v31 = vadd.f32 1.0, %v4737_v21  ;;  %v1621_v48 = vmul.f32 %v1429_v14, %v6581_v54  ;;  %v1430_v1 = vmul.f32 %v6593_v2, %v6593_v2  ;;  %v2004_v47 = vadd.f32 %v1812_v3, %v6551_v0  ;;  %v6611_v14 = vpop.f32.mrf.mxu0 }
 0x161   : > { %v2538_v35 = vadd.f32 1.0, %v4739_v52  ;;  %v6601_v63 = vmul.f32 0.7978846, %v2003_v38  ;;  %v6605_v16 = vmul.f32 %v2746_v44, %v9219_v39  ;;  %v6608_v30 = vmul.f32 %v2739_v13, %v9220_v59  ;;  %9221 = vst [vmem:[#allocation13_spill] sm:$0xff] %v6611_v14  ;;  %v9224_v44 = vld [vmem:[#allocation10_spill] sm:$0xff] }
 0x162   : > { %v2744_v17 = vmul.f32 0.5, %v2552_v31  ;;  %v1813_v49 = vmul.f32 0.044715, %v1621_v48  ;;  %v1622_v25 = vmul.f32 %v1430_v1, %v6593_v2  ;;  %4750 = vtanh.f32 %v9222_v11  ;;  %v9225_v48 = vld [vmem:[#allocation29_spill] sm:$0xff]  ;;  %v1153_v1 = vpop.f32.mrf.mxu1  ;;  %v6638_v0 = vpop.f32.mrf.mxu0 }
 0x163   : > { %v2730_v21 = vmul.f32 0.5, %v2538_v35  ;;  %v6616_v38 = vadd.f32 %v6344_v50, %v5865_v28  ;;  %v6619_v3 = vadd.f32 %v4461_v37, %v5889_v41  ;;  %4752 = vtanh.f32 %v9225_v48  ;;  %v9226_v35 = vld [vmem:[#allocation11_spill] sm:$0xff]  ;;  %v9228_v48 = vld [vmem:[#allocation36_spill] sm:$0xff]  ;;  %9229 = vst [vmem:[#allocation25_spill] sm:$0xff] %v6638_v0 }
 0x164   : > { %v2936_v52 = vmul.f32 %v2744_v17, %v9224_v44  ;;  %v2005_v31 = vadd.f32 %v1813_v49, %v6581_v54  ;;  %v1814_v13 = vmul.f32 0.044715, %v1622_v25  ;;  %v2557_v37 = vadd.f32 1.0, %v6346_v6  ;;  %v9227_v25 = vld [vmem:[#allocation35_spill] sm:$0xff] }
 0x165   : > { %9223 = vst [vmem:[#allocation14_spill] sm:$0xff] %v6619_v3  ;;  %v6624_v39 = vpop.eup %4740  ;;  %v2922_v59 = vmul.f32 %v2730_v21, %v9226_v35  ;;  %v1432_v11 = vmul.f32 %v6616_v38, %v6616_v38  ;;  %v1437_v50 = vmul.f32 %v6619_v3, %v6619_v3  ;;  %v2553_v44 = vadd.f32 1.0, %v9227_v25 }
 0x166   : > { %3264 = vmatprep.mubr.f32.mxu1 %v2936_v52  ;;  %v2197_v17 = vmul.f32 0.7978846, %v2005_v31  ;;  %v2006_v49 = vadd.f32 %v1814_v13, %v6593_v2  ;;  %v6636_v14 = vadd.f32 %v9228_v48, %v5867_v29  ;;  %v2749_v52 = vmul.f32 0.5, %v2557_v37 }
 0x167   : > { %v4743_v21 = vpop.eup %4742  ;;  %4563 = vmatprep.mubr.f32.mxu0 %v2922_v59  ;;  %3265 = vmatmul.mubr.f32.gmra.mxu1 %v6554_v10  ;;  %v1624_v35 = vmul.f32 %v1432_v11, %v6616_v38  ;;  %v1629_v6 = vmul.f32 %v1437_v50, %v6619_v3  ;;  %v6644_v31 = vadd.f32 %v1153_v1, %v5889_v41  ;;  %v6647_v25 = vmul.f32 0.7978846, %v2004_v47  ;;  %v6658_v47 = vpop.f32.mrf.mxu0 }
 0x168   : > { %v4745_v13 = vpop.eup %4744  ;;  %4564 = vmatmul.mubr.f32.gmra.mxu0 %v6570_v45  ;;  %v2555_v48 = vadd.f32 1.0, %v4743_v21  ;;  %4754 = vtanh.f32 %v2197_v17  ;;  %v6649_v0 = vmul.f32 0.7978846, %v2006_v49  ;;  %v2745_v54 = vmul.f32 0.5, %v2553_v44  ;;  %9231 = vst [vmem:[#allocation10_spill] sm:$0xff] %v6658_v47  ;;  %v9232_v21 = vld [vmem:[#allocation31_spill] sm:$0xff] }
 0x169   : > { %v2544_v59 = vadd.f32 1.0, %v4745_v13  ;;  %v1816_v2 = vmul.f32 0.044715, %v1624_v35  ;;  %v1821_v10 = vmul.f32 0.044715, %v1629_v6  ;;  %v6652_v50 = vmul.f32 %v2749_v52, %v9230_v40  ;;  %v9233_v35 = vld [vmem:[#allocation15_spill] sm:$0xff] }
 0x16a   : > { %v2747_v11 = vmul.f32 0.5, %v2555_v48  ;;  %v1433_v1 = vmul.f32 %v6636_v14, %v6636_v14  ;;  %v1434_v45 = vmul.f32 %v6644_v31, %v6644_v31  ;;  %4756 = vtanh.f32 %v9232_v21  ;;  %v9234_v48 = vld [vmem:[#allocation16_spill] sm:$0xff] }
 0x16b   : > { %v2736_v37 = vmul.f32 0.5, %v2544_v59  ;;  %v2008_v17 = vadd.f32 %v1816_v2, %v6616_v38  ;;  %v2013_v49 = vadd.f32 %v1821_v10, %v6619_v3  ;;  %v6663_v44 = vpop.eup %4746  ;;  %4758 = vtanh.f32 %v6369_v12  ;;  %v9236_v12 = vld [vmem:[#allocation18_spill] sm:$0xff] }
 0x16c   : > { %v2939_v40 = vmul.f32 %v2747_v11, %v9233_v35  ;;  %v1625_v6 = vmul.f32 %v1433_v1, %v6636_v14  ;;  %v1626_v52 = vmul.f32 %v1434_v45, %v6644_v31  ;;  %v6669_v13 = vpop.eup %4748  ;;  %v6674_v10 = vadd.f32 %v6373_v24, %v5865_v28  ;;  %v6678_v45 = vpop.f32.mrf.mxu0 }
 0x16d   : > { %v2928_v59 = vmul.f32 %v2736_v37, %v9234_v48  ;;  %v2200_v47 = vmul.f32 0.7978846, %v2008_v17  ;;  %v2205_v2 = vmul.f32 0.7978846, %v2013_v49  ;;  %v2560_v11 = vadd.f32 1.0, %v6392_v55  ;;  %9235 = vst [vmem:[#allocation29_spill] sm:$0xff] %v6678_v45 }
 0x16e   : > { %3269 = vmatprep.mubr.f32.mxu1 %v2939_v40  ;;  %v1817_v21 = vmul.f32 0.044715, %v1625_v6  ;;  %v1818_v3 = vmul.f32 0.044715, %v1626_v52  ;;  %v2559_v1 = vadd.f32 1.0, %v6409_v46  ;;  %v2937_v37 = vmul.f32 %v2745_v54, %v9236_v12  ;;  %v4464_v6 = vpop.f32.mrf.mxu1 }
 0x16f   : > { %4566 = vmatprep.mubr.f32.mxu0 %v2928_v59  ;;  %3270 = vmatmul.mubr.f32.gmra.mxu1 %v6605_v16  ;;  %4760 = vtanh.f32 %v2200_v47  ;;  %v1435_v17 = vmul.f32 %v6674_v10, %v6674_v10  ;;  %v6686_v24 = vadd.f32 %v6380_v33, %v5867_v29  ;;  %v4751_v49 = vpop.eup %4750  ;;  %v2752_v35 = vmul.f32 0.5, %v2560_v11  ;;  %v6702_v59 = vpop.f32.mrf.mxu0  ;;  %v9239_v11 = vld [vmem:[#allocation22_spill] sm:$0xff] }
 0x170   : > { %4567 = vmatmul.mubr.f32.gmra.mxu0 %v6608_v30  ;;  %v2009_v55 = vadd.f32 %v1817_v21, %v6636_v14  ;;  %v2010_v46 = vadd.f32 %v1818_v3, %v6644_v31  ;;  %v6693_v16 = vadd.f32 %v6390_v36, %v5865_v28  ;;  %v4753_v54 = vpop.eup %4752  ;;  %v2558_v47 = vadd.f32 1.0, %v4751_v49  ;;  %9238 = vst [vmem:[#allocation35_spill] sm:$0xff] %v6702_v59 }
 0x171   : > { %9237 = vst [vmem:[#allocation11_spill] sm:$0xff] %v6686_v24  ;;  %4762 = vtanh.f32 %v2205_v2  ;;  %v1627_v40 = vmul.f32 %v1435_v17, %v6674_v10  ;;  %v1436_v33 = vmul.f32 %v6686_v24, %v6686_v24  ;;  %v2550_v52 = vadd.f32 1.0, %v4753_v54  ;;  %v6724_v59 = vpop.f32.mrf.mxu0 }
 0x172   : > { %v6698_v30 = vmul.f32 0.7978846, %v2009_v55  ;;  %v6700_v48 = vmul.f32 0.7978846, %v2010_v46  ;;  %v2751_v3 = vmul.f32 0.5, %v2559_v1  ;;  %v2750_v21 = vmul.f32 0.5, %v2558_v47 }
 0x173   : > { %v1819_v36 = vmul.f32 0.044715, %v1627_v40  ;;  %v6705_v12 = vmul.f32 %v2752_v35, %v9239_v11  ;;  %v1628_v2 = vmul.f32 %v1436_v33, %v6686_v24  ;;  %v2742_v17 = vmul.f32 0.5, %v2550_v52  ;;  %v9240_v1 = vld [vmem:[#allocation19_spill] sm:$0xff]  ;;  %v1163_v35 = vpop.f32.mrf.mxu1  ;;  %v9241_v33 = vld [vmem:[#allocation20_spill] sm:$0xff]  ;;  %9242 = vst [vmem:[#allocation36_spill] sm:$0xff] %v6724_v59 }
 0x174   : > { %4764 = vtanh.f32 %v6376_v7  ;;  %v1438_v49 = vmul.f32 %v6693_v16, %v6693_v16  ;;  %v6712_v55 = vadd.f32 %v4464_v6, %v5889_v41  ;;  %v2942_v54 = vmul.f32 %v2750_v21, %v9240_v1 }
 0x175   : > { %v6714_v46 = vpop.eup %4754  ;;  %v2011_v47 = vadd.f32 %v1819_v36, %v6674_v10  ;;  %v1820_v40 = vmul.f32 0.044715, %v1628_v2  ;;  %4766 = vtanh.f32 %v6421_v32  ;;  %v2934_v52 = vmul.f32 %v2742_v17, %v9241_v33 }
 0x176   : > { %v1630_v7 = vmul.f32 %v1438_v49, %v6693_v16  ;;  %v1443_v11 = vmul.f32 %v6712_v55, %v6712_v55  ;;  %v2563_v6 = vadd.f32 1.0, %v6449_v5  ;;  %3274 = vmatprep.mubr.f32.mxu1 %v2942_v54  ;;  %v2565_v36 = vadd.f32 1.0, %v6458_v20  ;;  %v9245_v20 = vld [vmem:[#allocation23_spill] sm:$0xff] }
 0x177   : > { %v2203_v45 = vmul.f32 0.7978846, %v2011_v47  ;;  %v2012_v21 = vadd.f32 %v1820_v40, %v6686_v24  ;;  %v6730_v32 = vadd.f32 %v6407_v56, %v5867_v29  ;;  %v4757_v2 = vpop.eup %4756  ;;  %4569 = vmatprep.mubr.f32.mxu0 %v2934_v52  ;;  %3275 = vmatmul.mubr.f32.gmra.mxu1 %v6652_v50  ;;  %v6735_v1 = vadd.f32 %v1163_v35, %v5889_v41 }
 0x178   : > { %v1822_v17 = vmul.f32 0.044715, %v1630_v7  ;;  %v1635_v49 = vmul.f32 %v1443_v11, %v6712_v55  ;;  %v2755_v5 = vmul.f32 0.5, %v2563_v6  ;;  %v4759_v54 = vpop.eup %4758  ;;  %4570 = vmatmul.mubr.f32.gmra.mxu0 %v2937_v37  ;;  %v2561_v47 = vadd.f32 1.0, %v4757_v2  ;;  %v6741_v7 = vpop.f32.mrf.mxu0  ;;  %v9246_v6 = vld [vmem:[#allocation27_spill] sm:$0xff] }
 0x179   : > { %9243 = vst [vmem:[#allocation17_spill] sm:$0xff] %v6730_v32  ;;  %9244 = vst [vmem:[#allocation31_spill] sm:$0xff] %v6735_v1  ;;  %4768 = vtanh.f32 %v2203_v45  ;;  %v2943_v40 = vmul.f32 %v2751_v3, %v9245_v20  ;;  %v6738_v33 = vmul.f32 0.7978846, %v2012_v21  ;;  %v2556_v56 = vadd.f32 1.0, %v4759_v54 }
 0x17a   : > { %v2014_v52 = vadd.f32 %v1822_v17, %v6693_v16  ;;  %v1827_v59 = vmul.f32 0.044715, %v1635_v49  ;;  %v2757_v50 = vmul.f32 0.5, %v2565_v36  ;;  %v2753_v11 = vmul.f32 0.5, %v2561_v47  ;;  %v9247_v36 = vld [vmem:[#allocation24_spill] sm:$0xff]  ;;  %v9248_v47 = vld [vmem:[#allocation26_spill] sm:$0xff] }
 0x17b   : > { %v6744_v24 = vmul.f32 %v2755_v5, %v9246_v6  ;;  %v1439_v37 = vmul.f32 %v6730_v32, %v6730_v32  ;;  %v1440_v45 = vmul.f32 %v6735_v1, %v6735_v1  ;;  %v2748_v35 = vmul.f32 0.5, %v2556_v56 }
 0x17c   : > { %v6750_v3 = vpop.eup %4760  ;;  %v2206_v21 = vmul.f32 0.7978846, %v2014_v52  ;;  %v2019_v2 = vadd.f32 %v1827_v59, %v6712_v55  ;;  %4770 = vtanh.f32 %v6423_v9  ;;  %v2945_v17 = vmul.f32 %v2753_v11, %v9247_v36  ;;  %v6765_v59 = vpop.f32.mrf.mxu0 }
 0x17d   : > { %v1631_v49 = vmul.f32 %v1439_v37, %v6730_v32  ;;  %v1632_v5 = vmul.f32 %v1440_v45, %v6735_v1  ;;  %4772 = vtanh.f32 %v6460_v34  ;;  %v2940_v20 = vmul.f32 %v2748_v35, %v9248_v47  ;;  %9249 = vst [vmem:[#allocation15_spill] sm:$0xff] %v6765_v59  ;;  %v9250_v34 = vld [vmem:[#allocation28_spill] sm:$0xff]  ;;  %v4467_v36 = vpop.f32.mrf.mxu1 }
 0x17e   : > { %v6758_v54 = vpop.eup %4762  ;;  %4774 = vtanh.f32 %v2206_v21  ;;  %v2211_v6 = vmul.f32 0.7978846, %v2019_v2  ;;  %v6763_v56 = vadd.f32 %v6418_v23, %v5865_v28  ;;  %3279 = vmatprep.mubr.f32.mxu1 %v2945_v17  ;;  %v2566_v11 = vadd.f32 1.0, %v6493_v4 }
 0x17f   : > { %v1823_v9 = vmul.f32 0.044715, %v1631_v49  ;;  %v1824_v52 = vmul.f32 0.044715, %v1632_v5  ;;  %v2571_v37 = vadd.f32 1.0, %v6496_v19  ;;  %4572 = vmatprep.mubr.f32.mxu0 %v2940_v20  ;;  %3280 = vmatmul.mubr.f32.gmra.mxu1 %v6705_v12  ;;  %v2949_v45 = vmul.f32 %v2757_v50, %v9250_v34 }
 0x180   : > { %4776 = vtanh.f32 %v2211_v6  ;;  %v1441_v35 = vmul.f32 %v6763_v56, %v6763_v56  ;;  %v6775_v23 = vadd.f32 %v6427_v60, %v5867_v29  ;;  %4573 = vmatmul.mubr.f32.gmra.mxu0 %v2943_v40  ;;  %v2758_v19 = vmul.f32 0.5, %v2566_v11  ;;  %v6787_v40 = vpop.f32.mrf.mxu0 }
 0x181   : > { %v4765_v21 = vpop.eup %4764  ;;  %v2015_v2 = vadd.f32 %v1823_v9, %v6730_v32  ;;  %v2016_v4 = vadd.f32 %v1824_v52, %v6735_v1  ;;  %v6781_v12 = vadd.f32 %v6442_v8, %v5865_v28  ;;  %4778 = vtanh.f32 %v6467_v27  ;;  %9253 = vst [vmem:[#allocation22_spill] sm:$0xff] %v6787_v40  ;;  %v9254_v52 = vld [vmem:[#allocation33_spill] sm:$0xff]  ;;  %v9259_v40 = vld [vmem:[#allocation32_spill] sm:$0xff] }
 0x182   : > { %9251 = vst [vmem:[#allocation16_spill] sm:$0xff] %v6775_v23  ;;  %v4767_v50 = vpop.eup %4766  ;;  %v2564_v17 = vadd.f32 1.0, %v4765_v21  ;;  %v1633_v49 = vmul.f32 %v1441_v35, %v6763_v56  ;;  %v1442_v60 = vmul.f32 %v6775_v23, %v6775_v23  ;;  %v2763_v6 = vmul.f32 0.5, %v2571_v37  ;;  %v9256_v37 = vld [vmem:[#allocation30_spill] sm:$0xff] }
 0x183   : > { %9252 = vst [vmem:[#allocation18_spill] sm:$0xff] %v6781_v12  ;;  %v2562_v5 = vadd.f32 1.0, %v4767_v50  ;;  %v6789_v47 = vmul.f32 0.7978846, %v2015_v2  ;;  %v6791_v20 = vmul.f32 0.7978846, %v2016_v4  ;;  %v6794_v11 = vmul.f32 %v2758_v19, %v9254_v52  ;;  %v1173_v50 = vpop.f32.mrf.mxu1 }
 0x184   : > { %v2756_v8 = vmul.f32 0.5, %v2564_v17  ;;  %v1825_v9 = vmul.f32 0.044715, %v1633_v49  ;;  %v1634_v34 = vmul.f32 %v1442_v60, %v6775_v23  ;;  %v1444_v21 = vmul.f32 %v6781_v12, %v6781_v12  ;;  %v9257_v52 = vld [vmem:[#allocation44_spill] sm:$0xff] }
 0x185   : > { %v2754_v35 = vmul.f32 0.5, %v2562_v5  ;;  %v6800_v27 = vadd.f32 %v4467_v36, %v5889_v41  ;;  %v2569_v2 = vadd.f32 1.0, %v6566_v61  ;;  %v6809_v60 = vadd.f32 %v9257_v52, %v5867_v29  ;;  %v6811_v5 = vpop.f32.mrf.mxu0 }
 0x186   : > { %v6803_v4 = vpop.eup %4768  ;;  %v2948_v17 = vmul.f32 %v2756_v8, %v9256_v37  ;;  %v2017_v49 = vadd.f32 %v1825_v9, %v6763_v56  ;;  %v1826_v19 = vmul.f32 0.044715, %v1634_v34  ;;  %9258 = vst [vmem:[#allocation20_spill] sm:$0xff] %v6811_v5  ;;  %v1636_v36 = vmul.f32 %v1444_v21, %v6781_v12  ;;  %v9260_v8 = vld [vmem:[#allocation34_spill] sm:$0xff] }
 0x187   : > { %9255 = vst [vmem:[#allocation19_spill] sm:$0xff] %v6800_v27  ;;  %v2946_v59 = vmul.f32 %v2754_v35, %v9259_v40  ;;  %v1449_v61 = vmul.f32 %v6800_v27, %v6800_v27  ;;  %v2761_v1 = vmul.f32 0.5, %v2569_v2  ;;  %v2955_v37 = vmul.f32 %v2763_v6, %v9260_v8  ;;  %v6831_v8 = vpop.f32.mrf.mxu0 }
 0x188   : > { %3284 = vmatprep.mubr.f32.mxu1 %v2948_v17  ;;  %v2209_v32 = vmul.f32 0.7978846, %v2017_v49  ;;  %v1445_v9 = vmul.f32 %v6809_v60, %v6809_v60  ;;  %v6821_v34 = vadd.f32 %v1173_v50, %v5889_v41  ;;  %v2018_v40 = vadd.f32 %v1826_v19, %v6775_v23  ;;  %v9262_v17 = vld [vmem:[#allocation39_spill] sm:$0xff]  ;;  %9263 = vst [vmem:[#allocation27_spill] sm:$0xff] %v6831_v8  ;;  %v9268_v23 = vld [vmem:[#allocation38_spill] sm:$0xff] }
 0x189   : > { %v4771_v52 = vpop.eup %4770  ;;  %4575 = vmatprep.mubr.f32.mxu0 %v2946_v59  ;;  %3285 = vmatmul.mubr.f32.gmra.mxu1 %v6744_v24  ;;  %v1828_v35 = vmul.f32 0.044715, %v1636_v36  ;;  %v1641_v21 = vmul.f32 %v1449_v61, %v6800_v27  ;;  %4780 = vtanh.f32 %v6502_v57  ;;  %v6828_v49 = vmul.f32 %v2761_v1, %v9262_v17 }
 0x18a   : > { %9261 = vst [vmem:[#allocation23_spill] sm:$0xff] %v6821_v34  ;;  %v4773_v2 = vpop.eup %4772  ;;  %4576 = vmatmul.mubr.f32.gmra.mxu0 %v2949_v45  ;;  %v2567_v6 = vadd.f32 1.0, %v4771_v52  ;;  %4782 = vtanh.f32 %v2209_v32  ;;  %v1637_v50 = vmul.f32 %v1445_v9, %v6809_v60  ;;  %v1446_v57 = vmul.f32 %v6821_v34, %v6821_v34  ;;  %v9264_v32 = vld [vmem:[#allocation45_spill] sm:$0xff] }
 0x18b   : > { %v6833_v59 = vpop.eup %4774  ;;  %v2568_v24 = vadd.f32 1.0, %v4773_v2  ;;  %v2020_v19 = vadd.f32 %v1828_v35, %v6781_v12  ;;  %v1833_v36 = vmul.f32 0.044715, %v1641_v21  ;;  %4784 = vtanh.f32 %v6515_v53  ;;  %v9266_v21 = vld [vmem:[#allocation37_spill] sm:$0xff] }
 0x18c   : > { %v2759_v61 = vmul.f32 0.5, %v2567_v6  ;;  %v1829_v45 = vmul.f32 0.044715, %v1637_v50  ;;  %v6841_v1 = vadd.f32 %v9264_v32, %v5865_v28  ;;  %v1638_v35 = vmul.f32 %v1446_v57, %v6821_v34  ;;  %v6852_v50 = vpop.f32.mrf.mxu0 }
 0x18d   : > { %v6843_v9 = vpop.eup %4776  ;;  %v2760_v52 = vmul.f32 0.5, %v2568_v24  ;;  %v2212_v17 = vmul.f32 0.7978846, %v2020_v19  ;;  %v2025_v2 = vadd.f32 %v1833_v36, %v6800_v27  ;;  %v2572_v53 = vadd.f32 1.0, %v6574_v51  ;;  %9267 = vst [vmem:[#allocation26_spill] sm:$0xff] %v6852_v50  ;;  %v4470_v27 = vpop.f32.mrf.mxu1 }
 0x18e   : > { %9265 = vst [vmem:[#allocation24_spill] sm:$0xff] %v6841_v1  ;;  %v2951_v8 = vmul.f32 %v2759_v61, %v9266_v21  ;;  %v2021_v5 = vadd.f32 %v1829_v45, %v6809_v60  ;;  %v1447_v6 = vmul.f32 %v6841_v1, %v6841_v1  ;;  %v4779_v32 = vpop.eup %4778  ;;  %v6855_v24 = vmul.f32 0.7978846, %v2018_v40 }
 0x18f   : > { %v2952_v12 = vmul.f32 %v2760_v52, %v9268_v23  ;;  %v2217_v19 = vmul.f32 0.7978846, %v2025_v2  ;;  %v1830_v36 = vmul.f32 0.044715, %v1638_v35  ;;  %v2570_v57 = vadd.f32 1.0, %v4779_v32  ;;  %v9269_v23 = vld [vmem:[#allocation46_spill] sm:$0xff]  ;;  %v6868_v2 = vpop.f32.mrf.mxu0  ;;  %v1183_v32 = vpop.f32.mrf.mxu1 }
 0x190   : > { %3289 = vmatprep.mubr.f32.mxu1 %v2951_v8  ;;  %4786 = vtanh.f32 %v2212_v17  ;;  %v1639_v61 = vmul.f32 %v1447_v6, %v6841_v1  ;;  %v2764_v45 = vmul.f32 0.5, %v2572_v53  ;;  %v2577_v21 = vadd.f32 1.0, %v6583_v18  ;;  %9270 = vst [vmem:[#allocation28_spill] sm:$0xff] %v6868_v2  ;;  %v9272_v18 = vld [vmem:[#allocation47_spill] sm:$0xff] }
 0x191   : > { %4578 = vmatprep.mubr.f32.mxu0 %v2952_v12  ;;  %3290 = vmatmul.mubr.f32.gmra.mxu1 %v6794_v11  ;;  %4788 = vtanh.f32 %v2217_v19  ;;  %v2022_v51 = vadd.f32 %v1830_v36, %v6821_v34  ;;  %v6863_v40 = vadd.f32 %v9269_v23, %v5867_v29  ;;  %v2762_v52 = vmul.f32 0.5, %v2570_v57  ;;  %v9271_v12 = vld [vmem:[#allocation41_spill] sm:$0xff] }
 0x192   : > { %4579 = vmatmul.mubr.f32.gmra.mxu0 %v2955_v37  ;;  %v6865_v8 = vmul.f32 0.7978846, %v2021_v5  ;;  %v1831_v17 = vmul.f32 0.044715, %v1639_v61  ;;  %4790 = vtanh.f32 %v6587_v43  ;;  %v2956_v11 = vmul.f32 %v2764_v45, %v9271_v12  ;;  %v9273_v37 = vld [vmem:[#allocation40_spill] sm:$0xff] }
 0x193   : > { %v2769_v35 = vmul.f32 0.5, %v2577_v21  ;;  %v1448_v6 = vmul.f32 %v6863_v40, %v6863_v40  ;;  %v6875_v53 = vadd.f32 %v9272_v18, %v5865_v28  ;;  %v2954_v19 = vmul.f32 %v2762_v52, %v9273_v37 }
 0x194   : > { %v2023_v5 = vadd.f32 %v1831_v17, %v6841_v1  ;;  %v6880_v36 = vadd.f32 %v4470_v27, %v5889_v41  ;;  %v2575_v43 = vadd.f32 1.0, %v6624_v39  ;;  %v6883_v57 = vmul.f32 0.7978846, %v2022_v51  ;;  %v6897_v51 = vpop.f32.mrf.mxu0 }
 0x195   : > { %v1640_v61 = vmul.f32 %v1448_v6, %v6863_v40  ;;  %v1450_v45 = vmul.f32 %v6875_v53, %v6875_v53  ;;  %v6890_v21 = vadd.f32 %v6499_v26, %v5867_v29  ;;  %3294 = vmatprep.mubr.f32.mxu1 %v2954_v19  ;;  %v6895_v39 = vadd.f32 %v1183_v32, %v5889_v41  ;;  %v9277_v19 = vld [vmem:[#allocation42_spill] sm:$0xff] }
 0x196   : > { %v4781_v23 = vpop.eup %4780  ;;  %v2215_v52 = vmul.f32 0.7978846, %v2023_v5  ;;  %v1455_v27 = vmul.f32 %v6880_v36, %v6880_v36  ;;  %v2767_v17 = vmul.f32 0.5, %v2575_v43  ;;  %9276 = vst [vmem:[#allocation44_spill] sm:$0xff] %v6897_v51  ;;  %3295 = vmatmul.mubr.f32.gmra.mxu1 %v6828_v49  ;;  %v2961_v5 = vmul.f32 %v2769_v35, %v9277_v19  ;;  %v6915_v35 = vpop.f32.mrf.mxu0 }
 0x197   : > { %9274 = vst [vmem:[#allocation33_spill] sm:$0xff] %v6890_v21  ;;  %9275 = vst [vmem:[#allocation30_spill] sm:$0xff] %v6895_v39  ;;  %v6899_v12 = vpop.eup %4782  ;;  %v2573_v6 = vadd.f32 1.0, %v4781_v23  ;;  %v1832_v18 = vmul.f32 0.044715, %v1640_v61  ;;  %v1642_v26 = vmul.f32 %v1450_v45, %v6875_v53  ;;  %v1451_v37 = vmul.f32 %v6890_v21, %v6890_v21 }
 0x198   : > { %4792 = vtanh.f32 %v2215_v52  ;;  %v1647_v43 = vmul.f32 %v1455_v27, %v6880_v36  ;;  %v1452_v32 = vmul.f32 %v6895_v39, %v6895_v39  ;;  %v4785_v51 = vpop.eup %4784  ;;  %v6910_v49 = vmul.f32 %v2767_v17, %v6478_v62  ;;  %9278 = vst [vmem:[#allocation32_spill] sm:$0xff] %v6915_v35  ;;  %v9279_v52 = vld [vmem:[#allocation43_spill] sm:$0xff] }
 0x199   : > { %v2765_v2 = vmul.f32 0.5, %v2573_v6  ;;  %v1834_v50 = vmul.f32 0.044715, %v1642_v26  ;;  %v1643_v61 = vmul.f32 %v1451_v37, %v6890_v21  ;;  %v2574_v45 = vadd.f32 1.0, %v4785_v51 }
 0x19a   : > { %v1839_v23 = vmul.f32 0.044715, %v1647_v43  ;;  %v1644_v34 = vmul.f32 %v1452_v32, %v6895_v39  ;;  %4794 = vtanh.f32 %v6601_v63  ;;  %v2024_v19 = vadd.f32 %v1832_v18, %v6863_v40 }
 0x19b   : > { %v2957_v27 = vmul.f32 %v2765_v2, %v9279_v52  ;;  %v2026_v6 = vadd.f32 %v1834_v50, %v6875_v53  ;;  %v1835_v26 = vmul.f32 0.044715, %v1643_v61  ;;  %v2766_v1 = vmul.f32 0.5, %v2574_v45  ;;  %v4473_v50 = vpop.f32.mrf.mxu1  ;;  %v6935_v45 = vpop.f32.mrf.mxu0 }
 0x19c   : > { %v2031_v62 = vadd.f32 %v1839_v23, %v6880_v36  ;;  %v1836_v17 = vmul.f32 0.044715, %v1644_v34  ;;  %4796 = vtanh.f32 %v6647_v25  ;;  %v6927_v2 = vadd.f32 %v6507_v22, %v5865_v28  ;;  %9281 = vst [vmem:[#allocation39_spill] sm:$0xff] %v6935_v45 }
 0x19d   : > { %v6922_v51 = vpop.eup %4786  ;;  %3299 = vmatprep.mubr.f32.mxu1 %v2957_v27  ;;  %v2218_v37 = vmul.f32 0.7978846, %v2026_v6  ;;  %v2027_v63 = vadd.f32 %v1835_v26, %v6890_v21  ;;  %v2578_v18 = vadd.f32 1.0, %v6663_v44  ;;  %v2958_v32 = vmul.f32 %v2766_v1, %v6464_v58  ;;  %v9282_v6 = vld [vmem:[#allocation3_spill] sm:$0xff]  ;;  %v1193_v26 = vpop.f32.mrf.mxu1 }
 0x19e   : > { %9280 = vst [vmem:[#allocation34_spill] sm:$0xff] %v6927_v2  ;;  %v6930_v43 = vpop.eup %4788  ;;  %3300 = vmatmul.mubr.f32.gmra.mxu1 %v2956_v11  ;;  %v2223_v34 = vmul.f32 0.7978846, %v2031_v62  ;;  %v2028_v25 = vadd.f32 %v1836_v17, %v6895_v39  ;;  %v2583_v61 = vadd.f32 1.0, %v6669_v13  ;;  %v6937_v52 = vmul.f32 0.7978846, %v2024_v19 }
 0x19f   : > { %v4791_v23 = vpop.eup %4790  ;;  %4798 = vtanh.f32 %v2218_v37  ;;  %v1453_v22 = vmul.f32 %v6927_v2, %v6927_v2  ;;  %v2770_v44 = vmul.f32 0.5, %v2578_v18  ;;  %4581 = vmatprep.mubr.f32.mxu0 %v2958_v32  ;;  %v6941_v58 = vmul.f32 0.7978846, %v2027_v63  ;;  %v9284_v37 = vld [vmem:[#allocation5_spill] sm:$0xff]  ;;  %v6961_v18 = vpop.f32.mrf.mxu0 }
 0x1a0   : > { %v2576_v27 = vadd.f32 1.0, %v4791_v23  ;;  %4800 = vtanh.f32 %v2223_v34  ;;  %v6943_v1 = vmul.f32 0.7978846, %v2028_v25  ;;  %4582 = vmatmul.mubr.f32.gmra.mxu0 %v2961_v5  ;;  %v2775_v11 = vmul.f32 0.5, %v2583_v61  ;;  %9286 = vst [vmem:[#allocation38_spill] sm:$0xff] %v6961_v18  ;;  %v9287_v25 = vld [vmem:[#allocation4_spill] sm:$0xff] }
 0x1a1   : > { %v1645_v13 = vmul.f32 %v1453_v22, %v6927_v2  ;;  %v6948_v19 = vadd.f32 %v9282_v6, %v5867_v29  ;;  %4802 = vtanh.f32 %v6649_v0  ;;  %v6952_v17 = vmul.f32 %v2770_v44, %v6520_v42 }
 0x1a2   : > { %v2768_v62 = vmul.f32 0.5, %v2576_v27  ;;  %v6956_v63 = vadd.f32 %v9284_v37, %v5865_v28  ;;  %v6959_v5 = vadd.f32 %v4473_v50, %v5889_v41  ;;  %v2581_v0 = vadd.f32 1.0, %v6714_v46  ;;  %v9290_v46 = vld [vmem:[#allocation6_spill] sm:$0xff] }
 0x1a3   : > { %9283 = vst [vmem:[#allocation45_spill] sm:$0xff] %v6948_v19  ;;  %v1837_v32 = vmul.f32 0.044715, %v1645_v13  ;;  %v1454_v34 = vmul.f32 %v6948_v19, %v6948_v19  ;;  %v6968_v61 = vadd.f32 %v9287_v25, %v5867_v29  ;;  %v6976_v22 = vadd.f32 %v1193_v26, %v5889_v41  ;;  %v4476_v25 = vpop.f32.mrf.mxu1 }
 0x1a4   : > { %9285 = vst [vmem:[#allocation37_spill] sm:$0xff] %v6959_v5  ;;  %v2960_v42 = vmul.f32 %v2768_v62, %v6513_v15  ;;  %v1456_v23 = vmul.f32 %v6956_v63, %v6956_v63  ;;  %v1461_v50 = vmul.f32 %v6959_v5, %v6959_v5  ;;  %v6982_v13 = vmul.f32 %v2775_v11, %v9290_v46 }
 0x1a5   : > { %9288 = vst [vmem:[#allocation46_spill] sm:$0xff] %v6968_v61  ;;  %9289 = vst [vmem:[#allocation41_spill] sm:$0xff] %v6976_v22  ;;  %v6978_v44 = vpop.eup %4792  ;;  %v2029_v27 = vadd.f32 %v1837_v32, %v6927_v2  ;;  %v1646_v6 = vmul.f32 %v1454_v34, %v6948_v19  ;;  %v1457_v15 = vmul.f32 %v6968_v61, %v6968_v61  ;;  %4804 = vtanh.f32 %v6698_v30  ;;  %v6992_v32 = vpop.f32.mrf.mxu0 }
 0x1a6   : > { %3304 = vmatprep.mubr.f32.mxu1 %v2960_v42  ;;  %v1648_v62 = vmul.f32 %v1456_v23, %v6956_v63  ;;  %v1653_v37 = vmul.f32 %v1461_v50, %v6959_v5  ;;  %v1458_v26 = vmul.f32 %v6976_v22, %v6976_v22  ;;  %9291 = vst [vmem:[#allocation47_spill] sm:$0xff] %v6992_v32  ;;  %v2773_v18 = vmul.f32 0.5, %v2581_v0  ;;  %v9292_v32 = vld [vmem:[#allocation9_spill] sm:$0xff] }
 0x1a7   : > { %v4795_v11 = vpop.eup %4794  ;;  %3305 = vmatmul.mubr.f32.gmra.mxu1 %v6910_v49  ;;  %v2221_v34 = vmul.f32 0.7978846, %v2029_v27  ;;  %v1838_v46 = vmul.f32 0.044715, %v1646_v6  ;;  %v1649_v42 = vmul.f32 %v1457_v15, %v6968_v61  ;;  %v7000_v2 = vadd.f32 %v9292_v32, %v5865_v28  ;;  %v1203_v15 = vpop.f32.mrf.mxu1  ;;  %v9295_v32 = vld [vmem:[#allocation2_spill] sm:$0xff] }
 0x1a8   : > { %v2579_v45 = vadd.f32 1.0, %v4795_v11  ;;  %v1840_v23 = vmul.f32 0.044715, %v1648_v62  ;;  %v1845_v39 = vmul.f32 0.044715, %v1653_v37  ;;  %v1650_v50 = vmul.f32 %v1458_v26, %v6976_v22  ;;  %v7004_v62 = vpop.f32.mrf.mxu0  ;;  %v9294_v37 = vld [vmem:[#allocation7_spill] sm:$0xff] }
 0x1a9   : > { %v4797_v35 = vpop.eup %4796  ;;  %4806 = vtanh.f32 %v2221_v34  ;;  %v2030_v30 = vadd.f32 %v1838_v46, %v6948_v19  ;;  %v1841_v21 = vmul.f32 0.044715, %v1649_v42  ;;  %9293 = vst [vmem:[#allocation40_spill] sm:$0xff] %v7004_v62  ;;  %v2965_v26 = vmul.f32 %v2773_v18, %v9294_v37  ;;  %v9296_v37 = vld [vmem:[#allocation12_spill] sm:$0xff] }
 0x1aa   : > { %v2771_v49 = vmul.f32 0.5, %v2579_v45  ;;  %v2580_v27 = vadd.f32 1.0, %v4797_v35  ;;  %v2032_v0 = vadd.f32 %v1840_v23, %v6956_v63  ;;  %v2037_v6 = vadd.f32 %v1845_v39, %v6959_v5  ;;  %v7012_v23 = vpop.f32.mrf.mxu1 }
 0x1ab   : > { %v2033_v11 = vadd.f32 %v1841_v21, %v6968_v61  ;;  %v1842_v34 = vmul.f32 0.044715, %v1650_v50  ;;  %4808 = vtanh.f32 %v6700_v48  ;;  %v7016_v5 = vmul.f32 0.7978846, %v2030_v30  ;;  %v7028_v30 = vpop.f32.mrf.mxu0 }
 0x1ac   : > { %v7009_v46 = vpop.eup %4798  ;;  %v2963_v42 = vmul.f32 %v2771_v49, %v9295_v32  ;;  %v2772_v45 = vmul.f32 0.5, %v2580_v27  ;;  %v2224_v35 = vmul.f32 0.7978846, %v2032_v0  ;;  %v2229_v19 = vmul.f32 0.7978846, %v2037_v6  ;;  %v9297_v0 = vld [vmem:[#allocation8_spill] sm:$0xff] }
 0x1ad   : > { %v7014_v39 = vpop.eup %4800  ;;  %v2034_v18 = vadd.f32 %v1842_v34, %v6976_v22  ;;  %v1459_v21 = vmul.f32 %v7000_v2, %v7000_v2  ;;  %v2584_v48 = vadd.f32 1.0, %v6750_v3  ;;  %v2589_v27 = vadd.f32 1.0, %v6758_v54  ;;  %9298 = vst [vmem:[#allocation42_spill] sm:$0xff] %v7028_v30 }
 0x1ae   : > { %v4803_v50 = vpop.eup %4802  ;;  %3309 = vmatprep.mubr.f32.mxu1 %v2963_v42  ;;  %v2964_v49 = vmul.f32 %v2772_v45, %v9296_v37  ;;  %4810 = vtanh.f32 %v2224_v35  ;;  %v7026_v6 = vadd.f32 %v9297_v0, %v5867_v29  ;;  %v7031_v32 = vmul.f32 0.7978846, %v2033_v11  ;;  %v7039_v35 = vpop.f32.mrf.mxu1 }
 0x1af   : > { %3310 = vmatmul.mubr.f32.gmra.mxu1 %v6952_v17  ;;  %v2582_v34 = vadd.f32 1.0, %v4803_v50  ;;  %4812 = vtanh.f32 %v2229_v19  ;;  %v1651_v3 = vmul.f32 %v1459_v21, %v7000_v2  ;;  %v7034_v42 = vmul.f32 0.7978846, %v2034_v18  ;;  %v9299_v19 = vld [vmem:[#allocation13_spill] sm:$0xff]  ;;  %v7054_v0 = vpop.f32.mrf.mxu0 }
 0x1b0   : > { %4584 = vmatprep.mubr.f32.mxu0 %v2964_v49  ;;  %v2776_v45 = vmul.f32 0.5, %v2584_v48  ;;  %v1460_v54 = vmul.f32 %v7026_v6, %v7026_v6  ;;  %4814 = vtanh.f32 %v6738_v33  ;;  %v7044_v11 = vadd.f32 %v9299_v19, %v5865_v28  ;;  %v7052_v49 = vpop.f32.mrf.mxu1  ;;  %9301 = vst [vmem:[#allocation3_spill] sm:$0xff] %v7054_v0 }
 0x1b1   : > { %4585 = vmatmul.mubr.f32.gmra.mxu0 %v6982_v13  ;;  %v2774_v17 = vmul.f32 0.5, %v2582_v34  ;;  %v1843_v50 = vmul.f32 0.044715, %v1651_v3  ;;  %v7047_v21 = vadd.f32 %v4476_v25, %v5889_v41  ;;  %v2781_v48 = vmul.f32 0.5, %v2589_v27  ;;  %v9302_v34 = vld [vmem:[#allocation21_spill] sm:$0xff] }
 0x1b2   : > { %v2968_v18 = vmul.f32 %v2776_v45, %v6616_v38  ;;  %v1652_v37 = vmul.f32 %v1460_v54, %v7026_v6  ;;  %v2587_v33 = vadd.f32 1.0, %v6803_v4  ;;  %v4805_v13 = vpop.eup %4804  ;;  %v1462_v25 = vmul.f32 %v7044_v11, %v7044_v11  ;;  %v9303_v4 = vld [vmem:[#allocation25_spill] sm:$0xff] }
 0x1b3   : > { %9300 = vst [vmem:[#allocation43_spill] sm:$0xff] %v7047_v21  ;;  %v2966_v3 = vmul.f32 %v2774_v17, %v9302_v34  ;;  %v2035_v19 = vadd.f32 %v1843_v50, %v7000_v2  ;;  %v1467_v38 = vmul.f32 %v7047_v21, %v7047_v21  ;;  %v2585_v27 = vadd.f32 1.0, %v4805_v13  ;;  %v9306_v13 = vld [vmem:[#allocation14_spill] sm:$0xff] }
 0x1b4   : > { %v1844_v45 = vmul.f32 0.044715, %v1652_v37  ;;  %v2779_v54 = vmul.f32 0.5, %v2587_v33  ;;  %v7064_v30 = vadd.f32 %v9303_v4, %v5867_v29  ;;  %v1654_v62 = vmul.f32 %v1462_v25, %v7044_v11 }
 0x1b5   : > { %3314 = vmatprep.mubr.f32.mxu1 %v2966_v3  ;;  %v2227_v0 = vmul.f32 0.7978846, %v2035_v19  ;;  %v1659_v17 = vmul.f32 %v1467_v38, %v7047_v21  ;;  %v7069_v50 = vadd.f32 %v1203_v15, %v5889_v41  ;;  %v2777_v22 = vmul.f32 0.5, %v2585_v27  ;;  %v7077_v3 = vpop.f32.mrf.mxu1  ;;  %v7079_v19 = vpop.f32.mrf.mxu0 }
 0x1b6   : > { %9304 = vst [vmem:[#allocation5_spill] sm:$0xff] %v7064_v30  ;;  %v7071_v34 = vpop.eup %4806  ;;  %3315 = vmatmul.mubr.f32.gmra.mxu1 %v2965_v26  ;;  %v2973_v37 = vmul.f32 %v2781_v48, %v9306_v13  ;;  %v2036_v33 = vadd.f32 %v1844_v45, %v7026_v6  ;;  %v1463_v4 = vmul.f32 %v7064_v30, %v7064_v30  ;;  %9307 = vst [vmem:[#allocation6_spill] sm:$0xff] %v7079_v19 }
 0x1b7   : > { %9305 = vst [vmem:[#allocation4_spill] sm:$0xff] %v7069_v50  ;;  %4816 = vtanh.f32 %v2227_v0  ;;  %v1846_v25 = vmul.f32 0.044715, %v1654_v62  ;;  %v1851_v38 = vmul.f32 0.044715, %v1659_v17  ;;  %v1464_v15 = vmul.f32 %v7069_v50, %v7069_v50 }
 0x1b8   : > { %v4809_v61 = vpop.eup %4808  ;;  %v2969_v26 = vmul.f32 %v2777_v22, %v6636_v14  ;;  %v7085_v48 = vmul.f32 %v2779_v54, %v6674_v10  ;;  %v1655_v27 = vmul.f32 %v1463_v4, %v7064_v30  ;;  %4818 = vtanh.f32 %v6789_v47  ;;  %v9308_v14 = vld [vmem:[#allocation10_spill] sm:$0xff]  ;;  %v7098_v54 = vpop.f32.mrf.mxu1 }
 0x1b9   : > { %v2586_v45 = vadd.f32 1.0, %v4809_v61  ;;  %v2038_v13 = vadd.f32 %v1846_v25, %v7044_v11  ;;  %v2043_v0 = vadd.f32 %v1851_v38, %v7047_v21  ;;  %v1656_v62 = vmul.f32 %v1464_v15, %v7069_v50  ;;  %v7100_v47 = vpop.f32.mrf.mxu0 }
 0x1ba   : > { %3319 = vmatprep.mubr.f32.mxu1 %v2969_v26  ;;  %v1847_v17 = vmul.f32 0.044715, %v1655_v27  ;;  %4820 = vtanh.f32 %v6791_v20  ;;  %v7095_v22 = vadd.f32 %v9308_v14, %v5865_v28  ;;  %v2590_v10 = vadd.f32 1.0, %v6833_v59  ;;  %9310 = vst [vmem:[#allocation7_spill] sm:$0xff] %v7100_v47 }
 0x1bb   : > { %v7102_v61 = vpop.eup %4810  ;;  %v2778_v4 = vmul.f32 0.5, %v2586_v45  ;;  %3320 = vmatmul.mubr.f32.gmra.mxu1 %v2968_v18  ;;  %v2230_v25 = vmul.f32 0.7978846, %v2038_v13  ;;  %v2235_v38 = vmul.f32 0.7978846, %v2043_v0  ;;  %v2595_v15 = vadd.f32 1.0, %v6843_v9 }
 0x1bc   : > { %9309 = vst [vmem:[#allocation9_spill] sm:$0xff] %v7095_v22  ;;  %v7105_v26 = vpop.eup %4812  ;;  %v2039_v20 = vadd.f32 %v1847_v17, %v7064_v30  ;;  %v1848_v27 = vmul.f32 0.044715, %v1656_v62  ;;  %v1465_v59 = vmul.f32 %v7095_v22, %v7095_v22  ;;  %v2782_v14 = vmul.f32 0.5, %v2590_v10  ;;  %v9311_v18 = vld [vmem:[#allocation29_spill] sm:$0xff]  ;;  %v7119_v62 = vpop.f32.mrf.mxu1 }
 0x1bd   : > { %v4815_v19 = vpop.eup %4814  ;;  %v2970_v47 = vmul.f32 %v2778_v4, %v6644_v31  ;;  %4822 = vtanh.f32 %v2230_v25  ;;  %v2787_v21 = vmul.f32 0.5, %v2595_v15  ;;  %v7113_v45 = vadd.f32 %v9311_v18, %v5867_v29  ;;  %v7121_v17 = vpop.f32.mrf.mxu0 }
 0x1be   : > { %v7115_v13 = vmul.f32 0.7978846, %v2036_v33  ;;  %v2588_v9 = vadd.f32 1.0, %v4815_v19  ;;  %4824 = vtanh.f32 %v2235_v38  ;;  %v7117_v0 = vmul.f32 0.7978846, %v2039_v20  ;;  %9313 = vst [vmem:[#allocation12_spill] sm:$0xff] %v7121_v17  ;;  %v7155_v18 = vpop.f32.mrf.mxu1 }
 0x1bf   : > { %9312 = vst [vmem:[#allocation2_spill] sm:$0xff] %v7113_v45  ;;  %4587 = vmatprep.mubr.f32.mxu0 %v2970_v47  ;;  %v2040_v10 = vadd.f32 %v1848_v27, %v7069_v50  ;;  %v1657_v31 = vmul.f32 %v1465_v59, %v7095_v22  ;;  %v7126_v4 = vmul.f32 %v2782_v14, %v6693_v16  ;;  %4826 = vtanh.f32 %v6855_v24  ;;  %v9314_v38 = vld [vmem:[#allocation35_spill] sm:$0xff]  ;;  %v9317_v24 = vld [vmem:[#allocation36_spill] sm:$0xff] }
 0x1c0   : > { %v1466_v33 = vmul.f32 %v7113_v45, %v7113_v45  ;;  %4588 = vmatmul.mubr.f32.gmra.mxu0 %v2973_v37  ;;  %v2780_v19 = vmul.f32 0.5, %v2588_v9  ;;  %v7131_v25 = vmul.f32 %v2787_v21, %v6712_v55  ;;  %v7136_v47 = vadd.f32 %v9314_v38, %v5865_v28  ;;  %v9316_v37 = vld [vmem:[#allocation11_spill] sm:$0xff]  ;;  %v7157_v9 = vpop.f32.mrf.mxu0  ;;  %v7177_v30 = vpop.f32.mrf.mxu1 }
 0x1c1   : > { %v1849_v15 = vmul.f32 0.044715, %v1657_v31  ;;  %v7141_v16 = vadd.f32 %v7012_v23, %v5889_v41  ;;  %v2593_v27 = vadd.f32 1.0, %v6899_v12  ;;  %v7149_v21 = vadd.f32 %v9317_v24, %v5867_v29  ;;  %9320 = vst [vmem:[#allocation25_spill] sm:$0xff] %v7157_v9 }
 0x1c2   : > { %v1658_v20 = vmul.f32 %v1466_v33, %v7113_v45  ;;  %v2972_v59 = vmul.f32 %v2780_v19, %v9316_v37  ;;  %v1468_v55 = vmul.f32 %v7136_v47, %v7136_v47  ;;  %v7153_v14 = vadd.f32 %v7039_v35, %v5889_v41 }
 0x1c3   : > { %9315 = vst [vmem:[#allocation8_spill] sm:$0xff] %v7141_v16  ;;  %9318 = vst [vmem:[#allocation13_spill] sm:$0xff] %v7149_v21  ;;  %v2041_v23 = vadd.f32 %v1849_v15, %v7095_v22  ;;  %v1473_v31 = vmul.f32 %v7141_v16, %v7141_v16  ;;  %v2785_v33 = vmul.f32 0.5, %v2593_v27  ;;  %v1469_v35 = vmul.f32 %v7149_v21, %v7149_v21  ;;  %v7179_v22 = vpop.f32.mrf.mxu0 }
 0x1c4   : > { %9319 = vst [vmem:[#allocation21_spill] sm:$0xff] %v7153_v14  ;;  %v1850_v12 = vmul.f32 0.044715, %v1658_v20  ;;  %v7162_v19 = vpop.eup %4816  ;;  %3324 = vmatprep.mubr.f32.mxu1 %v2972_v59  ;;  %v1660_v38 = vmul.f32 %v1468_v55, %v7136_v47  ;;  %v1470_v37 = vmul.f32 %v7153_v14, %v7153_v14  ;;  %4828 = vtanh.f32 %v6865_v8  ;;  %9321 = vst [vmem:[#allocation14_spill] sm:$0xff] %v7179_v22 }
 0x1c5   : > { %v4819_v24 = vpop.eup %4818  ;;  %3325 = vmatmul.mubr.f32.gmra.mxu1 %v7085_v48  ;;  %v7171_v15 = vmul.f32 0.7978846, %v2040_v10  ;;  %v2233_v20 = vmul.f32 0.7978846, %v2041_v23  ;;  %v1665_v59 = vmul.f32 %v1473_v31, %v7141_v16  ;;  %v1661_v17 = vmul.f32 %v1469_v35, %v7149_v21 }
 0x1c6   : > { %v2042_v27 = vadd.f32 %v1850_v12, %v7113_v45  ;;  %v2591_v9 = vadd.f32 1.0, %v4819_v24  ;;  %v1852_v55 = vmul.f32 0.044715, %v1660_v38  ;;  %v1662_v50 = vmul.f32 %v1470_v37, %v7153_v14  ;;  %v9325_v45 = vld [vmem:[#allocation31_spill] sm:$0xff] }
 0x1c7   : > { %v4821_v8 = vpop.eup %4820  ;;  %4830 = vtanh.f32 %v2233_v20  ;;  %v1857_v48 = vmul.f32 0.044715, %v1665_v59  ;;  %v7182_v10 = vmul.f32 %v2785_v33, %v6763_v56  ;;  %v7186_v23 = vadd.f32 %v6741_v7, %v5865_v28  ;;  %v9323_v56 = vld [vmem:[#allocation17_spill] sm:$0xff] }
 0x1c8   : > { %v2783_v12 = vmul.f32 0.5, %v2591_v9  ;;  %v2592_v31 = vadd.f32 1.0, %v4821_v8  ;;  %v2044_v38 = vadd.f32 %v1852_v55, %v7136_v47  ;;  %v1853_v35 = vmul.f32 0.044715, %v1661_v17  ;;  %v7197_v8 = vpop.f32.mrf.mxu1  ;;  %v7199_v55 = vpop.f32.mrf.mxu0 }
 0x1c9   : > { %9322 = vst [vmem:[#allocation10_spill] sm:$0xff] %v7186_v23  ;;  %v2049_v37 = vadd.f32 %v1857_v48, %v7141_v16  ;;  %v1854_v24 = vmul.f32 0.044715, %v1662_v50  ;;  %4832 = vtanh.f32 %v6883_v57  ;;  %v1471_v20 = vmul.f32 %v7186_v23, %v7186_v23  ;;  %9324 = vst [vmem:[#allocation29_spill] sm:$0xff] %v7199_v55 }
 0x1ca   : > { %v7193_v59 = vpop.eup %4822  ;;  %v2975_v33 = vmul.f32 %v2783_v12, %v9323_v56  ;;  %v2784_v22 = vmul.f32 0.5, %v2592_v31  ;;  %v2236_v7 = vmul.f32 0.7978846, %v2044_v38  ;;  %v2045_v9 = vadd.f32 %v1853_v35, %v7149_v21 }
 0x1cb   : > { %v7201_v17 = vpop.eup %4824  ;;  %v2241_v50 = vmul.f32 0.7978846, %v2049_v37  ;;  %v2046_v57 = vadd.f32 %v1854_v24, %v7153_v14  ;;  %v1663_v48 = vmul.f32 %v1471_v20, %v7186_v23  ;;  %v2596_v16 = vadd.f32 1.0, %v6922_v51  ;;  %v9326_v51 = vld [vmem:[#allocation15_spill] sm:$0xff] }
 0x1cc   : > { %3329 = vmatprep.mubr.f32.mxu1 %v2975_v33  ;;  %v2976_v12 = vmul.f32 %v2784_v22, %v9325_v45  ;;  %v7207_v31 = vmul.f32 0.7978846, %v2042_v27  ;;  %4834 = vtanh.f32 %v2236_v7  ;;  %v2601_v38 = vadd.f32 1.0, %v6930_v43  ;;  %v4827_v35 = vpop.eup %4826  ;;  %v7223_v43 = vpop.f32.mrf.mxu1  ;;  %v9330_v33 = vld [vmem:[#allocation22_spill] sm:$0xff] }
 0x1cd   : > { %3330 = vmatmul.mubr.f32.gmra.mxu1 %v7126_v4  ;;  %4836 = vtanh.f32 %v2241_v50  ;;  %v7211_v56 = vmul.f32 0.7978846, %v2045_v9  ;;  %v1855_v37 = vmul.f32 0.044715, %v1663_v48  ;;  %v2788_v24 = vmul.f32 0.5, %v2596_v16  ;;  %v7225_v4 = vpop.f32.mrf.mxu0  ;;  %v9332_v50 = vld [vmem:[#allocation18_spill] sm:$0xff] }
 0x1ce   : > { %4590 = vmatprep.mubr.f32.mxu0 %v2976_v12  ;;  %v2594_v20 = vadd.f32 1.0, %v4827_v35  ;;  %v7213_v55 = vmul.f32 0.7978846, %v2046_v57  ;;  %v7217_v22 = vadd.f32 %v9326_v51, %v5867_v29  ;;  %v7221_v45 = vadd.f32 %v7052_v49, %v5889_v41  ;;  %9329 = vst [vmem:[#allocation36_spill] sm:$0xff] %v7225_v4 }
 0x1cf   : > { %4591 = vmatmul.mubr.f32.gmra.mxu0 %v7131_v25  ;;  %v2047_v16 = vadd.f32 %v1855_v37, %v7186_v23  ;;  %v2793_v27 = vmul.f32 0.5, %v2601_v38  ;;  %4838 = vtanh.f32 %v6937_v52  ;;  %v7232_v7 = vadd.f32 %v9330_v33, %v5865_v28  ;;  %v9334_v37 = vld [vmem:[#allocation16_spill] sm:$0xff]  ;;  %v7251_v4 = vpop.f32.mrf.mxu0 }
 0x1d0   : > { %9327 = vst [vmem:[#allocation35_spill] sm:$0xff] %v7217_v22  ;;  %9328 = vst [vmem:[#allocation11_spill] sm:$0xff] %v7221_v45  ;;  %v2786_v9 = vmul.f32 0.5, %v2594_v20  ;;  %v2980_v57 = vmul.f32 %v2788_v24, %v9332_v50  ;;  %v1472_v49 = vmul.f32 %v7217_v22, %v7217_v22  ;;  %v1479_v48 = vmul.f32 %v7221_v45, %v7221_v45  ;;  %v7249_v50 = vpop.f32.mrf.mxu1 }
 0x1d1   : > { %9331 = vst [vmem:[#allocation17_spill] sm:$0xff] %v7232_v7  ;;  %v4829_v12 = vpop.eup %4828  ;;  %v2239_v25 = vmul.f32 0.7978846, %v2047_v16  ;;  %v1474_v38 = vmul.f32 %v7232_v7, %v7232_v7  ;;  %v2599_v52 = vadd.f32 1.0, %v6978_v44  ;;  %v7244_v35 = vadd.f32 %v7077_v3, %v5889_v41  ;;  %9335 = vst [vmem:[#allocation15_spill] sm:$0xff] %v7251_v4  ;;  %v9336_v16 = vld [vmem:[#allocation19_spill] sm:$0xff] }
 0x1d2   : > { %v2978_v20 = vmul.f32 %v2786_v9, %v9334_v37  ;;  %v2597_v24 = vadd.f32 1.0, %v4829_v12  ;;  %v1664_v51 = vmul.f32 %v1472_v49, %v7217_v22  ;;  %v1671_v33 = vmul.f32 %v1479_v48, %v7221_v45  ;;  %v9337_v48 = vld [vmem:[#allocation20_spill] sm:$0xff] }
 0x1d3   : > { %9333 = vst [vmem:[#allocation31_spill] sm:$0xff] %v7244_v35  ;;  %v2985_v23 = vmul.f32 %v2793_v27, %v9336_v16  ;;  %v1666_v14 = vmul.f32 %v1474_v38, %v7232_v7  ;;  %v2791_v44 = vmul.f32 0.5, %v2599_v52  ;;  %v1476_v3 = vmul.f32 %v7244_v35, %v7244_v35 }
 0x1d4   : > { %v7257_v21 = vpop.eup %4830  ;;  %3334 = vmatprep.mubr.f32.mxu1 %v2978_v20  ;;  %v2789_v9 = vmul.f32 0.5, %v2597_v24  ;;  %v1856_v12 = vmul.f32 0.044715, %v1664_v51  ;;  %v1863_v49 = vmul.f32 0.044715, %v1671_v33  ;;  %v7261_v37 = vadd.f32 %v9337_v48, %v5867_v29  ;;  %v7274_v48 = vpop.f32.mrf.mxu1 }
 0x1d5   : > { %3335 = vmatmul.mubr.f32.gmra.mxu1 %v7182_v10  ;;  %4840 = vtanh.f32 %v2239_v25  ;;  %v1858_v27 = vmul.f32 0.044715, %v1666_v14  ;;  %v1668_v38 = vmul.f32 %v1476_v3, %v7244_v35  ;;  %v7267_v52 = vadd.f32 %v7098_v54, %v5889_v41  ;;  %v7276_v10 = vpop.f32.mrf.mxu0 }
 0x1d6   : > { %9338 = vst [vmem:[#allocation22_spill] sm:$0xff] %v7261_v37  ;;  %v4833_v16 = vpop.eup %4832  ;;  %v2981_v20 = vmul.f32 %v2789_v9, %v6809_v60  ;;  %v2048_v24 = vadd.f32 %v1856_v12, %v7217_v22  ;;  %v2055_v51 = vadd.f32 %v1863_v49, %v7221_v45  ;;  %v1475_v33 = vmul.f32 %v7261_v37, %v7261_v37  ;;  %v9341_v9 = vld [vmem:[#allocation24_spill] sm:$0xff] }
 0x1d7   : > { %9339 = vst [vmem:[#allocation18_spill] sm:$0xff] %v7267_v52  ;;  %9340 = vst [vmem:[#allocation16_spill] sm:$0xff] %v7276_v10  ;;  %v2598_v14 = vadd.f32 1.0, %v4833_v16  ;;  %v2050_v25 = vadd.f32 %v1858_v27, %v7232_v7  ;;  %v1860_v3 = vmul.f32 0.044715, %v1668_v38  ;;  %v1485_v54 = vmul.f32 %v7267_v52, %v7267_v52 }
 0x1d8   : > { %3339 = vmatprep.mubr.f32.mxu1 %v2981_v20  ;;  %v2247_v60 = vmul.f32 0.7978846, %v2055_v51  ;;  %v2983_v12 = vmul.f32 %v2791_v44, %v9341_v9  ;;  %v1667_v49 = vmul.f32 %v1475_v33, %v7261_v37  ;;  %4842 = vtanh.f32 %v6941_v58  ;;  %v9342_v51 = vld [vmem:[#allocation27_spill] sm:$0xff]  ;;  %v7295_v58 = vpop.f32.mrf.mxu1  ;;  %v7297_v9 = vpop.f32.mrf.mxu0 }
 0x1d9   : > { %v7284_v4 = vpop.eup %4834  ;;  %v2790_v22 = vmul.f32 0.5, %v2598_v14  ;;  %3340 = vmatmul.mubr.f32.gmra.mxu1 %v2980_v57  ;;  %v2242_v10 = vmul.f32 0.7978846, %v2050_v25  ;;  %v2052_v16 = vadd.f32 %v1860_v3, %v7244_v35  ;;  %v1677_v27 = vmul.f32 %v1485_v54, %v7267_v52  ;;  %9344 = vst [vmem:[#allocation20_spill] sm:$0xff] %v7297_v9  ;;  %v9345_v57 = vld [vmem:[#allocation23_spill] sm:$0xff] }
 0x1da   : > { %v7288_v38 = vpop.eup %4836  ;;  %4844 = vtanh.f32 %v2247_v60  ;;  %v1859_v20 = vmul.f32 0.044715, %v1667_v49  ;;  %v7292_v44 = vadd.f32 %v9342_v51, %v5865_v28  ;;  %v2602_v33 = vadd.f32 1.0, %v7009_v46 }
 0x1db   : > { %v2982_v14 = vmul.f32 %v2790_v22, %v9345_v57  ;;  %v7300_v25 = vmul.f32 0.7978846, %v2048_v24  ;;  %4846 = vtanh.f32 %v2242_v10  ;;  %v1869_v3 = vmul.f32 0.044715, %v1677_v27  ;;  %v9347_v27 = vld [vmem:[#allocation26_spill] sm:$0xff]  ;;  %v7323_v57 = vpop.f32.mrf.mxu0 }
 0x1dc   : > { %9343 = vst [vmem:[#allocation19_spill] sm:$0xff] %v7292_v44  ;;  %v4839_v54 = vpop.eup %4838  ;;  %v2051_v60 = vadd.f32 %v1859_v20, %v7261_v37  ;;  %4848 = vtanh.f32 %v6943_v1  ;;  %v1477_v49 = vmul.f32 %v7292_v44, %v7292_v44  ;;  %v2794_v51 = vmul.f32 0.5, %v2602_v33  ;;  %v7321_v33 = vpop.f32.mrf.mxu1  ;;  %9349 = vst [vmem:[#allocation23_spill] sm:$0xff] %v7323_v57 }
 0x1dd   : > { %4593 = vmatprep.mubr.f32.mxu0 %v2982_v14  ;;  %v2600_v46 = vadd.f32 1.0, %v4839_v54  ;;  %v2061_v35 = vadd.f32 %v1869_v3, %v7267_v52  ;;  %v2607_v9 = vadd.f32 1.0, %v7014_v39  ;;  %v7310_v22 = vadd.f32 %v7119_v62, %v5889_v41 }
 0x1de   : > { %4594 = vmatmul.mubr.f32.gmra.mxu0 %v2985_v23  ;;  %v7312_v24 = vmul.f32 0.7978846, %v2052_v16  ;;  %v7314_v10 = vmul.f32 0.7978846, %v2051_v60  ;;  %v1669_v1 = vmul.f32 %v1477_v49, %v7292_v44  ;;  %v7319_v20 = vadd.f32 %v9347_v27, %v5867_v29 }
 0x1df   : > { %9346 = vst [vmem:[#allocation24_spill] sm:$0xff] %v7310_v22  ;;  %v2792_v39 = vmul.f32 0.5, %v2600_v46  ;;  %v2253_v14 = vmul.f32 0.7978846, %v2061_v35  ;;  %v7326_v62 = vmul.f32 %v2794_v51, %v6875_v53  ;;  %v1482_v23 = vmul.f32 %v7310_v22, %v7310_v22 }
 0x1e0   : > { %9348 = vst [vmem:[#allocation27_spill] sm:$0xff] %v7319_v20  ;;  %v1861_v16 = vmul.f32 0.044715, %v1669_v1  ;;  %v1478_v3 = vmul.f32 %v7319_v20, %v7319_v20  ;;  %v7334_v54 = vadd.f32 %v7155_v18, %v5889_v41  ;;  %4850 = vtanh.f32 %v7016_v5  ;;  %v9351_v18 = vld [vmem:[#allocation28_spill] sm:$0xff]  ;;  %v7349_v5 = vpop.f32.mrf.mxu1 }
 0x1e1   : > { %v2984_v60 = vmul.f32 %v2792_v39, %v6863_v40  ;;  %4852 = vtanh.f32 %v2253_v14  ;;  %v2799_v35 = vmul.f32 0.5, %v2607_v9  ;;  %v1674_v53 = vmul.f32 %v1482_v23, %v7310_v22  ;;  %v7351_v40 = vpop.f32.mrf.mxu0  ;;  %v9355_v23 = vld [vmem:[#allocation44_spill] sm:$0xff] }
 0x1e2   : > { %9350 = vst [vmem:[#allocation26_spill] sm:$0xff] %v7334_v54  ;;  %v7339_v49 = vpop.eup %4840  ;;  %v2053_v51 = vadd.f32 %v1861_v16, %v7292_v44  ;;  %v1670_v46 = vmul.f32 %v1478_v3, %v7319_v20  ;;  %v1491_v1 = vmul.f32 %v7334_v54, %v7334_v54  ;;  %v7347_v27 = vadd.f32 %v9351_v18, %v5865_v28 }
 0x1e3   : > { %9353 = vst [vmem:[#allocation48_spill] sm:$0xff] %v7351_v40  ;;  %3344 = vmatprep.mubr.f32.mxu1 %v2984_v60  ;;  %v1866_v9 = vmul.f32 0.044715, %v1674_v53  ;;  %v2605_v39 = vadd.f32 1.0, %v7071_v34  ;;  %v7356_v14 = vadd.f32 %v7177_v30, %v5889_v41  ;;  %v7360_v16 = vadd.f32 %v9355_v23, %v5867_v29 }
 0x1e4   : > { %9352 = vst [vmem:[#allocation28_spill] sm:$0xff] %v7347_v27  ;;  %3345 = vmatmul.mubr.f32.gmra.mxu1 %v2983_v12  ;;  %v2245_v3 = vmul.f32 0.7978846, %v2053_v51  ;;  %v1862_v18 = vmul.f32 0.044715, %v1670_v46  ;;  %v1683_v57 = vmul.f32 %v1491_v1, %v7334_v54  ;;  %v1480_v40 = vmul.f32 %v7347_v27, %v7347_v27  ;;  %v7371_v46 = vpop.f32.mrf.mxu1  ;;  %v7373_v1 = vpop.f32.mrf.mxu0 }
 0x1e5   : > { %9354 = vst [vmem:[#allocation49_spill] sm:$0xff] %v7356_v14  ;;  %9356 = vst [vmem:[#allocation44_spill] sm:$0xff] %v7360_v16  ;;  %v4843_v60 = vpop.eup %4842  ;;  %v2058_v53 = vadd.f32 %v1866_v9, %v7310_v22  ;;  %v2797_v34 = vmul.f32 0.5, %v2605_v39  ;;  %v1488_v30 = vmul.f32 %v7356_v14, %v7356_v14  ;;  %v1481_v44 = vmul.f32 %v7360_v16, %v7360_v16 }
 0x1e6   : > { %v2603_v23 = vadd.f32 1.0, %v4843_v60  ;;  %4854 = vtanh.f32 %v2245_v3  ;;  %v2991_v12 = vmul.f32 %v2799_v35, %v6880_v36  ;;  %v1875_v51 = vmul.f32 0.044715, %v1683_v57  ;;  %9357 = vst [vmem:[#allocation50_spill] sm:$0xff] %v7373_v1  ;;  %v9359_v57 = vld [vmem:[#allocation34_spill] sm:$0xff] }
 0x1e7   : > { %v7375_v37 = vpop.eup %4844  ;;  %v7377_v52 = vmul.f32 0.7978846, %v2058_v53  ;;  %v2054_v9 = vadd.f32 %v1862_v18, %v7319_v20  ;;  %v1672_v39 = vmul.f32 %v1480_v40, %v7347_v27  ;;  %v1680_v22 = vmul.f32 %v1488_v30, %v7356_v14  ;;  %v9361_v40 = vld [vmem:[#allocation33_spill] sm:$0xff] }
 0x1e8   : > { %v7382_v7 = vpop.eup %4846  ;;  %v2795_v3 = vmul.f32 0.5, %v2603_v23  ;;  %v2067_v36 = vadd.f32 %v1875_v51, %v7334_v54  ;;  %v7386_v35 = vmul.f32 %v2797_v34, %v9359_v57  ;;  %v1673_v60 = vmul.f32 %v1481_v44, %v7360_v16  ;;  %v7395_v51 = vpop.f32.mrf.mxu1 }
 0x1e9   : > { %9358 = vst [vmem:[#allocation51_spill] sm:$0xff] %v7377_v52  ;;  %v4849_v1 = vpop.eup %4848  ;;  %v1864_v45 = vmul.f32 0.044715, %v1672_v39  ;;  %v1872_v53 = vmul.f32 0.044715, %v1680_v22  ;;  %v7391_v18 = vadd.f32 %v7197_v8, %v5889_v41  ;;  %4856 = vtanh.f32 %v7031_v32  ;;  %v7397_v34 = vpop.f32.mrf.mxu0 }
 0x1ea   : > { %v2987_v30 = vmul.f32 %v2795_v3, %v9361_v40  ;;  %v2604_v20 = vadd.f32 1.0, %v4849_v1  ;;  %v2259_v23 = vmul.f32 0.7978846, %v2067_v36  ;;  %v1865_v52 = vmul.f32 0.044715, %v1673_v60  ;;  %9362 = vst [vmem:[#allocation33_spill] sm:$0xff] %v7397_v34 }
 0x1eb   : > { %9360 = vst [vmem:[#allocation34_spill] sm:$0xff] %v7391_v18  ;;  %v2056_v44 = vadd.f32 %v1864_v45, %v7347_v27  ;;  %v2064_v39 = vadd.f32 %v1872_v53, %v7356_v14  ;;  %v1497_v22 = vmul.f32 %v7391_v18, %v7391_v18  ;;  %4858 = vtanh.f32 %v7034_v42  ;;  %v9363_v3 = vld [vmem:[#allocation32_spill] sm:$0xff]  ;;  %v7423_v34 = vpop.f32.mrf.mxu0 }
 0x1ec   : > { %3349 = vmatprep.mubr.f32.mxu1 %v2987_v30  ;;  %v2796_v32 = vmul.f32 0.5, %v2604_v20  ;;  %v7404_v8 = vmul.f32 0.7978846, %v2054_v9  ;;  %v2057_v1 = vadd.f32 %v1865_v52, %v7360_v16  ;;  %v7409_v36 = vadd.f32 %v9363_v3, %v5865_v28  ;;  %v9365_v20 = vld [vmem:[#allocation30_spill] sm:$0xff]  ;;  %v7421_v3 = vpop.f32.mrf.mxu1 }
 0x1ed   : > { %v4851_v57 = vpop.eup %4850  ;;  %3350 = vmatmul.mubr.f32.gmra.mxu1 %v7326_v62  ;;  %4860 = vtanh.f32 %v2259_v23  ;;  %v2248_v45 = vmul.f32 0.7978846, %v2056_v44  ;;  %v1689_v60 = vmul.f32 %v1497_v22, %v7391_v18  ;;  %v2608_v53 = vadd.f32 1.0, %v7102_v61  ;;  %9366 = vst [vmem:[#allocation30_spill] sm:$0xff] %v7423_v34 }
 0x1ee   : > { %9364 = vst [vmem:[#allocation32_spill] sm:$0xff] %v7409_v36  ;;  %v7414_v42 = vpop.eup %4852  ;;  %v2988_v9 = vmul.f32 %v2796_v32, %v9365_v20  ;;  %v2606_v40 = vadd.f32 1.0, %v4851_v57  ;;  %v7417_v30 = vmul.f32 0.7978846, %v2064_v39  ;;  %v1483_v52 = vmul.f32 %v7409_v36, %v7409_v36  ;;  %v9368_v57 = vld [vmem:[#allocation39_spill] sm:$0xff] }
 0x1ef   : > { %v7425_v62 = vmul.f32 0.7978846, %v2057_v1  ;;  %v1881_v23 = vmul.f32 0.044715, %v1689_v60  ;;  %v2800_v44 = vmul.f32 0.5, %v2608_v53  ;;  %v2613_v61 = vadd.f32 1.0, %v7105_v26 }
 0x1f0   : > { %4596 = vmatprep.mubr.f32.mxu0 %v2988_v9  ;;  %v2798_v22 = vmul.f32 0.5, %v2606_v40  ;;  %v1675_v32 = vmul.f32 %v1483_v52, %v7409_v36  ;;  %v7431_v39 = vadd.f32 %v7223_v43, %v5889_v41  ;;  %v7435_v20 = vadd.f32 %v9368_v57, %v5867_v29  ;;  %v9370_v53 = vld [vmem:[#allocation45_spill] sm:$0xff] }
 0x1f1   : > { %4597 = vmatmul.mubr.f32.gmra.mxu0 %v2991_v12  ;;  %4862 = vtanh.f32 %v2248_v45  ;;  %v2073_v1 = vadd.f32 %v1881_v23, %v7391_v18  ;;  %v7439_v60 = vmul.f32 %v2800_v44, %v6956_v63  ;;  %v7443_v26 = vadd.f32 %v7249_v50, %v5889_v41  ;;  %v7450_v12 = vpop.f32.mrf.mxu1  ;;  %v7452_v45 = vpop.f32.mrf.mxu0 }
 0x1f2   : > { %9367 = vst [vmem:[#allocation52_spill] sm:$0xff] %v7431_v39  ;;  %9369 = vst [vmem:[#allocation39_spill] sm:$0xff] %v7435_v20  ;;  %v2990_v9 = vmul.f32 %v2798_v22, %v9370_v53  ;;  %v1867_v40 = vmul.f32 0.044715, %v1675_v32  ;;  %v1494_v43 = vmul.f32 %v7431_v39, %v7431_v39  ;;  %v1484_v52 = vmul.f32 %v7435_v20, %v7435_v20  ;;  %v9372_v53 = vld [vmem:[#allocation38_spill] sm:$0xff] }
 0x1f3   : > { %9371 = vst [vmem:[#allocation45_spill] sm:$0xff] %v7452_v45  ;;  %v7454_v23 = vpop.eup %4854  ;;  %v2265_v63 = vmul.f32 0.7978846, %v2073_v1  ;;  %v2805_v44 = vmul.f32 0.5, %v2613_v61  ;;  %v1503_v50 = vmul.f32 %v7443_v26, %v7443_v26  ;;  %4864 = vtanh.f32 %v7115_v13 }
 0x1f4   : > { %3354 = vmatprep.mubr.f32.mxu1 %v2990_v9  ;;  %v2059_v22 = vadd.f32 %v1867_v40, %v7409_v36  ;;  %v1686_v32 = vmul.f32 %v1494_v43, %v7431_v39  ;;  %v1676_v57 = vmul.f32 %v1484_v52, %v7435_v20  ;;  %v7464_v34 = vadd.f32 %v9372_v53, %v5865_v28  ;;  %v7475_v53 = vpop.f32.mrf.mxu1  ;;  %v7477_v36 = vpop.f32.mrf.mxu0 }
 0x1f5   : > { %3355 = vmatmul.mubr.f32.gmra.mxu1 %v7386_v35  ;;  %4866 = vtanh.f32 %v2265_v63  ;;  %v1695_v61 = vmul.f32 %v1503_v50, %v7443_v26  ;;  %v2611_v1 = vadd.f32 1.0, %v7162_v19  ;;  %v7471_v13 = vadd.f32 %v7274_v48, %v5889_v41  ;;  %9375 = vst [vmem:[#allocation54_spill] sm:$0xff] %v7477_v36  ;;  %v9376_v48 = vld [vmem:[#allocation37_spill] sm:$0xff] }
 0x1f6   : > { %9373 = vst [vmem:[#allocation38_spill] sm:$0xff] %v7464_v34  ;;  %v4857_v9 = vpop.eup %4856  ;;  %v2251_v40 = vmul.f32 0.7978846, %v2059_v22  ;;  %v1878_v43 = vmul.f32 0.044715, %v1686_v32  ;;  %v1486_v52 = vmul.f32 %v7464_v34, %v7464_v34  ;;  %v2997_v14 = vmul.f32 %v2805_v44, %v9376_v48 }
 0x1f7   : > { %9374 = vst [vmem:[#allocation53_spill] sm:$0xff] %v7471_v13  ;;  %v1868_v45 = vmul.f32 0.044715, %v1676_v57  ;;  %v2609_v35 = vadd.f32 1.0, %v4857_v9  ;;  %v1887_v63 = vmul.f32 0.044715, %v1695_v61  ;;  %v1500_v19 = vmul.f32 %v7471_v13, %v7471_v13 }
 0x1f8   : > { %v2803_v50 = vmul.f32 0.5, %v2611_v1  ;;  %v4859_v16 = vpop.eup %4858  ;;  %4868 = vtanh.f32 %v2251_v40  ;;  %v2070_v22 = vadd.f32 %v1878_v43, %v7431_v39  ;;  %v1678_v32 = vmul.f32 %v1486_v52, %v7464_v34  ;;  %v7494_v40 = vpop.f32.mrf.mxu1  ;;  %v9378_v52 = vld [vmem:[#allocation46_spill] sm:$0xff] }
 0x1f9   : > { %v2801_v57 = vmul.f32 0.5, %v2609_v35  ;;  %v2610_v18 = vadd.f32 1.0, %v4859_v16  ;;  %v2060_v27 = vadd.f32 %v1868_v45, %v7435_v20  ;;  %v2079_v36 = vadd.f32 %v1887_v63, %v7443_v26  ;;  %v7496_v43 = vpop.f32.mrf.mxu0  ;;  %v9379_v63 = vld [vmem:[#allocation47_spill] sm:$0xff] }
 0x1fa   : > { %v7486_v9 = vpop.eup %4860  ;;  %v7488_v61 = vmul.f32 0.7978846, %v2070_v22  ;;  %v1870_v1 = vmul.f32 0.044715, %v1678_v32  ;;  %v7491_v54 = vmul.f32 %v2803_v50, %v7000_v2  ;;  %v1692_v44 = vmul.f32 %v1500_v19, %v7471_v13  ;;  %9377 = vst [vmem:[#allocation37_spill] sm:$0xff] %v7496_v43  ;;  %v9382_v50 = vld [vmem:[#allocation41_spill] sm:$0xff] }
 0x1fb   : > { %v2993_v16 = vmul.f32 %v2801_v57, %v9378_v52  ;;  %v2802_v35 = vmul.f32 0.5, %v2610_v18  ;;  %v2271_v45 = vmul.f32 0.7978846, %v2079_v36  ;;  %v7501_v48 = vadd.f32 %v9379_v63, %v5867_v29  ;;  %v9383_v36 = vld [vmem:[#allocation40_spill] sm:$0xff] }
 0x1fc   : > { %v2062_v22 = vadd.f32 %v1870_v1, %v7464_v34  ;;  %v1884_v32 = vmul.f32 0.044715, %v1692_v44  ;;  %v7506_v2 = vadd.f32 %v7295_v58, %v5889_v41  ;;  %4870 = vtanh.f32 %v7117_v0  ;;  %v7523_v44 = vpop.f32.mrf.mxu1 }
 0x1fd   : > { %9380 = vst [vmem:[#allocation46_spill] sm:$0xff] %v7501_v48  ;;  %3359 = vmatprep.mubr.f32.mxu1 %v2993_v16  ;;  %v2994_v19 = vmul.f32 %v2802_v35, %v9382_v50  ;;  %4872 = vtanh.f32 %v2271_v45  ;;  %v1487_v18 = vmul.f32 %v7501_v48, %v7501_v48  ;;  %v7514_v57 = vadd.f32 %v9383_v36, %v5865_v28  ;;  %v7525_v16 = vpop.f32.mrf.mxu0 }
 0x1fe   : > { %9381 = vst [vmem:[#allocation47_spill] sm:$0xff] %v7506_v2  ;;  %v7516_v52 = vpop.eup %4862  ;;  %3360 = vmatmul.mubr.f32.gmra.mxu1 %v7439_v60  ;;  %v2254_v1 = vmul.f32 0.7978846, %v2062_v22  ;;  %v2076_v58 = vadd.f32 %v1884_v32, %v7471_v13  ;;  %v1509_v0 = vmul.f32 %v7506_v2, %v7506_v2  ;;  %4874 = vtanh.f32 %v7171_v15  ;;  %9385 = vst [vmem:[#allocation40_spill] sm:$0xff] %v7525_v16 }
 0x1ff   : > { %9384 = vst [vmem:[#allocation41_spill] sm:$0xff] %v7514_v57  ;;  %4599 = vmatprep.mubr.f32.mxu0 %v2994_v19  ;;  %v1679_v35 = vmul.f32 %v1487_v18, %v7501_v48  ;;  %v1489_v45 = vmul.f32 %v7514_v57, %v7514_v57  ;;  %v2614_v60 = vadd.f32 1.0, %v7193_v59  ;;  %v2619_v63 = vadd.f32 1.0, %v7201_v17 }
 0x200   : > { %v4865_v22 = vpop.eup %4864  ;;  %4600 = vmatmul.mubr.f32.gmra.mxu0 %v2997_v14  ;;  %v7532_v32 = vmul.f32 0.7978846, %v2060_v27  ;;  %4876 = vtanh.f32 %v2254_v1  ;;  %v1701_v15 = vmul.f32 %v1509_v0, %v7506_v2  ;;  %v7537_v50 = vadd.f32 %v7321_v33, %v5889_v41  ;;  %v9387_v14 = vld [vmem:[#allocation42_spill] sm:$0xff]  ;;  %v7548_v0 = vpop.f32.mrf.mxu1 }
 0x201   : > { %v2612_v19 = vadd.f32 1.0, %v4865_v22  ;;  %v1871_v18 = vmul.f32 0.044715, %v1679_v35  ;;  %v1681_v36 = vmul.f32 %v1489_v45, %v7514_v57  ;;  %v2806_v16 = vmul.f32 0.5, %v2614_v60  ;;  %v7550_v33 = vpop.f32.mrf.mxu0 }
 0x202   : > { %9386 = vst [vmem:[#allocation55_spill] sm:$0xff] %v7537_v50  ;;  %v7540_v43 = vpop.eup %4866  ;;  %v1893_v59 = vmul.f32 0.044715, %v1701_v15  ;;  %v2811_v17 = vmul.f32 0.5, %v2619_v63  ;;  %v1506_v27 = vmul.f32 %v7537_v50, %v7537_v50  ;;  %v7546_v1 = vadd.f32 %v9387_v14, %v5867_v29  ;;  %9389 = vst [vmem:[#allocation56_spill] sm:$0xff] %v7550_v33 }
 0x203   : > { %v2804_v22 = vmul.f32 0.5, %v2612_v19  ;;  %v7552_v35 = vmul.f32 0.7978846, %v2076_v58  ;;  %v2063_v45 = vadd.f32 %v1871_v18, %v7501_v48  ;;  %v1873_v60 = vmul.f32 0.044715, %v1681_v36  ;;  %v9390_v19 = vld [vmem:[#allocation43_spill] sm:$0xff] }
 0x204   : > { %9388 = vst [vmem:[#allocation42_spill] sm:$0xff] %v7546_v1  ;;  %v2085_v15 = vadd.f32 %v1893_v59, %v7506_v2  ;;  %v7557_v63 = vmul.f32 %v2806_v16, %v7044_v11  ;;  %v1698_v13 = vmul.f32 %v1506_v27, %v7537_v50  ;;  %v1490_v14 = vmul.f32 %v7546_v1, %v7546_v1  ;;  %v7575_v59 = vpop.f32.mrf.mxu1  ;;  %v7577_v27 = vpop.f32.mrf.mxu0 }
 0x205   : > { %v7562_v34 = vpop.eup %4868  ;;  %v2996_v33 = vmul.f32 %v2804_v22, %v7026_v6  ;;  %v2065_v58 = vadd.f32 %v1873_v60, %v7514_v57  ;;  %v7567_v20 = vmul.f32 %v2811_v17, %v9390_v19  ;;  %v7571_v18 = vadd.f32 %v7349_v5, %v5889_v41  ;;  %9392 = vst [vmem:[#allocation57_spill] sm:$0xff] %v7577_v27  ;;  %v9393_v22 = vld [vmem:[#allocation3_spill] sm:$0xff] }
 0x206   : > { %v2277_v11 = vmul.f32 0.7978846, %v2085_v15  ;;  %v1890_v16 = vmul.f32 0.044715, %v1698_v13  ;;  %v1682_v36 = vmul.f32 %v1490_v14, %v7546_v1  ;;  %4878 = vtanh.f32 %v7207_v31 }
 0x207   : > { %9391 = vst [vmem:[#allocation43_spill] sm:$0xff] %v7571_v18  ;;  %3364 = vmatprep.mubr.f32.mxu1 %v2996_v33  ;;  %v2257_v6 = vmul.f32 0.7978846, %v2065_v58  ;;  %v1515_v17 = vmul.f32 %v7571_v18, %v7571_v18  ;;  %v7583_v60 = vadd.f32 %v9393_v22, %v5865_v28  ;;  %v2617_v5 = vadd.f32 1.0, %v7257_v21 }
 0x208   : > { %3365 = vmatmul.mubr.f32.gmra.mxu1 %v7491_v54  ;;  %v7587_v13 = vmul.f32 0.7978846, %v2063_v45  ;;  %v2082_v31 = vadd.f32 %v1890_v16, %v7537_v50  ;;  %v1874_v15 = vmul.f32 0.044715, %v1682_v36  ;;  %v7592_v33 = vadd.f32 %v7371_v46, %v5889_v41  ;;  %v7603_v36 = vpop.f32.mrf.mxu1  ;;  %v7605_v46 = vpop.f32.mrf.mxu0 }
 0x209   : > { %9394 = vst [vmem:[#allocation3_spill] sm:$0xff] %v7583_v60  ;;  %v4871_v14 = vpop.eup %4870  ;;  %4880 = vtanh.f32 %v2277_v11  ;;  %v1707_v58 = vmul.f32 %v1515_v17, %v7571_v18  ;;  %v1492_v19 = vmul.f32 %v7583_v60, %v7583_v60  ;;  %v2809_v22 = vmul.f32 0.5, %v2617_v5  ;;  %9397 = vst [vmem:[#allocation60_spill] sm:$0xff] %v7605_v46  ;;  %v9398_v5 = vld [vmem:[#allocation6_spill] sm:$0xff] }
 0x20a   : > { %9395 = vst [vmem:[#allocation58_spill] sm:$0xff] %v7592_v33  ;;  %v7597_v21 = vpop.eup %4872  ;;  %v2615_v54 = vadd.f32 1.0, %v4871_v14  ;;  %4882 = vtanh.f32 %v2257_v6  ;;  %v7599_v45 = vmul.f32 0.7978846, %v2082_v31  ;;  %v1512_v16 = vmul.f32 %v7592_v33, %v7592_v33  ;;  %v9399_v14 = vld [vmem:[#allocation9_spill] sm:$0xff] }
 0x20b   : > { %v4875_v11 = vpop.eup %4874  ;;  %v2066_v17 = vadd.f32 %v1874_v15, %v7546_v1  ;;  %v1899_v27 = vmul.f32 0.044715, %v1707_v58  ;;  %v1684_v50 = vmul.f32 %v1492_v19, %v7583_v60  ;;  %v7611_v57 = vadd.f32 %v9398_v5, %v5867_v29  ;;  %v9401_v19 = vld [vmem:[#allocation5_spill] sm:$0xff] }
 0x20c   : > { %9396 = vst [vmem:[#allocation59_spill] sm:$0xff] %v7599_v45  ;;  %v2807_v6 = vmul.f32 0.5, %v2615_v54  ;;  %v2616_v31 = vadd.f32 1.0, %v4875_v11  ;;  %v7614_v48 = vmul.f32 %v2809_v22, %v9399_v14  ;;  %v1704_v2 = vmul.f32 %v1512_v16, %v7592_v33  ;;  %v7628_v22 = vpop.f32.mrf.mxu1  ;;  %v7630_v16 = vpop.f32.mrf.mxu0 }
 0x20d   : > { %v7617_v45 = vpop.eup %4876  ;;  %v2091_v46 = vadd.f32 %v1899_v27, %v7571_v18  ;;  %v1876_v39 = vmul.f32 0.044715, %v1684_v50  ;;  %v1493_v15 = vmul.f32 %v7611_v57, %v7611_v57  ;;  %v7624_v58 = vadd.f32 %v7395_v51, %v5889_v41  ;;  %9402 = vst [vmem:[#allocation9_spill] sm:$0xff] %v7630_v16  ;;  %v9403_v51 = vld [vmem:[#allocation4_spill] sm:$0xff]  ;;  %v9411_v16 = vld [vmem:[#allocation2_spill] sm:$0xff] }
 0x20e   : > { %v2999_v54 = vmul.f32 %v2807_v6, %v9401_v19  ;;  %v2808_v11 = vmul.f32 0.5, %v2616_v31  ;;  %v1896_v5 = vmul.f32 0.044715, %v1704_v2  ;;  %4884 = vtanh.f32 %v7211_v56  ;;  %v9404_v56 = vld [vmem:[#allocation7_spill] sm:$0xff] }
 0x20f   : > { %9400 = vst [vmem:[#allocation6_spill] sm:$0xff] %v7624_v58  ;;  %v2283_v14 = vmul.f32 0.7978846, %v2091_v46  ;;  %v2068_v50 = vadd.f32 %v1876_v39, %v7583_v60  ;;  %v1685_v27 = vmul.f32 %v1493_v15, %v7611_v57  ;;  %v1521_v1 = vmul.f32 %v7624_v58, %v7624_v58 }
 0x210   : > { %3369 = vmatprep.mubr.f32.mxu1 %v2999_v54  ;;  %v3000_v18 = vmul.f32 %v2808_v11, %v9403_v51  ;;  %v2088_v6 = vadd.f32 %v1896_v5, %v7592_v33  ;;  %4886 = vtanh.f32 %v7213_v55  ;;  %v7641_v2 = vadd.f32 %v9404_v56, %v5865_v28  ;;  %v7651_v11 = vpop.f32.mrf.mxu1  ;;  %v7653_v5 = vpop.f32.mrf.mxu0 }
 0x211   : > { %3370 = vmatmul.mubr.f32.gmra.mxu1 %v7557_v63  ;;  %v7644_v46 = vmul.f32 0.7978846, %v2066_v17  ;;  %v2260_v39 = vmul.f32 0.7978846, %v2068_v50  ;;  %v1877_v31 = vmul.f32 0.044715, %v1685_v27  ;;  %v1713_v15 = vmul.f32 %v1521_v1, %v7624_v58 }
 0x212   : > { %9405 = vst [vmem:[#allocation5_spill] sm:$0xff] %v7641_v2  ;;  %4602 = vmatprep.mubr.f32.mxu0 %v3000_v18  ;;  %4888 = vtanh.f32 %v2283_v14  ;;  %v1495_v19 = vmul.f32 %v7641_v2, %v7641_v2  ;;  %v2620_v54 = vadd.f32 1.0, %v7284_v4  ;;  %v2625_v55 = vadd.f32 1.0, %v7288_v38  ;;  %9406 = vst [vmem:[#allocation4_spill] sm:$0xff] %v7653_v5 }
 0x213   : > { %v4879_v63 = vpop.eup %4878  ;;  %4603 = vmatmul.mubr.f32.gmra.mxu0 %v7567_v20  ;;  %v7656_v17 = vmul.f32 0.7978846, %v2088_v6  ;;  %v2069_v1 = vadd.f32 %v1877_v31, %v7611_v57  ;;  %v1905_v18 = vmul.f32 0.044715, %v1713_v15  ;;  %v7661_v14 = vadd.f32 %v7421_v3, %v5889_v41  ;;  %v9408_v6 = vld [vmem:[#allocation12_spill] sm:$0xff] }
 0x214   : > { %v2618_v50 = vadd.f32 1.0, %v4879_v63  ;;  %4890 = vtanh.f32 %v2260_v39  ;;  %v1687_v4 = vmul.f32 %v1495_v19, %v7641_v2  ;;  %v2812_v38 = vmul.f32 0.5, %v2620_v54  ;;  %v7676_v19 = vpop.f32.mrf.mxu1  ;;  %v7678_v54 = vpop.f32.mrf.mxu0 }
 0x215   : > { %9407 = vst [vmem:[#allocation7_spill] sm:$0xff] %v7661_v14  ;;  %v2261_v27 = vmul.f32 0.7978846, %v2069_v1  ;;  %v2097_v51 = vadd.f32 %v1905_v18, %v7624_v58  ;;  %v1518_v20 = vmul.f32 %v7661_v14, %v7661_v14  ;;  %v7669_v56 = vadd.f32 %v9408_v6, %v5867_v29  ;;  %9410 = vst [vmem:[#allocation61_spill] sm:$0xff] %v7678_v54 }
 0x216   : > { %v7671_v31 = vpop.eup %4880  ;;  %v2810_v15 = vmul.f32 0.5, %v2618_v50  ;;  %v1879_v3 = vmul.f32 0.044715, %v1687_v4  ;;  %v7674_v63 = vmul.f32 %v2812_v38, %v7136_v47  ;;  %v2817_v39 = vmul.f32 0.5, %v2625_v55 }
 0x217   : > { %9409 = vst [vmem:[#allocation12_spill] sm:$0xff] %v7669_v56  ;;  %v7680_v1 = vpop.eup %4882  ;;  %4892 = vtanh.f32 %v2261_v27  ;;  %v2289_v18 = vmul.f32 0.7978846, %v2097_v51  ;;  %v1710_v5 = vmul.f32 %v1518_v20, %v7661_v14  ;;  %v1496_v6 = vmul.f32 %v7669_v56, %v7669_v56  ;;  %v9413_v27 = vld [vmem:[#allocation25_spill] sm:$0xff] }
 0x218   : > { %v3002_v50 = vmul.f32 %v2810_v15, %v9411_v16  ;;  %v2071_v4 = vadd.f32 %v1879_v3, %v7641_v2  ;;  %v7689_v47 = vadd.f32 %v7450_v12, %v5889_v41  ;;  %4894 = vtanh.f32 %v7300_v25  ;;  %v7704_v25 = vpop.f32.mrf.mxu1 }
 0x219   : > { %4896 = vtanh.f32 %v2289_v18  ;;  %v1902_v55 = vmul.f32 0.044715, %v1710_v5  ;;  %v1688_v38 = vmul.f32 %v1496_v6, %v7669_v56  ;;  %v7695_v51 = vadd.f32 %v9413_v27, %v5865_v28  ;;  %v7706_v5 = vpop.f32.mrf.mxu0 }
 0x21a   : > { %9412 = vst [vmem:[#allocation2_spill] sm:$0xff] %v7689_v47  ;;  %3374 = vmatprep.mubr.f32.mxu1 %v3002_v50  ;;  %v2263_v20 = vmul.f32 0.7978846, %v2071_v4  ;;  %v1527_v16 = vmul.f32 %v7689_v47, %v7689_v47  ;;  %v2623_v15 = vadd.f32 1.0, %v7339_v49  ;;  %v7702_v12 = vadd.f32 %v7475_v53, %v5889_v41  ;;  %9416 = vst [vmem:[#allocation63_spill] sm:$0xff] %v7706_v5  ;;  %v9417_v4 = vld [vmem:[#allocation14_spill] sm:$0xff] }
 0x21b   : > { %9414 = vst [vmem:[#allocation25_spill] sm:$0xff] %v7695_v51  ;;  %v4885_v3 = vpop.eup %4884  ;;  %3375 = vmatmul.mubr.f32.gmra.mxu1 %v7614_v48  ;;  %v2094_v18 = vadd.f32 %v1902_v55, %v7661_v14  ;;  %v1880_v6 = vmul.f32 0.044715, %v1688_v38  ;;  %v1498_v50 = vmul.f32 %v7695_v51, %v7695_v51  ;;  %v7714_v49 = vadd.f32 %v9417_v4, %v5867_v29  ;;  %v9419_v53 = vld [vmem:[#allocation8_spill] sm:$0xff] }
 0x21c   : > { %9415 = vst [vmem:[#allocation62_spill] sm:$0xff] %v7702_v12  ;;  %v2621_v27 = vadd.f32 1.0, %v4885_v3  ;;  %4898 = vtanh.f32 %v2263_v20  ;;  %v3009_v54 = vmul.f32 %v2817_v39, %v9419_v53  ;;  %v1719_v2 = vmul.f32 %v1527_v16, %v7689_v47  ;;  %v7724_v3 = vpop.f32.mrf.mxu1  ;;  %v7726_v20 = vpop.f32.mrf.mxu0 }
 0x21d   : > { %9418 = vst [vmem:[#allocation14_spill] sm:$0xff] %v7714_v49  ;;  %v4887_v5 = vpop.eup %4886  ;;  %v2072_v33 = vadd.f32 %v1880_v6, %v7669_v56  ;;  %v1690_v48 = vmul.f32 %v1498_v50, %v7695_v51  ;;  %v2815_v55 = vmul.f32 0.5, %v2623_v15  ;;  %v1524_v38 = vmul.f32 %v7702_v12, %v7702_v12  ;;  %9421 = vst [vmem:[#allocation64_spill] sm:$0xff] %v7726_v20  ;;  %v9422_v50 = vld [vmem:[#allocation13_spill] sm:$0xff] }
 0x21e   : > { %v2813_v14 = vmul.f32 0.5, %v2621_v27  ;;  %v2622_v58 = vadd.f32 1.0, %v4887_v5  ;;  %v7722_v60 = vmul.f32 0.7978846, %v2094_v18  ;;  %v1911_v4 = vmul.f32 0.044715, %v1719_v2 }
 0x21f   : > { %v7728_v39 = vpop.eup %4888  ;;  %v2264_v16 = vmul.f32 0.7978846, %v2072_v33  ;;  %v1882_v53 = vmul.f32 0.044715, %v1690_v48  ;;  %v1716_v6 = vmul.f32 %v1524_v38, %v7702_v12  ;;  %v1499_v15 = vmul.f32 %v7714_v49, %v7714_v49  ;;  %v9423_v48 = vld [vmem:[#allocation21_spill] sm:$0xff] }
 0x220   : > { %9420 = vst [vmem:[#allocation8_spill] sm:$0xff] %v7722_v60  ;;  %v3005_v56 = vmul.f32 %v2813_v14, %v9422_v50  ;;  %v2814_v27 = vmul.f32 0.5, %v2622_v58  ;;  %v2103_v5 = vadd.f32 %v1911_v4, %v7689_v47  ;;  %4900 = vtanh.f32 %v7312_v24  ;;  %v7746_v58 = vpop.f32.mrf.mxu1  ;;  %v7748_v24 = vpop.f32.mrf.mxu0 }
 0x221   : > { %v7736_v2 = vpop.eup %4890  ;;  %4902 = vtanh.f32 %v2264_v16  ;;  %v2074_v18 = vadd.f32 %v1882_v53, %v7695_v51  ;;  %v1908_v20 = vmul.f32 0.044715, %v1716_v6  ;;  %v1691_v33 = vmul.f32 %v1499_v15, %v7714_v49  ;;  %9425 = vst [vmem:[#allocation21_spill] sm:$0xff] %v7748_v24 }
 0x222   : > { %3379 = vmatprep.mubr.f32.mxu1 %v3005_v56  ;;  %v3006_v38 = vmul.f32 %v2814_v27, %v9423_v48  ;;  %v2295_v60 = vmul.f32 0.7978846, %v2103_v5  ;;  %v7743_v14 = vadd.f32 %v7494_v40, %v5889_v41  ;;  %4904 = vtanh.f32 %v7314_v10  ;;  %v9426_v10 = vld [vmem:[#allocation29_spill] sm:$0xff] }
 0x223   : > { %3380 = vmatmul.mubr.f32.gmra.mxu1 %v7674_v63  ;;  %v2266_v4 = vmul.f32 0.7978846, %v2074_v18  ;;  %v2100_v16 = vadd.f32 %v1908_v20, %v7702_v12  ;;  %v1883_v53 = vmul.f32 0.044715, %v1691_v33  ;;  %v2631_v56 = vadd.f32 1.0, %v7375_v37  ;;  %v9428_v20 = vld [vmem:[#allocation10_spill] sm:$0xff] }
 0x224   : > { %9424 = vst [vmem:[#allocation13_spill] sm:$0xff] %v7743_v14  ;;  %v7753_v6 = vpop.eup %4892  ;;  %4605 = vmatprep.mubr.f32.mxu0 %v3006_v38  ;;  %4906 = vtanh.f32 %v2295_v60  ;;  %v1533_v40 = vmul.f32 %v7743_v14, %v7743_v14  ;;  %v7759_v15 = vadd.f32 %v9426_v10, %v5865_v28  ;;  %v2626_v50 = vadd.f32 1.0, %v7382_v7  ;;  %v7771_v10 = vpop.f32.mrf.mxu1 }
 0x225   : > { %v4895_v63 = vpop.eup %4894  ;;  %4606 = vmatmul.mubr.f32.gmra.mxu0 %v3009_v54  ;;  %4908 = vtanh.f32 %v2266_v4  ;;  %v3007_v27 = vmul.f32 %v2815_v55, %v9428_v20  ;;  %v2075_v37 = vadd.f32 %v1883_v53, %v7714_v49  ;;  %v2823_v5 = vmul.f32 0.5, %v2631_v56  ;;  %v7773_v7 = vpop.f32.mrf.mxu0  ;;  %v9431_v53 = vld [vmem:[#allocation36_spill] sm:$0xff]  ;;  %v9443_v49 = vld [vmem:[#allocation17_spill] sm:$0xff] }
 0x226   : > { %9427 = vst [vmem:[#allocation29_spill] sm:$0xff] %v7759_v15  ;;  %v7764_v18 = vpop.eup %4896  ;;  %v2624_v60 = vadd.f32 1.0, %v4895_v63  ;;  %v7766_v33 = vmul.f32 0.7978846, %v2100_v16  ;;  %v1725_v48 = vmul.f32 %v1533_v40, %v7743_v14  ;;  %v1501_v38 = vmul.f32 %v7759_v15, %v7759_v15  ;;  %9429 = vst [vmem:[#allocation10_spill] sm:$0xff] %v7773_v7  ;;  %v9433_v40 = vld [vmem:[#allocation11_spill] sm:$0xff]  ;;  %v7787_v12 = vpop.f32.mrf.mxu1 }
 0x227   : > { %v2267_v54 = vmul.f32 0.7978846, %v2075_v37  ;;  %v2818_v4 = vmul.f32 0.5, %v2626_v50  ;;  %v7777_v55 = vadd.f32 %v7523_v44, %v5889_v41  ;;  %v7781_v56 = vadd.f32 %v9431_v53, %v5867_v29  ;;  %9434 = vst [vmem:[#allocation11_spill] sm:$0xff] %v7787_v12  ;;  %v9437_v53 = vld [vmem:[#allocation51_spill] sm:$0xff] }
 0x228   : > { %v2816_v16 = vmul.f32 0.5, %v2624_v60  ;;  %v1917_v63 = vmul.f32 0.044715, %v1725_v48  ;;  %v7784_v20 = vmul.f32 %v2823_v5, %v9433_v40  ;;  %v1693_v24 = vmul.f32 %v1501_v38, %v7759_v15  ;;  %v9436_v60 = vld [vmem:[#allocation35_spill] sm:$0xff]  ;;  %v7802_v40 = vpop.f32.mrf.mxu0 }
 0x229   : > { %9430 = vst [vmem:[#allocation65_spill] sm:$0xff] %v7777_v55  ;;  %9432 = vst [vmem:[#allocation36_spill] sm:$0xff] %v7781_v56  ;;  %v7789_v7 = vpop.eup %4898  ;;  %4910 = vtanh.f32 %v2267_v54  ;;  %v1530_v44 = vmul.f32 %v7777_v55, %v7777_v55  ;;  %v1502_v50 = vmul.f32 %v7781_v56, %v7781_v56  ;;  %v7797_v37 = vadd.f32 %v7548_v0, %v5889_v41  ;;  %v3223_v54 = vpop.f32.mrf.mxu1 }
 0x22a   : > { %v3008_v5 = vmul.f32 %v2816_v16, %v9436_v60  ;;  %v2109_v48 = vadd.f32 %v1917_v63, %v7743_v14  ;;  %v1885_v38 = vmul.f32 0.044715, %v1693_v24  ;;  %4912 = vtanh.f32 %v9437_v53  ;;  %9438 = vst [vmem:[#allocation35_spill] sm:$0xff] %v7802_v40  ;;  %v9439_v63 = vld [vmem:[#allocation15_spill] sm:$0xff]  ;;  %v7821_v14 = vpop.f32.mrf.mxu0 }
 0x22b   : > { %9435 = vst [vmem:[#allocation66_spill] sm:$0xff] %v7797_v37  ;;  %v1722_v12 = vmul.f32 %v1530_v44, %v7777_v55  ;;  %v1694_v51 = vmul.f32 %v1502_v50, %v7781_v56  ;;  %v1539_v47 = vmul.f32 %v7797_v37, %v7797_v37  ;;  %4914 = vtanh.f32 %v7404_v8  ;;  %v7815_v53 = vpop.f32.mrf.mxu1  ;;  %9442 = vst [vmem:[#allocation67_spill] sm:$0xff] %v7821_v14  ;;  %v9445_v14 = vld [vmem:[#allocation18_spill] sm:$0xff] }
 0x22c   : > { %3384 = vmatprep.mubr.f32.mxu1 %v3008_v5  ;;  %v2301_v0 = vmul.f32 0.7978846, %v2109_v48  ;;  %v2077_v16 = vadd.f32 %v1885_v38, %v7759_v15  ;;  %v2637_v24 = vadd.f32 1.0, %v7414_v42  ;;  %v7813_v60 = vadd.f32 %v9439_v63, %v5865_v28  ;;  %9441 = vst [vmem:[#allocation15_spill] sm:$0xff] %v7815_v53 }
 0x22d   : > { %v4901_v44 = vpop.eup %4900  ;;  %3385 = vmatmul.mubr.f32.gmra.mxu1 %v3007_v27  ;;  %v1914_v50 = vmul.f32 0.044715, %v1722_v12  ;;  %v1886_v54 = vmul.f32 0.044715, %v1694_v51  ;;  %v1731_v40 = vmul.f32 %v1539_v47, %v7797_v37  ;;  %v2629_v8 = vadd.f32 1.0, %v7454_v23  ;;  %v3228_v63 = vpop.f32.mrf.mxu1 }
 0x22e   : > { %9440 = vst [vmem:[#allocation51_spill] sm:$0xff] %v7813_v60  ;;  %v7819_v5 = vpop.eup %4902  ;;  %v2628_v48 = vadd.f32 1.0, %v4901_v44  ;;  %4916 = vtanh.f32 %v2301_v0  ;;  %v2269_v38 = vmul.f32 0.7978846, %v2077_v16  ;;  %v2829_v42 = vmul.f32 0.5, %v2637_v24 }
 0x22f   : > { %v4905_v15 = vpop.eup %4904  ;;  %v2106_v53 = vadd.f32 %v1914_v50, %v7777_v55  ;;  %v2078_v27 = vadd.f32 %v1886_v54, %v7781_v56  ;;  %v1923_v12 = vmul.f32 0.044715, %v1731_v40  ;;  %v1504_v47 = vmul.f32 %v7813_v60, %v7813_v60  ;;  %v7828_v0 = vpop.f32.mrf.mxu1  ;;  %v9446_v55 = vld [vmem:[#allocation31_spill] sm:$0xff]  ;;  %v9457_v56 = vld [vmem:[#allocation26_spill] sm:$0xff] }
 0x230   : > { %v2820_v51 = vmul.f32 0.5, %v2628_v48  ;;  %v2627_v23 = vadd.f32 1.0, %v4905_v15  ;;  %4918 = vtanh.f32 %v2269_v38  ;;  %v3010_v44 = vmul.f32 %v2818_v4, %v9443_v49  ;;  %9444 = vst [vmem:[#allocation17_spill] sm:$0xff] %v7828_v0  ;;  %v7844_v4 = vpop.f32.mrf.mxu0 }
 0x231   : > { %v7830_v16 = vpop.eup %4906  ;;  %v2270_v24 = vmul.f32 0.7978846, %v2078_v27  ;;  %v2115_v63 = vadd.f32 %v1923_v12, %v7797_v37  ;;  %v7834_v50 = vmul.f32 %v2829_v42, %v9445_v14  ;;  %v1696_v40 = vmul.f32 %v1504_v47, %v7813_v60  ;;  %9447 = vst [vmem:[#allocation18_spill] sm:$0xff] %v7844_v4  ;;  %v3233_v27 = vpop.f32.mrf.mxu1  ;;  %v9448_v42 = vld [vmem:[#allocation16_spill] sm:$0xff]  ;;  %v9449_v47 = vld [vmem:[#allocation22_spill] sm:$0xff] }
 0x232   : > { %v7837_v54 = vpop.eup %4908  ;;  %v3012_v48 = vmul.f32 %v2820_v51, %v9446_v55  ;;  %v2819_v15 = vmul.f32 0.5, %v2627_v23  ;;  %v2821_v38 = vmul.f32 0.5, %v2629_v8  ;;  %v7842_v49 = vadd.f32 %v7575_v59, %v5889_v41  ;;  %v9451_v23 = vld [vmem:[#allocation19_spill] sm:$0xff] }
 0x233   : > { %v7846_v0 = vmul.f32 0.7978846, %v2106_v53  ;;  %4920 = vtanh.f32 %v2270_v24  ;;  %v1888_v14 = vmul.f32 0.044715, %v1696_v40  ;;  %v7850_v12 = vadd.f32 %v9448_v42, %v5867_v29  ;;  %v7856_v59 = vpop.f32.mrf.mxu1 }
 0x234   : > { %4608 = vmatprep.mubr.f32.mxu0 %v3012_v48  ;;  %v3011_v55 = vmul.f32 %v2819_v15, %v9449_v47  ;;  %v2307_v51 = vmul.f32 0.7978846, %v2115_v63  ;;  %v1536_v8 = vmul.f32 %v7842_v49, %v7842_v49  ;;  %4922 = vtanh.f32 %v7417_v30  ;;  %9450 = vst [vmem:[#allocation31_spill] sm:$0xff] %v7856_v59  ;;  %v9452_v15 = vld [vmem:[#allocation20_spill] sm:$0xff] }
 0x235   : > { %4609 = vmatmul.mubr.f32.gmra.mxu0 %v7784_v20  ;;  %v2080_v53 = vadd.f32 %v1888_v14, %v7813_v60  ;;  %v3013_v24 = vmul.f32 %v2821_v38, %v9451_v23  ;;  %v1505_v40 = vmul.f32 %v7850_v12, %v7850_v12  ;;  %v7865_v48 = vadd.f32 %v7603_v36, %v5889_v41  ;;  %v7876_v38 = vpop.f32.mrf.mxu0  ;;  %v3238_v14 = vpop.f32.mrf.mxu1 }
 0x236   : > { %v7867_v63 = vpop.eup %4910  ;;  %3389 = vmatprep.mubr.f32.mxu1 %v3011_v55  ;;  %v1728_v30 = vmul.f32 %v1536_v8, %v7842_v49  ;;  %4924 = vtanh.f32 %v7425_v62  ;;  %v2643_v20 = vadd.f32 1.0, %v7486_v9  ;;  %v7874_v27 = vadd.f32 %v9452_v15, %v5865_v28  ;;  %9453 = vst [vmem:[#allocation16_spill] sm:$0xff] %v7876_v38 }
 0x237   : > { %v4913_v42 = vpop.eup %4912  ;;  %3390 = vmatmul.mubr.f32.gmra.mxu1 %v3010_v44  ;;  %v2272_v36 = vmul.f32 0.7978846, %v2080_v53  ;;  %v1697_v47 = vmul.f32 %v1505_v40, %v7850_v12  ;;  %v1545_v55 = vmul.f32 %v7865_v48, %v7865_v48  ;;  %v2632_v8 = vadd.f32 1.0, %v7516_v52  ;;  %v7884_v4 = vpop.f32.mrf.mxu1 }
 0x238   : > { %v4915_v62 = vpop.eup %4914  ;;  %v2634_v23 = vadd.f32 1.0, %v4913_v42  ;;  %v1920_v9 = vmul.f32 0.044715, %v1728_v30  ;;  %v2835_v59 = vmul.f32 0.5, %v2643_v20  ;;  %v1507_v15 = vmul.f32 %v7874_v27, %v7874_v27  ;;  %9454 = vst [vmem:[#allocation22_spill] sm:$0xff] %v7884_v4  ;;  %v7889_v37 = vpop.f32.mrf.mxu0 }
 0x239   : > { %4926 = vtanh.f32 %v2307_v51  ;;  %v2630_v14 = vadd.f32 1.0, %v4915_v62  ;;  %v1889_v44 = vmul.f32 0.044715, %v1697_v47  ;;  %v1737_v53 = vmul.f32 %v1545_v55, %v7865_v48  ;;  %9455 = vst [vmem:[#allocation19_spill] sm:$0xff] %v7889_v37  ;;  %v3243_v30 = vpop.f32.mrf.mxu1  ;;  %v9456_v62 = vld [vmem:[#allocation24_spill] sm:$0xff] }
 0x23a   : > { %v2826_v40 = vmul.f32 0.5, %v2634_v23  ;;  %4928 = vtanh.f32 %v2272_v36  ;;  %v2112_v38 = vadd.f32 %v1920_v9, %v7842_v49  ;;  %v1699_v52 = vmul.f32 %v1507_v15, %v7874_v27  ;;  %v9460_v30 = vld [vmem:[#allocation27_spill] sm:$0xff] }
 0x23b   : > { %v7891_v20 = vpop.eup %4916  ;;  %v2822_v42 = vmul.f32 0.5, %v2630_v14  ;;  %v2081_v60 = vadd.f32 %v1889_v44, %v7850_v12  ;;  %v1929_v4 = vmul.f32 0.044715, %v1737_v53  ;;  %v2824_v51 = vmul.f32 0.5, %v2632_v8  ;;  %v7902_v9 = vpop.f32.mrf.mxu1 }
 0x23c   : > { %v3018_v47 = vmul.f32 %v2826_v40, %v9456_v62  ;;  %v7896_v55 = vmul.f32 %v2835_v59, %v9457_v56  ;;  %v1891_v36 = vmul.f32 0.044715, %v1699_v52  ;;  %v7900_v23 = vadd.f32 %v7628_v22, %v5889_v41  ;;  %9459 = vst [vmem:[#allocation24_spill] sm:$0xff] %v7902_v9  ;;  %v9461_v22 = vld [vmem:[#allocation23_spill] sm:$0xff]  ;;  %v7918_v40 = vpop.f32.mrf.mxu0 }
 0x23d   : > { %v7904_v15 = vpop.eup %4918  ;;  %v3014_v14 = vmul.f32 %v2822_v42, %v9460_v30  ;;  %v7907_v37 = vmul.f32 0.7978846, %v2112_v38  ;;  %v2273_v44 = vmul.f32 0.7978846, %v2081_v60  ;;  %v2121_v8 = vadd.f32 %v1929_v4, %v7865_v48  ;;  %9462 = vst [vmem:[#allocation26_spill] sm:$0xff] %v7918_v40  ;;  %v3248_v52 = vpop.f32.mrf.mxu1  ;;  %v9463_v4 = vld [vmem:[#allocation28_spill] sm:$0xff] }
 0x23e   : > { %9458 = vst [vmem:[#allocation20_spill] sm:$0xff] %v7900_v23  ;;  %4611 = vmatprep.mubr.f32.mxu0 %v3018_v47  ;;  %v2083_v56 = vadd.f32 %v1891_v36, %v7874_v27  ;;  %v1542_v59 = vmul.f32 %v7900_v23, %v7900_v23  ;;  %v7915_v53 = vadd.f32 %v9461_v22, %v5867_v29  ;;  %4930 = vtanh.f32 %v7488_v61  ;;  %v7944_v22 = vpop.f32.mrf.mxu0  ;;  %v9470_v40 = vld [vmem:[#allocation49_spill] sm:$0xff] }
 0x23f   : > { %3394 = vmatprep.mubr.f32.mxu1 %v3014_v14  ;;  %4612 = vmatmul.mubr.f32.gmra.mxu0 %v7834_v50  ;;  %v2313_v60 = vmul.f32 0.7978846, %v2121_v8  ;;  %v7922_v38 = vmul.f32 %v2824_v51, %v9463_v4  ;;  %v7926_v42 = vadd.f32 %v7651_v11, %v5889_v41  ;;  %v2649_v62 = vadd.f32 1.0, %v7540_v43  ;;  %v9465_v14 = vld [vmem:[#allocation48_spill] sm:$0xff]  ;;  %v7941_v8 = vpop.f32.mrf.mxu1  ;;  %9467 = vst [vmem:[#allocation28_spill] sm:$0xff] %v7944_v22 }
 0x240   : > { %v7929_v47 = vpop.eup %4920  ;;  %3395 = vmatmul.mubr.f32.gmra.mxu1 %v3013_v24  ;;  %v2275_v61 = vmul.f32 0.7978846, %v2083_v56  ;;  %v1734_v36 = vmul.f32 %v1542_v59, %v7900_v23  ;;  %v1508_v30 = vmul.f32 %v7915_v53, %v7915_v53  ;;  %4932 = vtanh.f32 %v7532_v32  ;;  %9466 = vst [vmem:[#allocation23_spill] sm:$0xff] %v7941_v8  ;;  %v9468_v8 = vld [vmem:[#allocation34_spill] sm:$0xff] }
 0x241   : > { %9464 = vst [vmem:[#allocation27_spill] sm:$0xff] %v7926_v42  ;;  %v4923_v50 = vpop.eup %4922  ;;  %4934 = vtanh.f32 %v2273_v44  ;;  %v1551_v51 = vmul.f32 %v7926_v42, %v7926_v42  ;;  %v2841_v11 = vmul.f32 0.5, %v2649_v62  ;;  %v7939_v43 = vadd.f32 %v9465_v14, %v5865_v28  ;;  %v3253_v62 = vpop.f32.mrf.mxu1 }
 0x242   : > { %v2640_v24 = vadd.f32 1.0, %v4923_v50  ;;  %4936 = vtanh.f32 %v2313_v60  ;;  %v1926_v56 = vmul.f32 0.044715, %v1734_v36  ;;  %v1700_v59 = vmul.f32 %v1508_v30, %v7915_v53 }
 0x243   : > { %v4925_v32 = vpop.eup %4924  ;;  %4938 = vtanh.f32 %v2275_v61  ;;  %v1743_v44 = vmul.f32 %v1551_v51, %v7926_v42  ;;  %v1510_v52 = vmul.f32 %v7939_v43, %v7939_v43  ;;  %v2635_v4 = vadd.f32 1.0, %v7562_v34 }
 0x244   : > { %v2832_v14 = vmul.f32 0.5, %v2640_v24  ;;  %v2633_v9 = vadd.f32 1.0, %v4925_v32  ;;  %v2118_v50 = vadd.f32 %v1926_v56, %v7900_v23  ;;  %v1892_v60 = vmul.f32 0.044715, %v1700_v59  ;;  %v7963_v56 = vpop.f32.mrf.mxu0  ;;  %v7965_v59 = vpop.f32.mrf.mxu1 }
 0x245   : > { %v1935_v36 = vmul.f32 0.044715, %v1743_v44  ;;  %v7952_v30 = vmul.f32 %v2841_v11, %v9468_v8  ;;  %v1702_v22 = vmul.f32 %v1510_v52, %v7939_v43  ;;  %v7957_v61 = vadd.f32 %v7676_v19, %v5889_v41  ;;  %9471 = vst [vmem:[#allocation34_spill] sm:$0xff] %v7963_v56  ;;  %9472 = vst [vmem:[#allocation49_spill] sm:$0xff] %v7965_v59 }
 0x246   : > { %v7959_v51 = vpop.eup %4926  ;;  %v3024_v34 = vmul.f32 %v2832_v14, %v9470_v40  ;;  %v2825_v62 = vmul.f32 0.5, %v2633_v9  ;;  %v2084_v24 = vadd.f32 %v1892_v60, %v7915_v53  ;;  %v2827_v32 = vmul.f32 0.5, %v2635_v4  ;;  %v9473_v40 = vld [vmem:[#allocation44_spill] sm:$0xff]  ;;  %v9474_v4 = vld [vmem:[#allocation50_spill] sm:$0xff]  ;;  %v3258_v59 = vpop.f32.mrf.mxu1 }
 0x247   : > { %9469 = vst [vmem:[#allocation48_spill] sm:$0xff] %v7957_v61  ;;  %v7967_v11 = vpop.eup %4928  ;;  %v7969_v8 = vmul.f32 0.7978846, %v2118_v50  ;;  %v2127_v44 = vadd.f32 %v1935_v36, %v7926_v42  ;;  %v1894_v19 = vmul.f32 0.044715, %v1702_v22  ;;  %v1548_v52 = vmul.f32 %v7957_v61, %v7957_v61 }
 0x248   : > { %4614 = vmatprep.mubr.f32.mxu0 %v3024_v34  ;;  %v3017_v9 = vmul.f32 %v2825_v62, %v9473_v40  ;;  %v2276_v14 = vmul.f32 0.7978846, %v2084_v24  ;;  %v7977_v60 = vadd.f32 %v9474_v4, %v5867_v29  ;;  %4940 = vtanh.f32 %v7552_v35  ;;  %v9475_v35 = vld [vmem:[#allocation33_spill] sm:$0xff] }
 0x249   : > { %4615 = vmatmul.mubr.f32.gmra.mxu0 %v7896_v55  ;;  %v2319_v50 = vmul.f32 0.7978846, %v2127_v44  ;;  %v2086_v36 = vadd.f32 %v1894_v19, %v7939_v43  ;;  %v1740_v22 = vmul.f32 %v1548_v52, %v7957_v61  ;;  %v7985_v34 = vadd.f32 %v7704_v25, %v5889_v41  ;;  %v7994_v55 = vpop.f32.mrf.mxu0  ;;  %v7996_v44 = vpop.f32.mrf.mxu1 }
 0x24a   : > { %3399 = vmatprep.mubr.f32.mxu1 %v3017_v9  ;;  %4942 = vtanh.f32 %v2276_v14  ;;  %v1511_v62 = vmul.f32 %v7977_v60, %v7977_v60  ;;  %v2655_v24 = vadd.f32 1.0, %v7597_v21  ;;  %v7992_v59 = vadd.f32 %v9475_v35, %v5865_v28  ;;  %9477 = vst [vmem:[#allocation50_spill] sm:$0xff] %v7994_v55  ;;  %9478 = vst [vmem:[#allocation33_spill] sm:$0xff] %v7996_v44  ;;  %v9479_v55 = vld [vmem:[#allocation32_spill] sm:$0xff] }
 0x24b   : > { %v4931_v19 = vpop.eup %4930  ;;  %3400 = vmatmul.mubr.f32.gmra.mxu1 %v7922_v38  ;;  %4944 = vtanh.f32 %v2319_v50  ;;  %v2278_v25 = vmul.f32 0.7978846, %v2086_v36  ;;  %v1932_v52 = vmul.f32 0.044715, %v1740_v22  ;;  %v1557_v40 = vmul.f32 %v7985_v34, %v7985_v34  ;;  %v3263_v4 = vpop.f32.mrf.mxu1 }
 0x24c   : > { %9476 = vst [vmem:[#allocation44_spill] sm:$0xff] %v7992_v59  ;;  %v2646_v9 = vadd.f32 1.0, %v4931_v19  ;;  %v1703_v21 = vmul.f32 %v1511_v62, %v7977_v60  ;;  %4946 = vtanh.f32 %v7587_v13  ;;  %v2847_v14 = vmul.f32 0.5, %v2655_v24  ;;  %v8010_v23 = vpop.f32.mrf.mxu0 }
 0x24d   : > { %v4933_v35 = vpop.eup %4932  ;;  %4948 = vtanh.f32 %v2278_v25  ;;  %v3019_v44 = vmul.f32 %v2827_v32, %v9479_v55  ;;  %v1749_v56 = vmul.f32 %v1557_v40, %v7985_v34  ;;  %v1513_v38 = vmul.f32 %v7992_v59, %v7992_v59  ;;  %9480 = vst [vmem:[#allocation32_spill] sm:$0xff] %v8010_v23  ;;  %v8012_v13 = vpop.f32.mrf.mxu1 }
 0x24e   : > { %v8007_v50 = vpop.eup %4934  ;;  %v2838_v36 = vmul.f32 0.5, %v2646_v9  ;;  %v2636_v22 = vadd.f32 1.0, %v4933_v35  ;;  %v2124_v19 = vadd.f32 %v1932_v52, %v7957_v61  ;;  %v1895_v62 = vmul.f32 0.044715, %v1703_v21  ;;  %9481 = vst [vmem:[#allocation68_spill] sm:$0xff] %v8012_v13  ;;  %v9482_v9 = vld [vmem:[#allocation52_spill] sm:$0xff] }
 0x24f   : > { %v8014_v24 = vpop.eup %4936  ;;  %v1941_v25 = vmul.f32 0.044715, %v1749_v56  ;;  %v8017_v32 = vmul.f32 %v2847_v14, %v7443_v26  ;;  %v1705_v55 = vmul.f32 %v1513_v38, %v7992_v59  ;;  %v2638_v40 = vadd.f32 1.0, %v7617_v45  ;;  %v3268_v23 = vpop.f32.mrf.mxu1  ;;  %v9484_v38 = vld [vmem:[#allocation30_spill] sm:$0xff]  ;;  %v9485_v45 = vld [vmem:[#allocation39_spill] sm:$0xff] }
 0x250   : > { %v8021_v4 = vpop.eup %4938  ;;  %v3030_v35 = vmul.f32 %v2838_v36, %v9482_v9  ;;  %v2828_v52 = vmul.f32 0.5, %v2636_v22  ;;  %v2087_v21 = vadd.f32 %v1895_v62, %v7977_v60  ;;  %v8027_v13 = vadd.f32 %v7724_v3, %v5889_v41  ;;  %v9486_v62 = vld [vmem:[#allocation59_spill] sm:$0xff]  ;;  %v8038_v3 = vpop.f32.mrf.mxu0 }
 0x251   : > { %v2133_v56 = vadd.f32 %v1941_v25, %v7985_v34  ;;  %v1897_v26 = vmul.f32 0.044715, %v1705_v55  ;;  %v2830_v14 = vmul.f32 0.5, %v2638_v40  ;;  %v8032_v61 = vadd.f32 %v9484_v38, %v5867_v29  ;;  %9487 = vst [vmem:[#allocation30_spill] sm:$0xff] %v8038_v3  ;;  %v8040_v23 = vpop.f32.mrf.mxu1 }
 0x252   : > { %9483 = vst [vmem:[#allocation52_spill] sm:$0xff] %v8027_v13  ;;  %4617 = vmatprep.mubr.f32.mxu0 %v3030_v35  ;;  %v3020_v42 = vmul.f32 %v2828_v52, %v9485_v45  ;;  %v2279_v36 = vmul.f32 0.7978846, %v2087_v21  ;;  %v1554_v22 = vmul.f32 %v8027_v13, %v8027_v13  ;;  %4950 = vtanh.f32 %v9486_v62  ;;  %9488 = vst [vmem:[#allocation39_spill] sm:$0xff] %v8040_v23  ;;  %v9489_v35 = vld [vmem:[#allocation38_spill] sm:$0xff] }
 0x253   : > { %4618 = vmatmul.mubr.f32.gmra.mxu0 %v7952_v30  ;;  %v8043_v25 = vmul.f32 0.7978846, %v2124_v19  ;;  %v2325_v55 = vmul.f32 0.7978846, %v2133_v56  ;;  %v2089_v40 = vadd.f32 %v1897_v26, %v7992_v59  ;;  %v1514_v9 = vmul.f32 %v8032_v61, %v8032_v61  ;;  %v3273_v19 = vpop.f32.mrf.mxu1 }
 0x254   : > { %3404 = vmatprep.mubr.f32.mxu1 %v3020_v42  ;;  %v8049_v52 = vmul.f32 %v2830_v14, %v9489_v35  ;;  %v1746_v21 = vmul.f32 %v1554_v22, %v8027_v13  ;;  %v8054_v38 = vadd.f32 %v7746_v58, %v5889_v41  ;;  %v2661_v30 = vadd.f32 1.0, %v7671_v31  ;;  %v9491_v42 = vld [vmem:[#allocation45_spill] sm:$0xff]  ;;  %v8065_v58 = vpop.f32.mrf.mxu0 }
 0x255   : > { %v4941_v45 = vpop.eup %4940  ;;  %3405 = vmatmul.mubr.f32.gmra.mxu1 %v3019_v44  ;;  %4952 = vtanh.f32 %v2279_v36  ;;  %v2281_v56 = vmul.f32 0.7978846, %v2089_v40  ;;  %v1706_v26 = vmul.f32 %v1514_v9, %v8032_v61  ;;  %v8060_v62 = vadd.f32 %v9491_v42, %v5865_v28  ;;  %9493 = vst [vmem:[#allocation45_spill] sm:$0xff] %v8065_v58  ;;  %v8067_v31 = vpop.f32.mrf.mxu1 }
 0x256   : > { %9490 = vst [vmem:[#allocation59_spill] sm:$0xff] %v8054_v38  ;;  %v2652_v14 = vadd.f32 1.0, %v4941_v45  ;;  %v1938_v35 = vmul.f32 0.044715, %v1746_v21  ;;  %v1563_v22 = vmul.f32 %v8054_v38, %v8054_v38  ;;  %4954 = vtanh.f32 %v7644_v46  ;;  %9494 = vst [vmem:[#allocation69_spill] sm:$0xff] %v8067_v31 }
 0x257   : > { %9492 = vst [vmem:[#allocation38_spill] sm:$0xff] %v8060_v62  ;;  %v8069_v44 = vpop.eup %4942  ;;  %4956 = vtanh.f32 %v2325_v55  ;;  %v1898_v36 = vmul.f32 0.044715, %v1706_v26  ;;  %v2853_v40 = vmul.f32 0.5, %v2661_v30  ;;  %v1516_v9 = vmul.f32 %v8060_v62, %v8060_v62  ;;  %v3278_v42 = vpop.f32.mrf.mxu1 }
 0x258   : > { %v8073_v19 = vpop.eup %4944  ;;  %v2844_v21 = vmul.f32 0.5, %v2652_v14  ;;  %4958 = vtanh.f32 %v2281_v56  ;;  %v2130_v45 = vadd.f32 %v1938_v35, %v8027_v13  ;;  %v1755_v46 = vmul.f32 %v1563_v22, %v8054_v38  ;;  %v9496_v14 = vld [vmem:[#allocation53_spill] sm:$0xff]  ;;  %v9497_v13 = vld [vmem:[#allocation47_spill] sm:$0xff]  ;;  %v8090_v42 = vpop.f32.mrf.mxu0 }
 0x259   : > { %v4947_v23 = vpop.eup %4946  ;;  %v2090_v31 = vadd.f32 %v1898_v36, %v8032_v61  ;;  %v1708_v58 = vmul.f32 %v1516_v9, %v8060_v62  ;;  %v2641_v55 = vadd.f32 1.0, %v7680_v1  ;;  %v8082_v30 = vadd.f32 %v7771_v10, %v5889_v41  ;;  %9498 = vst [vmem:[#allocation53_spill] sm:$0xff] %v8090_v42  ;;  %v8092_v36 = vpop.f32.mrf.mxu1 }
 0x25a   : > { %v8084_v26 = vpop.eup %4948  ;;  %v3036_v56 = vmul.f32 %v2844_v21, %v9496_v14  ;;  %v2639_v3 = vadd.f32 1.0, %v4947_v23  ;;  %v1947_v35 = vmul.f32 0.044715, %v1755_v46  ;;  %v8088_v22 = vmul.f32 %v2853_v40, %v9497_v13  ;;  %9499 = vst [vmem:[#allocation47_spill] sm:$0xff] %v8092_v36  ;;  %v9500_v23 = vld [vmem:[#allocation54_spill] sm:$0xff] }
 0x25b   : > { %9495 = vst [vmem:[#allocation70_spill] sm:$0xff] %v8082_v30  ;;  %v8094_v9 = vmul.f32 0.7978846, %v2130_v45  ;;  %v2282_v1 = vmul.f32 0.7978846, %v2090_v31  ;;  %v1560_v41 = vmul.f32 %v8082_v30, %v8082_v30  ;;  %v8101_v46 = vadd.f32 %v9500_v23, %v5867_v29  ;;  %v3283_v13 = vpop.f32.mrf.mxu1  ;;  %v9501_v45 = vld [vmem:[#allocation46_spill] sm:$0xff]  ;;  %v8111_v23 = vpop.f32.mrf.mxu0 }
 0x25c   : > { %v1900_v59 = vmul.f32 0.044715, %v1708_v58  ;;  %4620 = vmatprep.mubr.f32.mxu0 %v3036_v56  ;;  %v2831_v10 = vmul.f32 0.5, %v2639_v3  ;;  %v2139_v21 = vadd.f32 %v1947_v35, %v8054_v38  ;;  %4960 = vtanh.f32 %v7656_v17  ;;  %9502 = vst [vmem:[#allocation54_spill] sm:$0xff] %v8111_v23 }
 0x25d   : > { %4621 = vmatmul.mubr.f32.gmra.mxu0 %v8017_v32  ;;  %4962 = vtanh.f32 %v2282_v1  ;;  %v2833_v58 = vmul.f32 0.5, %v2641_v55  ;;  %v1752_v40 = vmul.f32 %v1560_v41, %v8082_v30  ;;  %v1517_v56 = vmul.f32 %v8101_v46, %v8101_v46  ;;  %v8113_v17 = vpop.f32.mrf.mxu1  ;;  %v9504_v55 = vld [vmem:[#allocation37_spill] sm:$0xff] }
 0x25e   : > { %v2092_v31 = vadd.f32 %v1900_v59, %v8060_v62  ;;  %v3023_v14 = vmul.f32 %v2831_v10, %v9501_v45  ;;  %v2331_v3 = vmul.f32 0.7978846, %v2139_v21  ;;  %v2645_v35 = vadd.f32 1.0, %v7753_v6  ;;  %9503 = vst [vmem:[#allocation46_spill] sm:$0xff] %v8113_v17  ;;  %v9506_v17 = vld [vmem:[#allocation41_spill] sm:$0xff]  ;;  %v9512_v62 = vld [vmem:[#allocation43_spill] sm:$0xff] }
 0x25f   : > { %v4951_v13 = vpop.eup %4950  ;;  %v1944_v1 = vmul.f32 0.044715, %v1752_v40  ;;  %v2667_v59 = vadd.f32 1.0, %v7728_v39  ;;  %v8118_v41 = vadd.f32 %v9504_v55, %v5865_v28  ;;  %v1709_v21 = vmul.f32 %v1517_v56, %v8101_v46  ;;  %v3288_v6 = vpop.f32.mrf.mxu1 }
 0x260   : > { %v2284_v32 = vmul.f32 0.7978846, %v2092_v31  ;;  %3409 = vmatprep.mubr.f32.mxu1 %v3023_v14  ;;  %v2658_v10 = vadd.f32 1.0, %v4951_v13  ;;  %4964 = vtanh.f32 %v2331_v3  ;;  %v2837_v45 = vmul.f32 0.5, %v2645_v35  ;;  %v8129_v56 = vpop.f32.mrf.mxu0 }
 0x261   : > { %9505 = vst [vmem:[#allocation37_spill] sm:$0xff] %v8118_v41  ;;  %3410 = vmatmul.mubr.f32.gmra.mxu1 %v8049_v52  ;;  %v3025_v36 = vmul.f32 %v2833_v58, %v9506_v17  ;;  %v2136_v31 = vadd.f32 %v1944_v1, %v8082_v30  ;;  %v1519_v39 = vmul.f32 %v8118_v41, %v8118_v41  ;;  %v1901_v14 = vmul.f32 0.044715, %v1709_v21  ;;  %v8131_v35 = vpop.f32.mrf.mxu1  ;;  %v9509_v1 = vld [vmem:[#allocation40_spill] sm:$0xff] }
 0x262   : > { %4966 = vtanh.f32 %v2284_v32  ;;  %v8126_v40 = vpop.eup %4952  ;;  %v2850_v55 = vmul.f32 0.5, %v2658_v10  ;;  %v2859_v13 = vmul.f32 0.5, %v2667_v59  ;;  %v2644_v3 = vadd.f32 1.0, %v7736_v2  ;;  %9507 = vst [vmem:[#allocation41_spill] sm:$0xff] %v8129_v56  ;;  %9508 = vst [vmem:[#allocation71_spill] sm:$0xff] %v8131_v35  ;;  %v9510_v59 = vld [vmem:[#allocation55_spill] sm:$0xff] }
 0x263   : > { %v4955_v52 = vpop.eup %4954  ;;  %v8133_v32 = vmul.f32 0.7978846, %v2136_v31  ;;  %v3029_v58 = vmul.f32 %v2837_v45, %v7611_v57  ;;  %v1711_v17 = vmul.f32 %v1519_v39, %v8118_v41  ;;  %v8139_v6 = vadd.f32 %v9509_v1, %v5867_v29  ;;  %v3293_v35 = vpop.f32.mrf.mxu1  ;;  %v9511_v45 = vld [vmem:[#allocation8_spill] sm:$0xff] }
 0x264   : > { %v8141_v10 = vpop.eup %4956  ;;  %v3042_v21 = vmul.f32 %v2850_v55, %v9510_v59  ;;  %v2642_v2 = vadd.f32 1.0, %v4955_v52  ;;  %v2093_v56 = vadd.f32 %v1901_v14, %v8101_v46  ;;  %v2836_v23 = vmul.f32 0.5, %v2644_v3  ;;  %v8153_v14 = vpop.f32.mrf.mxu0 }
 0x265   : > { %v8145_v42 = vpop.eup %4958  ;;  %v1903_v31 = vmul.f32 0.044715, %v1711_v17  ;;  %v1520_v57 = vmul.f32 %v8139_v6, %v8139_v6  ;;  %4968 = vtanh.f32 %v9511_v45  ;;  %v2648_v39 = vadd.f32 1.0, %v7819_v5  ;;  %9513 = vst [vmem:[#allocation40_spill] sm:$0xff] %v8153_v14  ;;  %v8155_v3 = vpop.f32.mrf.mxu1  ;;  %v9515_v5 = vld [vmem:[#allocation56_spill] sm:$0xff] }
 0x266   : > { %4623 = vmatprep.mubr.f32.mxu0 %v3042_v21  ;;  %v2834_v1 = vmul.f32 0.5, %v2642_v2  ;;  %v2285_v30 = vmul.f32 0.7978846, %v2093_v56  ;;  %v3051_v55 = vmul.f32 %v2859_v13, %v9512_v62  ;;  %v2673_v52 = vadd.f32 1.0, %v7764_v18  ;;  %9514 = vst [vmem:[#allocation55_spill] sm:$0xff] %v8155_v3  ;;  %v9516_v56 = vld [vmem:[#allocation42_spill] sm:$0xff] }
 0x267   : > { %4624 = vmatmul.mubr.f32.gmra.mxu0 %v8088_v22  ;;  %v2095_v35 = vadd.f32 %v1903_v31, %v8118_v41  ;;  %v1712_v17 = vmul.f32 %v1520_v57, %v8139_v6  ;;  %v2840_v59 = vmul.f32 0.5, %v2648_v39  ;;  %v8162_v21 = vadd.f32 %v9515_v5, %v5865_v28  ;;  %v9517_v62 = vld [vmem:[#allocation3_spill] sm:$0xff]  ;;  %v3298_v14 = vpop.f32.mrf.mxu1  ;;  %v9518_v5 = vld [vmem:[#allocation12_spill] sm:$0xff] }
 0x268   : > { %v3026_v2 = vmul.f32 %v2834_v1, %v9516_v56  ;;  %v3028_v13 = vmul.f32 %v2836_v23, %v9517_v62  ;;  %v2865_v18 = vmul.f32 0.5, %v2673_v52  ;;  %v2647_v45 = vadd.f32 1.0, %v7789_v7  ;;  %v9519_v1 = vld [vmem:[#allocation6_spill] sm:$0xff]  ;;  %v9520_v23 = vld [vmem:[#allocation57_spill] sm:$0xff]  ;;  %v8179_v52 = vpop.f32.mrf.mxu0 }
 0x269   : > { %v4961_v3 = vpop.eup %4960  ;;  %4970 = vtanh.f32 %v2285_v30  ;;  %v2287_v22 = vmul.f32 0.7978846, %v2095_v35  ;;  %v1904_v38 = vmul.f32 0.044715, %v1712_v17  ;;  %v1522_v31 = vmul.f32 %v8162_v21, %v8162_v21  ;;  %v8181_v30 = vpop.f32.mrf.mxu1 }
 0x26a   : > { %v8169_v57 = vpop.eup %4962  ;;  %3414 = vmatprep.mubr.f32.mxu1 %v3026_v2  ;;  %v2664_v39 = vadd.f32 1.0, %v4961_v3  ;;  %v3032_v41 = vmul.f32 %v2840_v59, %v9518_v5  ;;  %v8173_v56 = vmul.f32 %v2865_v18, %v9519_v1  ;;  %v8177_v7 = vadd.f32 %v9520_v23, %v5867_v29  ;;  %9521 = vst [vmem:[#allocation8_spill] sm:$0xff] %v8181_v30  ;;  %v8201_v23 = vpop.f32.mrf.mxu0 }
 0x26b   : > { %3415 = vmatmul.mubr.f32.gmra.mxu1 %v3025_v36  ;;  %4972 = vtanh.f32 %v2287_v22  ;;  %v2096_v14 = vadd.f32 %v1904_v38, %v8139_v6  ;;  %v1714_v35 = vmul.f32 %v1522_v31, %v8162_v21  ;;  %v2651_v3 = vadd.f32 1.0, %v7867_v63  ;;  %v3303_v62 = vpop.f32.mrf.mxu1  ;;  %v9522_v31 = vld [vmem:[#allocation58_spill] sm:$0xff] }
 0x26c   : > { %v2856_v17 = vmul.f32 0.5, %v2664_v39  ;;  %3419 = vmatprep.mubr.f32.mxu1 %v3029_v58  ;;  %v2839_v59 = vmul.f32 0.5, %v2647_v45  ;;  %v1523_v2 = vmul.f32 %v8177_v7, %v8177_v7  ;;  %4974 = vtanh.f32 %v7766_v33  ;;  %v9523_v45 = vld [vmem:[#allocation60_spill] sm:$0xff] }
 0x26d   : > { %v8189_v18 = vpop.eup %4964  ;;  %v2288_v5 = vmul.f32 0.7978846, %v2096_v14  ;;  %v1906_v36 = vmul.f32 0.044715, %v1714_v35  ;;  %v2843_v22 = vmul.f32 0.5, %v2651_v3  ;;  %v2679_v38 = vadd.f32 1.0, %v7830_v16  ;;  %v8203_v62 = vpop.f32.mrf.mxu1 }
 0x26e   : > { %v3048_v63 = vmul.f32 %v2856_v17, %v9522_v31  ;;  %v1715_v58 = vmul.f32 %v1523_v2, %v8177_v7  ;;  %v8198_v39 = vadd.f32 %v9523_v45, %v5865_v28  ;;  %v2650_v33 = vadd.f32 1.0, %v7837_v54  ;;  %9524 = vst [vmem:[#allocation43_spill] sm:$0xff] %v8203_v62  ;;  %v9525_v14 = vld [vmem:[#allocation14_spill] sm:$0xff]  ;;  %v9526_v54 = vld [vmem:[#allocation9_spill] sm:$0xff] }
 0x26f   : > { %v8192_v1 = vpop.eup %4966  ;;  %3420 = vmatmul.mubr.f32.gmra.mxu1 %v3028_v13  ;;  %4976 = vtanh.f32 %v2288_v5  ;;  %v2098_v16 = vadd.f32 %v1906_v36, %v8162_v21  ;;  %v3035_v35 = vmul.f32 %v2843_v22, %v9525_v14  ;;  %v2871_v3 = vmul.f32 0.5, %v2679_v38  ;;  %v3308_v30 = vpop.f32.mrf.mxu1  ;;  %v9527_v5 = vld [vmem:[#allocation5_spill] sm:$0xff]  ;;  %v9528_v38 = vld [vmem:[#allocation2_spill] sm:$0xff] }
 0x270   : > { %4626 = vmatprep.mubr.f32.mxu0 %v3048_v63  ;;  %3424 = vmatprep.mubr.f32.mxu1 %v3032_v41  ;;  %v1907_v17 = vmul.f32 0.044715, %v1715_v58  ;;  %v1525_v2 = vmul.f32 %v8198_v39, %v8198_v39  ;;  %v2842_v31 = vmul.f32 0.5, %v2650_v33  ;;  %v8211_v45 = vadd.f32 %v9526_v54, %v5867_v29  ;;  %v8223_v30 = vpop.f32.mrf.mxu0 }
 0x271   : > { %4627 = vmatmul.mubr.f32.gmra.mxu0 %v3051_v55  ;;  %v2290_v13 = vmul.f32 0.7978846, %v2098_v16  ;;  %v3031_v62 = vmul.f32 %v2839_v59, %v9527_v5  ;;  %4978 = vtanh.f32 %v7846_v0  ;;  %v2654_v36 = vadd.f32 1.0, %v7929_v47  ;;  %9529 = vst [vmem:[#allocation56_spill] sm:$0xff] %v8223_v30  ;;  %v8225_v55 = vpop.f32.mrf.mxu1  ;;  %v9531_v0 = vld [vmem:[#allocation25_spill] sm:$0xff] }
 0x272   : > { %v4969_v22 = vpop.eup %4968  ;;  %v2099_v41 = vadd.f32 %v1907_v17, %v8177_v7  ;;  %v8218_v63 = vmul.f32 %v2871_v3, %v9528_v38  ;;  %v1717_v58 = vmul.f32 %v1525_v2, %v8198_v39  ;;  %v1526_v33 = vmul.f32 %v8211_v45, %v8211_v45  ;;  %9530 = vst [vmem:[#allocation42_spill] sm:$0xff] %v8225_v55  ;;  %v9532_v2 = vld [vmem:[#allocation4_spill] sm:$0xff] }
 0x273   : > { %v2670_v59 = vadd.f32 1.0, %v4969_v22  ;;  %3425 = vmatmul.mubr.f32.gmra.mxu1 %v3031_v62  ;;  %v3034_v16 = vmul.f32 %v2842_v31, %v9531_v0  ;;  %v2846_v47 = vmul.f32 0.5, %v2654_v36  ;;  %v2685_v14 = vadd.f32 1.0, %v7891_v20  ;;  %v3313_v38 = vpop.f32.mrf.mxu1  ;;  %v9533_v55 = vld [vmem:[#allocation36_spill] sm:$0xff]  ;;  %v9535_v0 = vld [vmem:[#allocation7_spill] sm:$0xff] }
 0x274   : > { %v2291_v17 = vmul.f32 0.7978846, %v2099_v41  ;;  %3429 = vmatprep.mubr.f32.mxu1 %v3035_v35  ;;  %v1909_v3 = vmul.f32 0.044715, %v1717_v58  ;;  %v1718_v54 = vmul.f32 %v1526_v33, %v8211_v45  ;;  %v8232_v5 = vadd.f32 %v9532_v2, %v5865_v28  ;;  %v8241_v58 = vpop.f32.mrf.mxu0 }
 0x275   : > { %v2862_v30 = vmul.f32 0.5, %v2670_v59  ;;  %4980 = vtanh.f32 %v2290_v13  ;;  %v3038_v22 = vmul.f32 %v2846_v47, %v9533_v55  ;;  %v2653_v62 = vadd.f32 1.0, %v7904_v15  ;;  %v9536_v15 = vld [vmem:[#allocation61_spill] sm:$0xff] }
 0x276   : > { %v8236_v31 = vpop.eup %4970  ;;  %v2101_v20 = vadd.f32 %v1909_v3, %v8198_v39  ;;  %v1910_v36 = vmul.f32 0.044715, %v1718_v54  ;;  %v2877_v35 = vmul.f32 0.5, %v2685_v14  ;;  %v1528_v41 = vmul.f32 %v8232_v5, %v8232_v5  ;;  %v8243_v33 = vpop.f32.mrf.mxu1 }
 0x277   : > { %9534 = vst [vmem:[#allocation3_spill] sm:$0xff] %v8243_v33  ;;  %v3054_v59 = vmul.f32 %v2862_v30, %v9535_v0  ;;  %4982 = vtanh.f32 %v2291_v17  ;;  %3430 = vmatmul.mubr.f32.gmra.mxu1 %v3034_v16  ;;  %v2845_v13 = vmul.f32 0.5, %v2653_v62  ;;  %v8248_v55 = vadd.f32 %v9536_v15, %v5867_v29  ;;  %v9537_v30 = vld [vmem:[#allocation29_spill] sm:$0xff] }
 0x278   : > { %v8250_v47 = vpop.eup %4972  ;;  %v2293_v3 = vmul.f32 0.7978846, %v2101_v20  ;;  %v2102_v14 = vadd.f32 %v1910_v36, %v8211_v45  ;;  %3434 = vmatprep.mubr.f32.mxu1 %v3038_v22  ;;  %v1720_v54 = vmul.f32 %v1528_v41, %v8232_v5  ;;  %4984 = vtanh.f32 %v7907_v37  ;;  %v3318_v2 = vpop.f32.mrf.mxu1  ;;  %v9538_v36 = vld [vmem:[#allocation13_spill] sm:$0xff] }
 0x279   : > { %v4975_v38 = vpop.eup %4974  ;;  %4629 = vmatprep.mubr.f32.mxu0 %v3054_v59  ;;  %v3037_v16 = vmul.f32 %v2845_v13, %v9537_v30  ;;  %v1529_v17 = vmul.f32 %v8248_v55, %v8248_v55  ;;  %v2657_v62 = vadd.f32 1.0, %v8007_v50  ;;  %v2691_v0 = vadd.f32 1.0, %v7959_v51  ;;  %v8262_v37 = vpop.f32.mrf.mxu0  ;;  %v9540_v2 = vld [vmem:[#allocation63_spill] sm:$0xff] }
 0x27a   : > { %4630 = vmatmul.mubr.f32.gmra.mxu0 %v8173_v56  ;;  %v2676_v20 = vadd.f32 1.0, %v4975_v38  ;;  %v2294_v22 = vmul.f32 0.7978846, %v2102_v14  ;;  %v3069_v41 = vmul.f32 %v2877_v35, %v9538_v36  ;;  %v1912_v15 = vmul.f32 0.044715, %v1720_v54  ;;  %9539 = vst [vmem:[#allocation12_spill] sm:$0xff] %v8262_v37 }
 0x27b   : > { %4986 = vtanh.f32 %v2293_v3  ;;  %3435 = vmatmul.mubr.f32.gmra.mxu1 %v3037_v16  ;;  %v1721_v59 = vmul.f32 %v1529_v17, %v8248_v55  ;;  %v2849_v13 = vmul.f32 0.5, %v2657_v62  ;;  %v8267_v30 = vadd.f32 %v9540_v2, %v5865_v28  ;;  %v8269_v50 = vpop.f32.mrf.mxu1  ;;  %v9542_v36 = vld [vmem:[#allocation62_spill] sm:$0xff] }
 0x27c   : > { %9541 = vst [vmem:[#allocation6_spill] sm:$0xff] %v8269_v50  ;;  %v8271_v51 = vpop.eup %4976  ;;  %v2868_v56 = vmul.f32 0.5, %v2676_v20  ;;  %v2104_v14 = vadd.f32 %v1912_v15, %v8232_v5  ;;  %v2883_v35 = vmul.f32 0.5, %v2691_v0  ;;  %v2656_v54 = vadd.f32 1.0, %v7967_v11  ;;  %v9543_v20 = vld [vmem:[#allocation64_spill] sm:$0xff]  ;;  %v8283_v0 = vpop.f32.mrf.mxu0  ;;  %v9544_v15 = vld [vmem:[#allocation51_spill] sm:$0xff] }
 0x27d   : > { %4988 = vtanh.f32 %v2294_v22  ;;  %v1913_v3 = vmul.f32 0.044715, %v1721_v59  ;;  %v3041_v38 = vmul.f32 %v2849_v13, %v7850_v12  ;;  %v1531_v16 = vmul.f32 %v8267_v30, %v8267_v30  ;;  %v3323_v17 = vpop.f32.mrf.mxu1 }
 0x27e   : > { %v4979_v62 = vpop.eup %4978  ;;  %v3060_v2 = vmul.f32 %v2868_v56, %v9542_v36  ;;  %v2296_v50 = vmul.f32 0.7978846, %v2104_v14  ;;  %v2848_v33 = vmul.f32 0.5, %v2656_v54  ;;  %v8281_v37 = vadd.f32 %v9543_v20, %v5867_v29 }
 0x27f   : > { %v2682_v11 = vadd.f32 1.0, %v4979_v62  ;;  %v2105_v22 = vadd.f32 %v1913_v3, %v8248_v55  ;;  %3439 = vmatprep.mubr.f32.mxu1 %v3041_v38  ;;  %v1723_v12 = vmul.f32 %v1531_v16, %v8267_v30  ;;  %4990 = vtanh.f32 %v7969_v8 }
 0x280   : > { %4632 = vmatprep.mubr.f32.mxu0 %v3060_v2  ;;  %4992 = vtanh.f32 %v2296_v50  ;;  %v3040_v59 = vmul.f32 %v2848_v33, %v9544_v15  ;;  %v1532_v13 = vmul.f32 %v8281_v37, %v8281_v37  ;;  %v2660_v56 = vadd.f32 1.0, %v8069_v44  ;;  %v9545_v33 = vld [vmem:[#allocation21_spill] sm:$0xff]  ;;  %v8302_v44 = vpop.f32.mrf.mxu0 }
 0x281   : > { %4633 = vmatmul.mubr.f32.gmra.mxu0 %v8218_v63  ;;  %v2874_v14 = vmul.f32 0.5, %v2682_v11  ;;  %v2297_v54 = vmul.f32 0.7978846, %v2105_v22  ;;  %v1915_v17 = vmul.f32 0.044715, %v1723_v12  ;;  %v2697_v3 = vadd.f32 1.0, %v8014_v24 }
 0x282   : > { %v8294_v38 = vpop.eup %4980  ;;  %3440 = vmatmul.mubr.f32.gmra.mxu1 %v3040_v59  ;;  %v1724_v8 = vmul.f32 %v1532_v13, %v8281_v37  ;;  %v2852_v50 = vmul.f32 0.5, %v2660_v56  ;;  %v8299_v16 = vadd.f32 %v9545_v33, %v5865_v28  ;;  %v2659_v62 = vadd.f32 1.0, %v8021_v4  ;;  %v9546_v63 = vld [vmem:[#allocation65_spill] sm:$0xff]  ;;  %v9547_v4 = vld [vmem:[#allocation66_spill] sm:$0xff]  ;;  %v8322_v33 = vpop.f32.mrf.mxu0 }
 0x283   : > { %v3066_v36 = vmul.f32 %v2874_v14, %v9546_v63  ;;  %4994 = vtanh.f32 %v2297_v54  ;;  %v2107_v2 = vadd.f32 %v1915_v17, %v8267_v30  ;;  %v2889_v24 = vmul.f32 0.5, %v2697_v3  ;;  %v9548_v14 = vld [vmem:[#allocation10_spill] sm:$0xff] }
 0x284   : > { %v8306_v20 = vpop.eup %4982  ;;  %v1916_v11 = vmul.f32 0.044715, %v1724_v8  ;;  %v3044_v22 = vmul.f32 %v2852_v50, %v7915_v53  ;;  %v1534_v12 = vmul.f32 %v8299_v16, %v8299_v16  ;;  %v2851_v15 = vmul.f32 0.5, %v2659_v62 }
 0x285   : > { %v4985_v59 = vpop.eup %4984  ;;  %4635 = vmatprep.mubr.f32.mxu0 %v3066_v36  ;;  %v3075_v13 = vmul.f32 %v2883_v35, %v9547_v4  ;;  %v2299_v56 = vmul.f32 0.7978846, %v2107_v2  ;;  %v8314_v54 = vadd.f32 %v9548_v14, %v5867_v29  ;;  %4996 = vtanh.f32 %v8043_v25  ;;  %v8317_v17 = vpop.f32.mrf.mxu1 }
 0x286   : > { %9549 = vst [vmem:[#allocation57_spill] sm:$0xff] %v8317_v17  ;;  %4636 = vmatmul.mubr.f32.gmra.mxu0 %v3069_v41  ;;  %v2688_v3 = vadd.f32 1.0, %v4985_v59  ;;  %v2108_v53 = vadd.f32 %v1916_v11, %v8281_v37  ;;  %3444 = vmatprep.mubr.f32.mxu1 %v3044_v22  ;;  %v1726_v8 = vmul.f32 %v1534_v12, %v8299_v16  ;;  %v2663_v25 = vadd.f32 1.0, %v8126_v40 }
 0x287   : > { %v3043_v50 = vmul.f32 %v2851_v15, %v7874_v27  ;;  %v8325_v35 = vmul.f32 %v2889_v24, %v7865_v48  ;;  %v1535_v62 = vmul.f32 %v8314_v54, %v8314_v54  ;;  %v2703_v41 = vadd.f32 1.0, %v8073_v19  ;;  %v3328_v63 = vpop.f32.mrf.mxu1  ;;  %v9550_v27 = vld [vmem:[#allocation35_spill] sm:$0xff] }
 0x288   : > { %v8331_v36 = vpop.eup %4986  ;;  %v2880_v2 = vmul.f32 0.5, %v2688_v3  ;;  %v2300_v11 = vmul.f32 0.7978846, %v2108_v53  ;;  %v1918_v22 = vmul.f32 0.044715, %v1726_v8  ;;  %v8335_v12 = vadd.f32 %v9550_v27, %v5865_v28  ;;  %v8345_v3 = vpop.f32.mrf.mxu0  ;;  %v9553_v27 = vld [vmem:[#allocation27_spill] sm:$0xff] }
 0x289   : > { %3445 = vmatmul.mubr.f32.gmra.mxu1 %v3043_v50  ;;  %4998 = vtanh.f32 %v2299_v56  ;;  %v1727_v48 = vmul.f32 %v1535_v62, %v8314_v54  ;;  %v2855_v24 = vmul.f32 0.5, %v2663_v25  ;;  %v2662_v15 = vadd.f32 1.0, %v8084_v26 }
 0x28a   : > { %v8339_v40 = vpop.eup %4988  ;;  %v3072_v19 = vmul.f32 %v2880_v2, %v7842_v49  ;;  %v2110_v59 = vadd.f32 %v1918_v22, %v8299_v16  ;;  %v2895_v4 = vmul.f32 0.5, %v2703_v41  ;;  %v1537_v14 = vmul.f32 %v8335_v12, %v8335_v12  ;;  %v9551_v49 = vld [vmem:[#allocation67_spill] sm:$0xff] }
 0x28b   : > { %5000 = vtanh.f32 %v2300_v11  ;;  %v1919_v53 = vmul.f32 0.044715, %v1727_v48  ;;  %v3047_v56 = vmul.f32 %v2855_v24, %v7977_v60  ;;  %v2854_v8 = vmul.f32 0.5, %v2662_v15 }
 0x28c   : > { %v4991_v50 = vpop.eup %4990  ;;  %4638 = vmatprep.mubr.f32.mxu0 %v3072_v19  ;;  %v2302_v26 = vmul.f32 0.7978846, %v2110_v59  ;;  %v1729_v62 = vmul.f32 %v1537_v14, %v8335_v12  ;;  %v8351_v25 = vadd.f32 %v9551_v49, %v5867_v29  ;;  %5002 = vtanh.f32 %v8094_v9 }
 0x28d   : > { %v8354_v41 = vpop.eup %4992  ;;  %4639 = vmatmul.mubr.f32.gmra.mxu0 %v3075_v13  ;;  %v2694_v63 = vadd.f32 1.0, %v4991_v50  ;;  %v2111_v2 = vadd.f32 %v1919_v53, %v8314_v54  ;;  %3449 = vmatprep.mubr.f32.mxu1 %v3047_v56  ;;  %v3046_v60 = vmul.f32 %v2854_v8, %v7939_v43  ;;  %v2666_v11 = vadd.f32 1.0, %v8169_v57  ;;  %v8359_v22 = vpop.f32.mrf.mxu1  ;;  %v9554_v43 = vld [vmem:[#allocation18_spill] sm:$0xff] }
 0x28e   : > { %9552 = vst [vmem:[#allocation58_spill] sm:$0xff] %v8359_v22  ;;  %v8362_v48 = vmul.f32 %v2895_v4, %v9553_v27  ;;  %v1921_v24 = vmul.f32 0.044715, %v1729_v62  ;;  %v1538_v9 = vmul.f32 %v8351_v25, %v8351_v25  ;;  %v2709_v15 = vadd.f32 1.0, %v8141_v10  ;;  %v8367_v13 = vpop.f32.mrf.mxu0  ;;  %v9555_v62 = vld [vmem:[#allocation20_spill] sm:$0xff] }
 0x28f   : > { %v2886_v19 = vmul.f32 0.5, %v2694_v63  ;;  %v2303_v59 = vmul.f32 0.7978846, %v2111_v2  ;;  %3450 = vmatmul.mubr.f32.gmra.mxu1 %v3046_v60  ;;  %v2858_v14 = vmul.f32 0.5, %v2666_v11  ;;  %v8371_v57 = vadd.f32 %v9554_v43, %v5865_v28  ;;  %v3333_v53 = vpop.f32.mrf.mxu1  ;;  %v9568_v22 = vld [vmem:[#allocation52_spill] sm:$0xff] }
 0x290   : > { %v8373_v56 = vpop.eup %4994  ;;  %v2113_v4 = vadd.f32 %v1921_v24, %v8335_v12  ;;  %v1730_v8 = vmul.f32 %v1538_v9, %v8351_v25  ;;  %v2901_v50 = vmul.f32 0.5, %v2709_v15  ;;  %v2665_v10 = vadd.f32 1.0, %v8145_v42  ;;  %v8382_v53 = vpop.f32.mrf.mxu0  ;;  %v9556_v9 = vld [vmem:[#allocation16_spill] sm:$0xff] }
 0x291   : > { %v3078_v49 = vmul.f32 %v2886_v19, %v9555_v62  ;;  %5004 = vtanh.f32 %v2302_v26  ;;  %v3050_v63 = vmul.f32 %v2858_v14, %v8032_v61  ;;  %v1540_v2 = vmul.f32 %v8371_v57, %v8371_v57  ;;  %v9557_v19 = vld [vmem:[#allocation44_spill] sm:$0xff] }
 0x292   : > { %v4997_v60 = vpop.eup %4996  ;;  %5006 = vtanh.f32 %v2303_v59  ;;  %v2305_v11 = vmul.f32 0.7978846, %v2113_v4  ;;  %v1922_v27 = vmul.f32 0.044715, %v1730_v8  ;;  %v2857_v43 = vmul.f32 0.5, %v2665_v10 }
 0x293   : > { %4641 = vmatprep.mubr.f32.mxu0 %v3078_v49  ;;  %v2700_v24 = vadd.f32 1.0, %v4997_v60  ;;  %3454 = vmatprep.mubr.f32.mxu1 %v3050_v63  ;;  %v1732_v42 = vmul.f32 %v1540_v2, %v8371_v57  ;;  %v8387_v26 = vadd.f32 %v9556_v9, %v5867_v29  ;;  %5008 = vtanh.f32 %v8133_v32  ;;  %v8403_v32 = vld [vmem:[%s9033_s4] ss:$0 sm:$0xff]  ;;  %v9559_v49 = vld [vmem:[#allocation19_spill] sm:$0xff]  ;;  %v8413_v2 = vpop.f32.mrf.mxu0 }
 0x294   : > { %4642 = vmatmul.mubr.f32.gmra.mxu0 %v8325_v35  ;;  %v2114_v61 = vadd.f32 %v1922_v27, %v8351_v25  ;;  %v8393_v15 = vmul.f32 %v2901_v50, %v7985_v34  ;;  %v3049_v59 = vmul.f32 %v2857_v43, %v9557_v19  ;;  %v2669_v14 = vadd.f32 1.0, %v8236_v31  ;;  %v9561_v19 = vld [vmem:[#allocation11_spill] sm:$0xff] }
 0x295   : > { %v2892_v4 = vmul.f32 0.5, %v2700_v24  ;;  %v1924_v8 = vmul.f32 0.044715, %v1732_v42  ;;  %v1541_v10 = vmul.f32 %v8387_v26, %v8387_v26  ;;  %v2715_v62 = vadd.f32 1.0, %v8189_v18  ;;  %v8405_v35 = vpop.f32.mrf.mxu1  ;;  %v9560_v18 = vld [vmem:[#allocation48_spill] sm:$0xff] }
 0x296   : > { %9558 = vst [vmem:[#allocation60_spill] sm:$0xff] %v8405_v35  ;;  %v8407_v34 = vpop.eup %4998  ;;  %5010 = vtanh.f32 %v2305_v11  ;;  %v2306_v50 = vmul.f32 0.7978846, %v2114_v61  ;;  %3455 = vmatmul.mubr.f32.gmra.mxu1 %v3049_v59  ;;  %v2861_v31 = vmul.f32 0.5, %v2669_v14  ;;  %v8411_v63 = vadd.f32 %v9559_v49, %v5865_v28 }
 0x297   : > { %v3084_v60 = vmul.f32 %v2892_v4, %v9560_v18  ;;  %v2116_v27 = vadd.f32 %v1924_v8, %v8371_v57  ;;  %v1733_v43 = vmul.f32 %v1541_v10, %v8387_v26  ;;  %v2907_v24 = vmul.f32 0.5, %v2715_v62  ;;  %v3338_v42 = vpop.f32.mrf.mxu1  ;;  %v9562_v62 = vld [vmem:[#allocation26_spill] sm:$0xff] }
 0x298   : > { %v8418_v9 = vpop.eup %5000  ;;  %v3053_v11 = vmul.f32 %v2861_v31, %v8101_v46  ;;  %v1543_v61 = vmul.f32 %v8411_v63, %v8411_v63  ;;  %v8425_v59 = vadd.f32 %v8403_v32, %v9561_v19  ;;  %v2668_v14 = vadd.f32 1.0, %v8192_v1  ;;  %v8437_v19 = vpop.f32.mrf.mxu0 }
 0x299   : > { %v5003_v4 = vpop.eup %5002  ;;  %4644 = vmatprep.mubr.f32.mxu0 %v3084_v60  ;;  %5012 = vtanh.f32 %v2306_v50  ;;  %v2308_v8 = vmul.f32 0.7978846, %v2116_v27  ;;  %v1925_v10 = vmul.f32 0.044715, %v1733_v43  ;;  %v8430_v49 = vadd.f32 %v9562_v62, %v5867_v29  ;;  %v8432_v18 = vpop.f32.mrf.mxu1  ;;  %9564 = vst [vmem:[#allocation9_spill] sm:$0xff] %v8437_v19  ;;  %v9565_v60 = vld [vmem:[#allocation59_spill] sm:$0xff] }
 0x29a   : > { %9563 = vst [vmem:[#allocation14_spill] sm:$0xff] %v8432_v18  ;;  %4645 = vmatmul.mubr.f32.gmra.mxu0 %v8362_v48  ;;  %v2706_v46 = vadd.f32 1.0, %v5003_v4  ;;  %3459 = vmatprep.mubr.f32.mxu1 %v3053_v11  ;;  %v1735_v31 = vmul.f32 %v1543_v61, %v8411_v63  ;;  %v2860_v42 = vmul.f32 0.5, %v2668_v14  ;;  %v2672_v1 = vadd.f32 1.0, %v8271_v51  ;;  %v9566_v62 = vld [vmem:[#allocation28_spill] sm:$0xff]  ;;  %v9567_v14 = vld [vmem:[#allocation38_spill] sm:$0xff] }
 0x29b   : > { %v2117_v50 = vadd.f32 %v1925_v10, %v8387_v26  ;;  %v8441_v27 = vmul.f32 %v2907_v24, %v9565_v60  ;;  %v1544_v43 = vmul.f32 %v8430_v49, %v8430_v49  ;;  %v8447_v48 = vadd.f32 %v9566_v62, %v5865_v28  ;;  %v3343_v11 = vpop.f32.mrf.mxu1 }
 0x29c   : > { %v2898_v4 = vmul.f32 0.5, %v2706_v46  ;;  %v1927_v61 = vmul.f32 0.044715, %v1735_v31  ;;  %v3052_v18 = vmul.f32 %v2860_v42, %v9567_v14  ;;  %v2864_v51 = vmul.f32 0.5, %v2672_v1  ;;  %v8459_v42 = vpop.f32.mrf.mxu0  ;;  %v9572_v14 = vld [vmem:[#allocation50_spill] sm:$0xff] }
 0x29d   : > { %5014 = vtanh.f32 %v2308_v8  ;;  %v2309_v35 = vmul.f32 0.7978846, %v2117_v50  ;;  %v1736_v10 = vmul.f32 %v1544_v43, %v8430_v49  ;;  %v1546_v24 = vmul.f32 %v8447_v48, %v8447_v48  ;;  %9569 = vst [vmem:[#allocation5_spill] sm:$0xff] %v8459_v42  ;;  %v9570_v43 = vld [vmem:[#allocation15_spill] sm:$0xff] }
 0x29e   : > { %v8453_v60 = vpop.eup %5004  ;;  %v3090_v17 = vmul.f32 %v2898_v4, %v9568_v22  ;;  %v2119_v62 = vadd.f32 %v1927_v61, %v8411_v63  ;;  %3460 = vmatmul.mubr.f32.gmra.mxu1 %v3052_v18  ;;  %v3056_v46 = vmul.f32 %v2864_v51, %v8139_v6  ;;  %v2671_v31 = vadd.f32 1.0, %v8250_v47  ;;  %v9571_v22 = vld [vmem:[#allocation34_spill] sm:$0xff] }
 0x29f   : > { %v8461_v8 = vpop.eup %5006  ;;  %v1928_v1 = vmul.f32 0.044715, %v1736_v10  ;;  %v1738_v50 = vmul.f32 %v1546_v24, %v8447_v48  ;;  %v8466_v11 = vadd.f32 %v8403_v32, %v9570_v43  ;;  %v8470_v4 = vadd.f32 %v9571_v22, %v5867_v29 }
 0x2a0   : > { %v5009_v18 = vpop.eup %5008  ;;  %4647 = vmatprep.mubr.f32.mxu0 %v3090_v17  ;;  %v2311_v6 = vmul.f32 0.7978846, %v2119_v62  ;;  %3464 = vmatprep.mubr.f32.mxu1 %v3056_v46  ;;  %v2863_v47 = vmul.f32 0.5, %v2671_v31  ;;  %v2675_v61 = vadd.f32 1.0, %v8306_v20  ;;  %v8475_v51 = vadd.f32 %v9572_v14, %v5865_v28  ;;  %v9573_v17 = vld [vmem:[#allocation37_spill] sm:$0xff]  ;;  %v8484_v31 = vpop.f32.mrf.mxu0 }
 0x2a1   : > { %4648 = vmatmul.mubr.f32.gmra.mxu0 %v8393_v15  ;;  %v2712_v10 = vadd.f32 1.0, %v5009_v18  ;;  %v2120_v24 = vadd.f32 %v1928_v1, %v8430_v49  ;;  %v1930_v43 = vmul.f32 0.044715, %v1738_v50  ;;  %v1547_v22 = vmul.f32 %v8470_v4, %v8470_v4  ;;  %9574 = vst [vmem:[#allocation2_spill] sm:$0xff] %v8484_v31 }
 0x2a2   : > { %5016 = vtanh.f32 %v2309_v35  ;;  %v3055_v62 = vmul.f32 %v2863_v47, %v9573_v17  ;;  %v2867_v46 = vmul.f32 0.5, %v2675_v61  ;;  %v1549_v20 = vmul.f32 %v8475_v51, %v8475_v51  ;;  %v9576_v17 = vld [vmem:[#allocation70_spill] sm:$0xff] }
 0x2a3   : > { %v8486_v14 = vpop.eup %5010  ;;  %v2904_v42 = vmul.f32 0.5, %v2712_v10  ;;  %v2312_v15 = vmul.f32 0.7978846, %v2120_v24  ;;  %v2122_v18 = vadd.f32 %v1930_v43, %v8447_v48  ;;  %v1739_v1 = vmul.f32 %v1547_v22, %v8470_v4 }
 0x2a4   : > { %5018 = vtanh.f32 %v2311_v6  ;;  %3465 = vmatmul.mubr.f32.gmra.mxu1 %v3055_v62  ;;  %v3059_v35 = vmul.f32 %v2867_v46, %v8177_v7  ;;  %v1741_v50 = vmul.f32 %v1549_v20, %v8475_v51  ;;  %v2674_v47 = vadd.f32 1.0, %v8294_v38  ;;  %v8493_v61 = vpop.f32.mrf.mxu1  ;;  %v9577_v6 = vld [vmem:[#allocation32_spill] sm:$0xff]  ;;  %v8503_v46 = vpop.f32.mrf.mxu0  ;;  %v9578_v20 = vld [vmem:[#allocation17_spill] sm:$0xff] }
 0x2a5   : > { %9575 = vst [vmem:[#allocation25_spill] sm:$0xff] %v8493_v61  ;;  %v3096_v31 = vmul.f32 %v2904_v42, %v9576_v17  ;;  %5020 = vtanh.f32 %v2312_v15  ;;  %v2314_v19 = vmul.f32 0.7978846, %v2122_v18  ;;  %v1931_v10 = vmul.f32 0.044715, %v1739_v1  ;;  %v9579_v18 = vld [vmem:[#allocation30_spill] sm:$0xff] }
 0x2a6   : > { %v8496_v24 = vpop.eup %5012  ;;  %3469 = vmatprep.mubr.f32.mxu1 %v3059_v35  ;;  %v1933_v43 = vmul.f32 0.044715, %v1741_v50  ;;  %v2866_v22 = vmul.f32 0.5, %v2674_v47  ;;  %v8500_v62 = vadd.f32 %v9577_v6, %v5867_v29  ;;  %v2678_v7 = vadd.f32 1.0, %v8339_v40  ;;  %v3348_v38 = vpop.f32.mrf.mxu1 }
 0x2a7   : > { %4650 = vmatprep.mubr.f32.mxu0 %v3096_v31  ;;  %5022 = vtanh.f32 %v2314_v19  ;;  %v2123_v42 = vadd.f32 %v1931_v10, %v8470_v4  ;;  %v8508_v15 = vadd.f32 %v8403_v32, %v9578_v20  ;;  %v8512_v1 = vadd.f32 %v9579_v18, %v5865_v28  ;;  %v9580_v10 = vld [vmem:[#allocation45_spill] sm:$0xff]  ;;  %v9582_v20 = vld [vmem:[#allocation31_spill] sm:$0xff] }
 0x2a8   : > { %4651 = vmatmul.mubr.f32.gmra.mxu0 %v8441_v27  ;;  %v2125_v35 = vadd.f32 %v1933_v43, %v8475_v51  ;;  %v3058_v40 = vmul.f32 %v2866_v22, %v8162_v21  ;;  %v1550_v31 = vmul.f32 %v8500_v62, %v8500_v62  ;;  %v2870_v19 = vmul.f32 0.5, %v2678_v7  ;;  %v8531_v7 = vpop.f32.mrf.mxu0 }
 0x2a9   : > { %v2315_v50 = vmul.f32 0.7978846, %v2123_v42  ;;  %v1552_v47 = vmul.f32 %v8512_v1, %v8512_v1  ;;  %v2677_v17 = vadd.f32 1.0, %v8331_v36  ;;  %v8524_v6 = vadd.f32 %v9580_v10, %v5867_v29  ;;  %9581 = vst [vmem:[#allocation4_spill] sm:$0xff] %v8531_v7 }
 0x2aa   : > { %v8526_v38 = vpop.eup %5014  ;;  %v2317_v27 = vmul.f32 0.7978846, %v2125_v35  ;;  %3470 = vmatmul.mubr.f32.gmra.mxu1 %v3058_v40  ;;  %v1742_v21 = vmul.f32 %v1550_v31, %v8500_v62  ;;  %v3062_v43 = vmul.f32 %v2870_v19, %v8211_v45  ;;  %v2681_v22 = vadd.f32 1.0, %v8373_v56  ;;  %v9583_v45 = vld [vmem:[#allocation53_spill] sm:$0xff] }
 0x2ab   : > { %v1744_v42 = vmul.f32 %v1552_v47, %v8512_v1  ;;  %v8536_v36 = vadd.f32 %v8403_v32, %v9582_v20  ;;  %v2869_v18 = vmul.f32 0.5, %v2677_v17  ;;  %v1553_v10 = vmul.f32 %v8524_v6, %v8524_v6 }
 0x2ac   : > { %5024 = vtanh.f32 %v2315_v50  ;;  %v1934_v35 = vmul.f32 0.044715, %v1742_v21  ;;  %3474 = vmatprep.mubr.f32.mxu1 %v3062_v43  ;;  %v2873_v40 = vmul.f32 0.5, %v2681_v22  ;;  %v8542_v31 = vadd.f32 %v9583_v45, %v5865_v28  ;;  %v8553_v43 = vpop.f32.mrf.mxu0  ;;  %v9587_v45 = vld [vmem:[#allocation41_spill] sm:$0xff] }
 0x2ad   : > { %5026 = vtanh.f32 %v2317_v27  ;;  %v1936_v56 = vmul.f32 0.044715, %v1744_v42  ;;  %v3061_v19 = vmul.f32 %v2869_v18, %v8198_v39  ;;  %v1745_v47 = vmul.f32 %v1553_v10, %v8524_v6  ;;  %v8546_v20 = vpop.f32.mrf.mxu1  ;;  %9585 = vst [vmem:[#allocation7_spill] sm:$0xff] %v8553_v43  ;;  %v9586_v42 = vld [vmem:[#allocation54_spill] sm:$0xff] }
 0x2ae   : > { %9584 = vst [vmem:[#allocation36_spill] sm:$0xff] %v8546_v20  ;;  %v2126_v17 = vadd.f32 %v1934_v35, %v8500_v62  ;;  %v3065_v61 = vmul.f32 %v2873_v40, %v8248_v55  ;;  %v1555_v50 = vmul.f32 %v8542_v31, %v8542_v31  ;;  %v2680_v21 = vadd.f32 1.0, %v8354_v41  ;;  %v8568_v7 = vpop.f32.mrf.mxu0 }
 0x2af   : > { %v8555_v22 = vpop.eup %5016  ;;  %v2128_v27 = vadd.f32 %v1936_v56, %v8512_v1  ;;  %3475 = vmatmul.mubr.f32.gmra.mxu1 %v3061_v19  ;;  %v1937_v39 = vmul.f32 0.044715, %v1745_v47  ;;  %v8560_v18 = vadd.f32 %v9586_v42, %v5867_v29  ;;  %v2684_v10 = vadd.f32 1.0, %v8418_v9  ;;  %v3353_v55 = vpop.f32.mrf.mxu1  ;;  %9588 = vst [vmem:[#allocation61_spill] sm:$0xff] %v8568_v7 }
 0x2b0   : > { %v2318_v35 = vmul.f32 0.7978846, %v2126_v17  ;;  %3479 = vmatprep.mubr.f32.mxu1 %v3065_v61  ;;  %v1747_v40 = vmul.f32 %v1555_v50, %v8542_v31  ;;  %v2872_v41 = vmul.f32 0.5, %v2680_v21  ;;  %v8566_v20 = vadd.f32 %v9587_v45, %v5865_v28  ;;  %v9589_v50 = vld [vmem:[#allocation22_spill] sm:$0xff] }
 0x2b1   : > { %v8570_v56 = vpop.eup %5018  ;;  %v2320_v19 = vmul.f32 0.7978846, %v2128_v27  ;;  %v2129_v47 = vadd.f32 %v1937_v39, %v8524_v6  ;;  %v1556_v9 = vmul.f32 %v8560_v18, %v8560_v18  ;;  %v2876_v42 = vmul.f32 0.5, %v2684_v10 }
 0x2b2   : > { %v8575_v17 = vpop.eup %5020  ;;  %v1939_v61 = vmul.f32 0.044715, %v1747_v40  ;;  %v8579_v21 = vadd.f32 %v8403_v32, %v9589_v50  ;;  %v3064_v55 = vmul.f32 %v2872_v41, %v8232_v5  ;;  %v1558_v45 = vmul.f32 %v8566_v20, %v8566_v20  ;;  %v8591_v5 = vpop.f32.mrf.mxu0 }
 0x2b3   : > { %5028 = vtanh.f32 %v2318_v35  ;;  %v2321_v27 = vmul.f32 0.7978846, %v2129_v47  ;;  %v1748_v39 = vmul.f32 %v1556_v9, %v8560_v18  ;;  %v3068_v7 = vmul.f32 %v2876_v42, %v8281_v37  ;;  %9590 = vst [vmem:[#allocation29_spill] sm:$0xff] %v8591_v5  ;;  %v9591_v35 = vld [vmem:[#allocation24_spill] sm:$0xff] }
 0x2b4   : > { %v8586_v43 = vpop.eup %5022  ;;  %5030 = vtanh.f32 %v2320_v19  ;;  %v2131_v10 = vadd.f32 %v1939_v61, %v8542_v31  ;;  %3480 = vmatmul.mubr.f32.gmra.mxu1 %v3064_v55  ;;  %v1750_v40 = vmul.f32 %v1558_v45, %v8566_v20  ;;  %v2683_v50 = vadd.f32 1.0, %v8407_v34  ;;  %v9592_v37 = vld [vmem:[#allocation40_spill] sm:$0xff] }
 0x2b5   : > { %v1940_v41 = vmul.f32 0.044715, %v1748_v39  ;;  %3484 = vmatprep.mubr.f32.mxu1 %v3068_v7  ;;  %v8595_v47 = vadd.f32 %v8403_v32, %v9591_v35  ;;  %v8599_v9 = vadd.f32 %v9592_v37, %v5867_v29  ;;  %v2687_v19 = vadd.f32 1.0, %v8461_v8  ;;  %v8602_v42 = vpop.f32.mrf.mxu1  ;;  %v8608_v7 = vpop.f32.mrf.mxu0 }
 0x2b6   : > { %9593 = vst [vmem:[#allocation13_spill] sm:$0xff] %v8602_v42  ;;  %v2323_v61 = vmul.f32 0.7978846, %v2131_v10  ;;  %v1942_v55 = vmul.f32 0.044715, %v1750_v40  ;;  %v2875_v45 = vmul.f32 0.5, %v2683_v50  ;;  %v8606_v34 = vadd.f32 %v8179_v52, %v5865_v28 }
 0x2b7   : > { %5032 = vtanh.f32 %v2321_v27  ;;  %v2132_v39 = vadd.f32 %v1940_v41, %v8560_v18  ;;  %v1559_v35 = vmul.f32 %v8599_v9, %v8599_v9  ;;  %v2879_v37 = vmul.f32 0.5, %v2687_v19  ;;  %v3358_v5 = vpop.f32.mrf.mxu1  ;;  %v9594_v50 = vld [vmem:[#allocation23_spill] sm:$0xff] }
 0x2b8   : > { %v2134_v8 = vadd.f32 %v1942_v55, %v8566_v20  ;;  %v3067_v10 = vmul.f32 %v2875_v45, %v8267_v30  ;;  %v1561_v40 = vmul.f32 %v8606_v34, %v8606_v34  ;;  %v8619_v28 = vadd.f32 %v8403_v32, %v9594_v50 }
 0x2b9   : > { %v8621_v52 = vpop.eup %5024  ;;  %v2324_v27 = vmul.f32 0.7978846, %v2132_v39  ;;  %v1751_v41 = vmul.f32 %v1559_v35, %v8599_v9  ;;  %v3071_v42 = vmul.f32 %v2879_v37, %v8314_v54  ;;  %v2686_v5 = vadd.f32 1.0, %v8453_v60  ;;  %v8634_v39 = vpop.f32.mrf.mxu0 }
 0x2ba   : > { %v8626_v19 = vpop.eup %5026  ;;  %5034 = vtanh.f32 %v2323_v61  ;;  %3485 = vmatmul.mubr.f32.gmra.mxu1 %v3067_v10  ;;  %v1753_v30 = vmul.f32 %v1561_v40, %v8606_v34  ;;  %v8631_v55 = vadd.f32 %v8201_v23, %v5867_v29  ;;  %v2690_v45 = vadd.f32 1.0, %v8496_v24  ;;  %v9595_v40 = vld [vmem:[#allocation49_spill] sm:$0xff] }
 0x2bb   : > { %5036 = vtanh.f32 %v2324_v27  ;;  %v2326_v35 = vmul.f32 0.7978846, %v2134_v8  ;;  %v1943_v54 = vmul.f32 0.044715, %v1751_v41  ;;  %3489 = vmatprep.mubr.f32.mxu1 %v3071_v42  ;;  %v2878_v60 = vmul.f32 0.5, %v2686_v5  ;;  %v8642_v23 = vpop.f32.mrf.mxu0  ;;  %v9596_v42 = vld [vmem:[#allocation56_spill] sm:$0xff] }
 0x2bc   : > { %v1945_v37 = vmul.f32 0.044715, %v1753_v30  ;;  %v1562_v61 = vmul.f32 %v8631_v55, %v8631_v55  ;;  %v2882_v10 = vmul.f32 0.5, %v2690_v45  ;;  %v8640_v29 = vadd.f32 %v8403_v32, %v9595_v40 }
 0x2bd   : > { %v2135_v24 = vadd.f32 %v1943_v54, %v8599_v9  ;;  %v3070_v50 = vmul.f32 %v2878_v60, %v8299_v16  ;;  %v2689_v8 = vadd.f32 1.0, %v8486_v14  ;;  %v3612_v27 = vadd.f32 %v9596_v42, %v8466_v11  ;;  %v5046_v54 = vld [vmem:[%s5255_s10 + $0x8] sm:$0xff] }
 0x2be   : > { %v2137_v41 = vadd.f32 %v1945_v37, %v8606_v34  ;;  %v1754_v5 = vmul.f32 %v1562_v61, %v8631_v55  ;;  %v3074_v30 = vmul.f32 %v2882_v10, %v8351_v25  ;;  %v3607_v16 = vadd.f32 %v8241_v58, %v8425_v59  ;;  %v8661_v14 = vpop.f32.mrf.mxu1  ;;  %v5047_v25 = vld [vmem:[%s5255_s10] sm:$0xff]  ;;  %v8668_v58 = vpop.f32.mrf.mxu0 }
 0x2bf   : > { %v2327_v45 = vmul.f32 0.7978846, %v2135_v24  ;;  %3490 = vmatmul.mubr.f32.gmra.mxu1 %v3070_v50  ;;  %v2881_v11 = vmul.f32 0.5, %v2689_v8  ;;  %v3926_v60 = vadd.f32 %v5046_v54, %v3612_v27  ;;  %v2693_v40 = vadd.f32 1.0, %v8555_v22  ;;  %v9597_v27 = vld [vmem:[#allocation33_spill] sm:$0xff] }
 0x2c0   : > { %v8665_v42 = vpop.eup %5028  ;;  %5038 = vtanh.f32 %v2326_v35  ;;  %v2329_v37 = vmul.f32 0.7978846, %v2137_v41  ;;  %v1946_v61 = vmul.f32 0.044715, %v1754_v5  ;;  %3494 = vmatprep.mubr.f32.mxu1 %v3074_v30  ;;  %v3925_v10 = vadd.f32 %v5047_v25, %v3607_v16  ;;  %v3363_v59 = vpop.f32.mrf.mxu1  ;;  %v9598_v5 = vld [vmem:[#allocation12_spill] sm:$0xff] }
 0x2c1   : > { %v8670_v24 = vpop.eup %5030  ;;  %5040 = vtanh.f32 %v2327_v45  ;;  %v3073_v50 = vmul.f32 %v2881_v11, %v8335_v12  ;;  %3990 = vst.msk [vmem:[%s8654_s25 + $0x8] sm:$0xff] %vm345_vm0, %v3926_v60  ;;  %v2885_v22 = vmul.f32 0.5, %v2693_v40  ;;  %v2692_v8 = vadd.f32 1.0, %v8526_v38  ;;  %v8685_v16 = vpop.f32.mrf.mxu0  ;;  %v5048_v40 = vld [vmem:[%s5255_s10 + $0x18] sm:$0xff]  ;;  %v5049_v25 = vld [vmem:[%s5255_s10 + $0x10] sm:$0xff] }
 0x2c2   : > { %v2138_v35 = vadd.f32 %v1946_v61, %v8631_v55  ;;  %3989 = vst.msk [vmem:[%s8654_s25] sm:$0xff] %vm345_vm0, %v3925_v10  ;;  %v3262_v41 = vadd.f32 %v8403_v32, %v9597_v27  ;;  %v3622_v30 = vadd.f32 %v9598_v5, %v8536_v36  ;;  %v3617_v12 = vadd.f32 %v8283_v0, %v8508_v15 }
 0x2c3   : > { %5042 = vtanh.f32 %v2329_v37  ;;  %3495 = vmatmul.mubr.f32.gmra.mxu1 %v3073_v50  ;;  %v3077_v38 = vmul.f32 %v2885_v22, %v8387_v26  ;;  %v2884_v45 = vmul.f32 0.5, %v2692_v8  ;;  %v2696_v11 = vadd.f32 1.0, %v8575_v17  ;;  %v9599_v37 = vld [vmem:[#allocation68_spill] sm:$0xff] }
 0x2c4   : > { %v5033_v54 = vpop.eup %5032  ;;  %v2330_v60 = vmul.f32 0.7978846, %v2138_v35  ;;  %v3928_v61 = vadd.f32 %v5048_v40, %v3622_v30  ;;  %v3927_v36 = vadd.f32 %v5049_v25, %v3617_v12  ;;  %v2695_v10 = vadd.f32 1.0, %v8570_v56  ;;  %v9600_v30 = vld [vmem:[#allocation39_spill] sm:$0xff]  ;;  %v5053_v40 = vld [vmem:[%s5255_s10 + $0x30] sm:$0xff] }
 0x2c5   : > { %3499 = vmatprep.mubr.f32.mxu1 %v3077_v38  ;;  %v3076_v0 = vmul.f32 %v2884_v45, %v8371_v57  ;;  %v2888_v15 = vmul.f32 0.5, %v2696_v11  ;;  %v3632_v26 = vadd.f32 %v8302_v44, %v8595_v47  ;;  %v3627_v17 = vadd.f32 %v8322_v33, %v8579_v21  ;;  %v8704_v57 = vpop.f32.mrf.mxu0  ;;  %v5050_v33 = vld [vmem:[%s5255_s10 + $0x28] sm:$0xff]  ;;  %v5051_v47 = vld [vmem:[%s5255_s10 + $0x20] sm:$0xff] }
 0x2c6   : > { %5044 = vtanh.f32 %v2330_v60  ;;  %3992 = vst.msk [vmem:[%s8654_s25 + $0x18] sm:$0xff] %vm345_vm0, %v3928_v61  ;;  %3991 = vst.msk [vmem:[%s8654_s25 + $0x10] sm:$0xff] %vm345_vm0, %v3927_v36  ;;  %v3267_v56 = vadd.f32 %v8403_v32, %v9599_v37  ;;  %v2887_v59 = vmul.f32 0.5, %v2695_v10  ;;  %v2699_v50 = vadd.f32 1.0, %v8621_v52 }
 0x2c7   : > { %v5035_v22 = vpop.eup %5034  ;;  %3500 = vmatmul.mubr.f32.gmra.mxu1 %v3076_v0  ;;  %v3080_v44 = vmul.f32 %v2888_v15, %v8430_v49  ;;  %v3930_v21 = vadd.f32 %v5050_v33, %v3632_v26  ;;  %v3929_v8 = vadd.f32 %v5051_v47, %v3627_v17  ;;  %v2698_v35 = vadd.f32 1.0, %v8586_v43  ;;  %v8716_v38 = vpop.f32.mrf.mxu0  ;;  %v9601_v0 = vld [vmem:[#allocation69_spill] sm:$0xff]  ;;  %v5054_v15 = vld [vmem:[%s5255_s10 + $0x48] sm:$0xff] }
 0x2c8   : > { %v5037_v27 = vpop.eup %5036  ;;  %v2891_v5 = vmul.f32 0.5, %v2699_v50  ;;  %v3272_v52 = vadd.f32 %v8403_v32, %v9600_v30  ;;  %v3642_v12 = vadd.f32 %v8345_v3, %v8640_v29  ;;  %v3637_v49 = vadd.f32 %v8367_v13, %v8619_v28  ;;  %v8718_v45 = vpop.f32.mrf.mxu1  ;;  %v5052_v28 = vld [vmem:[%s5255_s10 + $0x38] sm:$0xff] }
 0x2c9   : > { %3504 = vmatprep.mubr.f32.mxu1 %v3080_v44  ;;  %v3079_v43 = vmul.f32 %v2887_v59, %v8411_v63  ;;  %3994 = vst.msk [vmem:[%s8654_s25 + $0x28] sm:$0xff] %vm345_vm0, %v3930_v21  ;;  %3993 = vst.msk [vmem:[%s8654_s25 + $0x20] sm:$0xff] %vm345_vm0, %v3929_v8  ;;  %v2890_v11 = vmul.f32 0.5, %v2698_v35  ;;  %v2702_v60 = vadd.f32 1.0, %v8665_v42  ;;  %v2701_v3 = vadd.f32 1.0, %v8626_v19  ;;  %v9602_v59 = vld [vmem:[#allocation47_spill] sm:$0xff] }
 0x2ca   : > { %v3083_v13 = vmul.f32 %v2891_v5, %v8470_v4  ;;  %v3932_v29 = vadd.f32 %v5052_v28, %v3642_v12  ;;  %v3931_v61 = vadd.f32 %v5053_v40, %v3637_v49  ;;  %v3652_v63 = vadd.f32 %v8382_v53, %v3267_v56  ;;  %v3368_v25 = vpop.f32.mrf.mxu1  ;;  %v9603_v44 = vld [vmem:[#allocation9_spill] sm:$0xff]  ;;  %v9605_v12 = vld [vmem:[#allocation46_spill] sm:$0xff] }
 0x2cb   : > { %3505 = vmatmul.mubr.f32.gmra.mxu1 %v3079_v43  ;;  %v3082_v36 = vmul.f32 %v2890_v11, %v8447_v48  ;;  %v2894_v10 = vmul.f32 0.5, %v2702_v60  ;;  %v3277_v42 = vadd.f32 %v8403_v32, %v9601_v0  ;;  %v3647_v19 = vadd.f32 %v8413_v2, %v3262_v41  ;;  %v8741_v48 = vpop.f32.mrf.mxu0  ;;  %v5055_v2 = vld [vmem:[%s5255_s10 + $0x40] sm:$0xff]  ;;  %v9604_v47 = vld [vmem:[#allocation5_spill] sm:$0xff]  ;;  %v9608_v0 = vld [vmem:[#allocation55_spill] sm:$0xff] }
 0x2cc   : > { %3509 = vmatprep.mubr.f32.mxu1 %v3083_v13  ;;  %3996 = vst.msk [vmem:[%s8654_s25 + $0x38] sm:$0xff] %vm345_vm0, %v3932_v29  ;;  %3995 = vst.msk [vmem:[%s8654_s25 + $0x30] sm:$0xff] %vm345_vm0, %v3931_v61  ;;  %v2893_v4 = vmul.f32 0.5, %v2701_v3  ;;  %v3934_v53 = vadd.f32 %v5054_v15, %v3652_v63  ;;  %v2705_v26 = vadd.f32 1.0, %v5033_v54  ;;  %v2704_v17 = vadd.f32 1.0, %v8670_v24  ;;  %v5057_v3 = vld [vmem:[%s5255_s10 + $0x50] sm:$0xff] }
 0x2cd   : > { %v5039_v37 = vpop.eup %5038  ;;  %v3086_v56 = vmul.f32 %v2894_v10, %v8500_v62  ;;  %v3933_v41 = vadd.f32 %v5055_v2, %v3647_v19  ;;  %v3282_v50 = vadd.f32 %v8403_v32, %v9602_v59  ;;  %v3662_v33 = vadd.f32 %v9603_v44, %v3277_v42  ;;  %v8751_v5 = vpop.f32.mrf.mxu0  ;;  %v5056_v62 = vld [vmem:[%s5255_s10 + $0x58] sm:$0xff]  ;;  %v9606_v40 = vld [vmem:[#allocation2_spill] sm:$0xff]  ;;  %v9609_v2 = vld [vmem:[#allocation7_spill] sm:$0xff] }
 0x2ce   : > { %v5041_v21 = vpop.eup %5040  ;;  %3998 = vst.msk [vmem:[%s8654_s25 + $0x48] sm:$0xff] %vm345_vm0, %v3934_v53  ;;  %v2897_v54 = vmul.f32 0.5, %v2705_v26  ;;  %v2896_v24 = vmul.f32 0.5, %v2704_v17  ;;  %v3657_v8 = vadd.f32 %v9604_v47, %v3272_v52  ;;  %v2708_v35 = vadd.f32 1.0, %v5037_v27  ;;  %v5059_v53 = vld [vmem:[%s5255_s10 + $0x68] sm:$0xff] }
 0x2cf   : > { %3510 = vmatmul.mubr.f32.gmra.mxu1 %v3082_v36  ;;  %3997 = vst.msk [vmem:[%s8654_s25 + $0x40] sm:$0xff] %vm345_vm0, %v3933_v41  ;;  %v3936_v30 = vadd.f32 %v5056_v62, %v3662_v33  ;;  %v3287_v49 = vadd.f32 %v8403_v32, %v9605_v12  ;;  %v2707_v43 = vadd.f32 1.0, %v5035_v22  ;;  %v3667_v11 = vadd.f32 %v8503_v46, %v3282_v50  ;;  %v5058_v22 = vld [vmem:[%s5255_s10 + $0x60] sm:$0xff]  ;;  %v8775_v19 = vpop.f32.mrf.mxu0  ;;  %v9610_v50 = vld [vmem:[#allocation4_spill] sm:$0xff]  ;;  %v9612_v47 = vld [vmem:[#allocation43_spill] sm:$0xff] }
 0x2d0   : > { %v5043_v60 = vpop.eup %5042  ;;  %3514 = vmatprep.mubr.f32.mxu1 %v3086_v56  ;;  %v3085_v27 = vmul.f32 %v2893_v4, %v8475_v51  ;;  %v3089_v52 = vmul.f32 %v2897_v54, %v8524_v6  ;;  %v3935_v13 = vadd.f32 %v5057_v3, %v3657_v8  ;;  %v2900_v28 = vmul.f32 0.5, %v2708_v35  ;;  %v9607_v51 = vld [vmem:[#allocation71_spill] sm:$0xff]  ;;  %v9611_v54 = vld [vmem:[#allocation8_spill] sm:$0xff]  ;;  %v5061_v12 = vld [vmem:[%s5255_s10 + $0x78] sm:$0xff] }
 0x2d1   : > { %4000 = vst.msk [vmem:[%s8654_s25 + $0x58] sm:$0xff] %vm345_vm0, %v3936_v30  ;;  %v2899_v29 = vmul.f32 0.5, %v2707_v43  ;;  %v3672_v61 = vadd.f32 %v9606_v40, %v3287_v49  ;;  %v3937_v63 = vadd.f32 %v5058_v22, %v3667_v11  ;;  %v2711_v46 = vadd.f32 1.0, %v5041_v21  ;;  %v8766_v25 = vpop.f32.mrf.mxu1  ;;  %v8783_v33 = vpop.f32.mrf.mxu0  ;;  %v5060_v35 = vld [vmem:[%s5255_s10 + $0x70] sm:$0xff]  ;;  %v9617_v40 = vld [vmem:[#allocation6_spill] sm:$0xff] }
 0x2d2   : > { %v3088_v36 = vmul.f32 %v2896_v24, %v8512_v1  ;;  %3999 = vst.msk [vmem:[%s8654_s25 + $0x50] sm:$0xff] %vm345_vm0, %v3935_v13  ;;  %v3292_v6 = vadd.f32 %v8403_v32, %v9607_v51  ;;  %v2710_v10 = vadd.f32 1.0, %v5039_v37  ;;  %v3297_v42 = vadd.f32 %v8403_v32, %v9608_v0  ;;  %v5063_v51 = vld [vmem:[%s5255_s10 + $0x88] sm:$0xff] }
 0x2d3   : > { %v5045_v4 = vpop.eup %5044  ;;  %3515 = vmatmul.mubr.f32.gmra.mxu1 %v3085_v27  ;;  %v3092_v15 = vmul.f32 %v2900_v28, %v8560_v18  ;;  %v3938_v26 = vadd.f32 %v5059_v53, %v3672_v61  ;;  %4001 = vst.msk [vmem:[%s8654_s25 + $0x60] sm:$0xff] %vm345_vm0, %v3937_v63  ;;  %v2903_v1 = vmul.f32 0.5, %v2711_v46  ;;  %v2713_v17 = vadd.f32 1.0, %v5043_v60  ;;  %v3373_v56 = vpop.f32.mrf.mxu1  ;;  %v9614_v60 = vld [vmem:[#allocation61_spill] sm:$0xff]  ;;  %v9616_v28 = vld [vmem:[#allocation3_spill] sm:$0xff]  ;;  %v5062_v46 = vld [vmem:[%s5255_s10 + $0x80] sm:$0xff] }
 0x2d4   : > { %3519 = vmatprep.mubr.f32.mxu1 %v3089_v52  ;;  %v2902_v37 = vmul.f32 0.5, %v2710_v10  ;;  %v3677_v41 = vadd.f32 %v9609_v2, %v3292_v6  ;;  %v2714_v59 = vadd.f32 1.0, %v5045_v4  ;;  %v3682_v44 = vadd.f32 %v9610_v50, %v3297_v42  ;;  %v9615_v52 = vld [vmem:[#allocation42_spill] sm:$0xff]  ;;  %v9618_v61 = vld [vmem:[#allocation57_spill] sm:$0xff]  ;;  %v3746_v63 = vpop.f32.mrf.mxu0  ;;  %v9620_v53 = vld [vmem:[#allocation60_spill] sm:$0xff] }
 0x2d5   : > { %v3091_v18 = vmul.f32 %v2899_v29, %v8542_v31  ;;  %4002 = vst.msk [vmem:[%s8654_s25 + $0x68] sm:$0xff] %vm345_vm0, %v3938_v26  ;;  %v3095_v21 = vmul.f32 %v2903_v1, %v8599_v9  ;;  %v3302_v24 = vadd.f32 %v8403_v32, %v9611_v54  ;;  %v3307_v8 = vadd.f32 %v8403_v32, %v9612_v47  ;;  %v9613_v9 = vld [vmem:[#allocation29_spill] sm:$0xff]  ;;  %v9619_v10 = vld [vmem:[#allocation58_spill] sm:$0xff] }
 0x2d6   : > { %v3939_v62 = vadd.f32 %v5060_v35, %v3677_v41  ;;  %v2906_v30 = vmul.f32 0.5, %v2714_v59  ;;  %v3940_v49 = vadd.f32 %v5061_v12, %v3682_v44  ;;  %v8795_v43 = vmul.f32 0.5, %v2713_v17  ;;  %v4604_v1 = vpop.f32.mrf.mxu0  ;;  %v5065_v41 = vld [vmem:[%s5255_s10 + $0x98] sm:$0xff]  ;;  %v5066_v50 = vld [vmem:[%s5255_s10 + $0xa0] sm:$0xff]  ;;  %v9623_v35 = vld [vmem:[#allocation36_spill] sm:$0xff] }
 0x2d7   : > { %3520 = vmatmul.mubr.f32.gmra.mxu1 %v3088_v36  ;;  %v3094_v31 = vmul.f32 %v2902_v37, %v8566_v20  ;;  %v3687_v11 = vadd.f32 %v9613_v9, %v3302_v24  ;;  %v3692_v27 = vadd.f32 %v9614_v60, %v3307_v8  ;;  %v3312_v3 = vadd.f32 %v8403_v32, %v9615_v52  ;;  %v5068_v24 = vld [vmem:[%s5255_s10 + $0xb0] sm:$0xff]  ;;  %v5070_v60 = vld [vmem:[%s5255_s10 + $0xc0] sm:$0xff]  ;;  %v5071_v52 = vld [vmem:[%s5255_s10 + $0xc8] sm:$0xff] }
 0x2d8   : > { %3524 = vmatprep.mubr.f32.mxu1 %v3092_v15  ;;  %4003 = vst.msk [vmem:[%s8654_s25 + $0x70] sm:$0xff] %vm345_vm0, %v3939_v62  ;;  %v3098_v13 = vmul.f32 %v2906_v30, %v8631_v55  ;;  %4004 = vst.msk [vmem:[%s8654_s25 + $0x78] sm:$0xff] %vm345_vm0, %v3940_v49  ;;  %v3317_v29 = vadd.f32 %v8403_v32, %v9616_v28  ;;  %v3322_v20 = vadd.f32 %v8403_v32, %v9617_v40  ;;  %v9624_v49 = vld [vmem:[#allocation13_spill] sm:$0xff] }
 0x2d9   : > { %v3327_v22 = vadd.f32 %v8403_v32, %v9618_v61  ;;  %v3941_v36 = vadd.f32 %v5062_v46, %v3687_v11  ;;  %v3942_v6 = vadd.f32 %v5063_v51, %v3692_v27  ;;  %v3697_v55 = vadd.f32 %v8634_v39, %v3312_v3  ;;  %v5064_v39 = vld [vmem:[%s5255_s10 + $0x90] sm:$0xff]  ;;  %v3756_v11 = vpop.f32.mrf.mxu0  ;;  %v5074_v61 = vld [vmem:[%s5255_s10 + $0xe0] sm:$0xff] }
 0x2da   : > { %v3332_v0 = vadd.f32 %v8403_v32, %v9619_v10  ;;  %v3702_v42 = vadd.f32 %v8608_v7, %v3317_v29  ;;  %v3707_v4 = vadd.f32 %v8668_v58, %v3322_v20  ;;  %v3337_v26 = vadd.f32 %v8403_v32, %v9620_v53  ;;  %v9621_v58 = vld [vmem:[#allocation14_spill] sm:$0xff]  ;;  %v5073_v20 = vld [vmem:[%s5255_s10 + $0xd8] sm:$0xff] }
 0x2db   : > { %v3712_v15 = vadd.f32 %v8642_v23, %v3327_v22  ;;  %3525 = vmatmul.mubr.f32.gmra.mxu1 %v3091_v18  ;;  %4005 = vst.msk [vmem:[%s8654_s25 + $0x80] sm:$0xff] %vm345_vm0, %v3941_v36  ;;  %4006 = vst.msk [vmem:[%s8654_s25 + $0x88] sm:$0xff] %vm345_vm0, %v3942_v6  ;;  %v3943_v17 = vadd.f32 %v5064_v39, %v3697_v55  ;;  %v3342_v56 = vadd.f32 %v8403_v32, %v9621_v58  ;;  %v9622_v23 = vld [vmem:[#allocation25_spill] sm:$0xff]  ;;  %v3376_v2 = vpop.f32.mrf.mxu1  ;;  %v5067_v18 = vld [vmem:[%s5255_s10 + $0xa8] sm:$0xff] }
 0x2dc   : > { %v3717_v7 = vadd.f32 %v8704_v57, %v3332_v0  ;;  %v3347_v37 = vadd.f32 %v8403_v32, %v9622_v23  ;;  %3529 = vmatprep.mubr.f32.mxu1 %v3095_v21  ;;  %v3944_v59 = vadd.f32 %v5065_v41, %v3702_v42  ;;  %v3945_v44 = vadd.f32 %v5066_v50, %v3707_v4  ;;  %v5077_v6 = vld [vmem:[%s5255_s10 + $0xf8] sm:$0xff]  ;;  %v5078_v53 = vld [vmem:[%s5255_s10 + $0x100] sm:$0xff]  ;;  %v5079_v58 = vld [vmem:[%s5255_s10 + $0x108] sm:$0xff] }
 0x2dd   : > { %v3946_v54 = vadd.f32 %v5067_v18, %v3712_v15  ;;  %v3722_v57 = vadd.f32 %v8685_v16, %v3337_v26  ;;  %4007 = vst.msk [vmem:[%s8654_s25 + $0x90] sm:$0xff] %vm345_vm0, %v3943_v17  ;;  %v3727_v8 = vadd.f32 %v8741_v48, %v3342_v56  ;;  %v3352_v62 = vadd.f32 %v8403_v32, %v9623_v35  ;;  %v3378_v30 = vpop.f32.mrf.mxu1  ;;  %v5069_v16 = vld [vmem:[%s5255_s10 + $0xb8] sm:$0xff] }
 0x2de   : > { %v3947_v47 = vadd.f32 %v5068_v24, %v3717_v7  ;;  %v3732_v21 = vadd.f32 %v8716_v38, %v3347_v37  ;;  %4008 = vst.msk [vmem:[%s8654_s25 + $0x98] sm:$0xff] %vm345_vm0, %v3944_v59  ;;  %4009 = vst.msk [vmem:[%s8654_s25 + $0xa0] sm:$0xff] %vm345_vm0, %v3945_v44  ;;  %v3357_v9 = vadd.f32 %v8403_v32, %v9624_v49  ;;  %v5080_v44 = vld [vmem:[%s5255_s10 + $0x110] sm:$0xff] }
 0x2df   : > { %4010 = vst.msk [vmem:[%s8654_s25 + $0xa8] sm:$0xff] %vm345_vm0, %v3946_v54  ;;  %v3948_v12 = vadd.f32 %v5069_v16, %v3722_v57  ;;  %v3362_v38 = vadd.f32 %v8403_v32, %v8661_v14  ;;  %v3367_v48 = vadd.f32 %v8403_v32, %v8718_v45  ;;  %3530 = vmatmul.mubr.f32.gmra.mxu1 %v3094_v31 }
 0x2e0   : > { %4011 = vst.msk [vmem:[%s8654_s25 + $0xb0] sm:$0xff] %vm345_vm0, %v3947_v47  ;;  %v3949_v27 = vadd.f32 %v5070_v60, %v3727_v8  ;;  %v3950_v3 = vadd.f32 %v5071_v52, %v3732_v21  ;;  %v3737_v28 = vadd.f32 %v8775_v19, %v3352_v62  ;;  %v3372_v14 = vadd.f32 %v8403_v32, %v8766_v25  ;;  %v5072_v25 = vld [vmem:[%s5255_s10 + $0xd0] sm:$0xff]  ;;  %v5081_v8 = vld [vmem:[%s5255_s10 + $0x118] sm:$0xff]  ;;  %v5083_v52 = vld [vmem:[%s5255_s10 + $0x128] sm:$0xff] }
 0x2e1   : > { %3534 = vmatprep.mubr.f32.mxu1 %v3098_v13  ;;  %4012 = vst.msk [vmem:[%s8654_s25 + $0xb8] sm:$0xff] %vm345_vm0, %v3948_v12  ;;  %v3742_v45 = vadd.f32 %v8751_v5, %v3357_v9  ;;  %v3747_v31 = vadd.f32 %v3746_v63, %v3362_v38  ;;  %v3752_v29 = vadd.f32 %v8783_v33, %v3367_v48  ;;  %v5075_v63 = vld [vmem:[%s5255_s10 + $0xe8] sm:$0xff]  ;;  %v5082_v9 = vld [vmem:[%s5255_s10 + $0x120] sm:$0xff] }
 0x2e2   : > { %v3377_v40 = vadd.f32 %v8403_v32, %v3376_v2  ;;  %v3097_v19 = vmul.f32 %v8795_v43, %v8606_v34  ;;  %4013 = vst.msk [vmem:[%s8654_s25 + $0xc0] sm:$0xff] %vm345_vm0, %v3949_v27  ;;  %4014 = vst.msk [vmem:[%s8654_s25 + $0xc8] sm:$0xff] %vm345_vm0, %v3950_v3  ;;  %v3951_v13 = vadd.f32 %v5072_v25, %v3737_v28  ;;  %v5076_v43 = vld [vmem:[%s5255_s10 + $0xf0] sm:$0xff] }
 0x2e3   : > { %v3757_v5 = vadd.f32 %v3756_v11, %v3372_v14  ;;  %v3952_v33 = vadd.f32 %v5073_v20, %v3742_v45  ;;  %v3953_v22 = vadd.f32 %v5074_v61, %v3747_v31  ;;  %v3954_v46 = vadd.f32 %v5075_v63, %v3752_v29  ;;  %v3381_v51 = vpop.f32.mrf.mxu1  ;;  %v5085_v63 = vld [vmem:[%s5255_s10 + $0x138] sm:$0xff] }
 0x2e4   : > { %v3762_v34 = vadd.f32 %v4604_v1, %v3377_v40  ;;  %3535 = vmatmul.mubr.f32.gmra.mxu1 %v3097_v19  ;;  %4015 = vst.msk [vmem:[%s8654_s25 + $0xd0] sm:$0xff] %vm345_vm0, %v3951_v13  ;;  %v3382_v10 = vadd.f32 %v8403_v32, %v3381_v51  ;;  %v5084_v19 = vld [vmem:[%s5255_s10 + $0x130] sm:$0xff] }
 0x2e5   : > { %v3955_v36 = vadd.f32 %v5076_v43, %v3757_v5  ;;  %4016 = vst.msk [vmem:[%s8654_s25 + $0xd8] sm:$0xff] %vm345_vm0, %v3952_v33  ;;  %4017 = vst.msk [vmem:[%s8654_s25 + $0xe0] sm:$0xff] %vm345_vm0, %v3953_v22  ;;  %v4607_v0 = vpop.f32.mrf.mxu0  ;;  %v3383_v42 = vpop.f32.mrf.mxu1 }
 0x2e6   : > { %4018 = vst.msk [vmem:[%s8654_s25 + $0xe8] sm:$0xff] %vm345_vm0, %v3954_v46  ;;  %v3956_v55 = vadd.f32 %v5077_v6, %v3762_v34 }
 0x2e7   : > { %4019 = vst.msk [vmem:[%s8654_s25 + $0xf0] sm:$0xff] %vm345_vm0, %v3955_v36  ;;  %v3766_v4 = vpop.f32.mrf.mxu0 }
 0x2e8   : > { %4020 = vst.msk [vmem:[%s8654_s25 + $0xf8] sm:$0xff] %vm345_vm0, %v3956_v55  ;;  %v3767_v15 = vadd.f32 %v3766_v4, %v3382_v10  ;;  %v5086_v55 = vld [vmem:[%s5255_s10 + $0x140] sm:$0xff] }
 0x2ea   : > { %v3957_v26 = vadd.f32 %v5078_v53, %v3767_v15 }
 0x2ec   : > { %4021 = vst.msk [vmem:[%s8654_s25 + $0x100] sm:$0xff] %vm345_vm0, %v3957_v26  ;;  %v5087_v26 = vld [vmem:[%s5255_s10 + $0x148] sm:$0xff] }
 0x2ed   : > { %v3386_v1 = vpop.f32.mrf.mxu1 }
 0x2ee   : > { %v3387_v39 = vadd.f32 %v8403_v32, %v3386_v1 }
 0x2ef   : > { %v3388_v17 = vpop.f32.mrf.mxu1 }
 0x2f0   : > { %v3772_v7 = vadd.f32 %v4607_v0, %v3387_v39  ;;  %v8934_v39 = vld [vmem:[%s9033_s4] ss:$0 sm:$0xff] }
 0x2f2   : > { %v3958_v56 = vadd.f32 %v5079_v58, %v3772_v7 }
 0x2f4   : > { %4022 = vst.msk [vmem:[%s8654_s25 + $0x108] sm:$0xff] %vm345_vm0, %v3958_v56 }
 0x2f5   : > { %v4610_v23 = vpop.f32.mrf.mxu0 }
 0x2f7   : > { %v3391_v37 = vpop.f32.mrf.mxu1  ;;  %v3776_v2 = vpop.f32.mrf.mxu0 }
 0x2f8   : > { %v3392_v41 = vadd.f32 %v8403_v32, %v3391_v37 }
 0x2f9   : > { %v3393_v59 = vpop.f32.mrf.mxu1 }
 0x2fa   : > { %v3777_v50 = vadd.f32 %v3776_v2, %v3392_v41 }
 0x2fc   : > { %v3959_v18 = vadd.f32 %v5080_v44, %v3777_v50  ;;  %v5090_v44 = vld [vmem:[%s5255_s10 + $0x158] sm:$0xff] }
 0x2fe   : > { %4023 = vst.msk [vmem:[%s8654_s25 + $0x110] sm:$0xff] %vm345_vm0, %v3959_v18 }
 0x2ff   : > { %v4613_v35 = vpop.f32.mrf.mxu0 }
 0x300   : > { %v3396_v54 = vpop.f32.mrf.mxu1 }
 0x301   : > { %v3397_v57 = vadd.f32 %v8403_v32, %v3396_v54  ;;  %v3786_v16 = vpop.f32.mrf.mxu0 }
 0x302   : > { %v3398_v24 = vpop.f32.mrf.mxu1 }
 0x303   : > { %v3782_v47 = vadd.f32 %v4610_v23, %v3397_v57  ;;  %v5089_v23 = vld [vmem:[%s5255_s10 + $0x150] sm:$0xff] }
 0x305   : > { %v3960_v21 = vadd.f32 %v5081_v8, %v3782_v47 }
 0x307   : > { %4024 = vst.msk [vmem:[%s8654_s25 + $0x118] sm:$0xff] %vm345_vm0, %v3960_v21  ;;  %v5091_v21 = vld [vmem:[%s5255_s10 + $0x160] sm:$0xff] }
 0x309   : > { %v4616_v28 = vpop.f32.mrf.mxu0 }
 0x30b   : > { %v3401_v62 = vpop.f32.mrf.mxu1  ;;  %v3796_v31 = vpop.f32.mrf.mxu0 }
 0x30c   : > { %v3402_v30 = vadd.f32 %v8403_v32, %v3401_v62 }
 0x30d   : > { %v3403_v12 = vpop.f32.mrf.mxu1 }
 0x30e   : > { %v3787_v49 = vadd.f32 %v3786_v16, %v3402_v30 }
 0x310   : > { %v3961_v38 = vadd.f32 %v5082_v9, %v3787_v49  ;;  %v5092_v9 = vld [vmem:[%s5255_s10 + $0x168] sm:$0xff] }
 0x312   : > { %4025 = vst.msk [vmem:[%s8654_s25 + $0x120] sm:$0xff] %vm345_vm0, %v3961_v38 }
 0x313   : > { %v4619_v20 = vpop.f32.mrf.mxu0 }
 0x315   : > { %v3406_v48 = vpop.f32.mrf.mxu1  ;;  %v3806_v43 = vpop.f32.mrf.mxu0 }
 0x316   : > { %v3407_v11 = vadd.f32 %v8403_v32, %v3406_v48 }
 0x317   : > { %v3408_v60 = vpop.f32.mrf.mxu1 }
 0x318   : > { %v3792_v27 = vadd.f32 %v4613_v35, %v3407_v11 }
 0x31a   : > { %v3962_v3 = vadd.f32 %v5083_v52, %v3792_v27 }
 0x31c   : > { %4026 = vst.msk [vmem:[%s8654_s25 + $0x128] sm:$0xff] %vm345_vm0, %v3962_v3  ;;  %v5093_v3 = vld [vmem:[%s5255_s10 + $0x170] sm:$0xff] }
 0x31d   : > { %v4622_v42 = vpop.f32.mrf.mxu0 }
 0x31f   : > { %v3816_v7 = vpop.f32.mrf.mxu0 }
 0x321   : > { %v3411_v14 = vpop.f32.mrf.mxu1 }
 0x322   : > { %v3412_v45 = vadd.f32 %v8403_v32, %v3411_v14 }
 0x323   : > { %v3413_v29 = vpop.f32.mrf.mxu1 }
 0x324   : > { %v3797_v40 = vadd.f32 %v3796_v31, %v3412_v45 }
 0x326   : > { %v3963_v25 = vadd.f32 %v5084_v19, %v3797_v40  ;;  %v5094_v40 = vld [vmem:[%s5255_s10 + $0x178] sm:$0xff] }
 0x327   : > { %v4625_v50 = vpop.f32.mrf.mxu0 }
 0x328   : > { %4027 = vst.msk [vmem:[%s8654_s25 + $0x130] sm:$0xff] %vm345_vm0, %v3963_v25 }
 0x329   : > { %v3826_v24 = vpop.f32.mrf.mxu0 }
 0x32b   : > { %v3416_v13 = vpop.f32.mrf.mxu1 }
 0x32c   : > { %v3417_v5 = vadd.f32 %v8403_v32, %v3416_v13 }
 0x32d   : > { %v3418_v33 = vpop.f32.mrf.mxu1 }
 0x32e   : > { %v3802_v61 = vadd.f32 %v4616_v28, %v3417_v5 }
 0x32f   : > { %v3421_v22 = vpop.f32.mrf.mxu1 }
 0x330   : > { %v3964_v46 = vadd.f32 %v5085_v63, %v3802_v61  ;;  %v3422_v34 = vadd.f32 %v8403_v32, %v3421_v22  ;;  %v5095_v22 = vld [vmem:[%s5255_s10 + $0x180] sm:$0xff] }
 0x331   : > { %v3423_v36 = vpop.f32.mrf.mxu1  ;;  %v4628_v49 = vpop.f32.mrf.mxu0 }
 0x332   : > { %4028 = vst.msk [vmem:[%s8654_s25 + $0x138] sm:$0xff] %vm345_vm0, %v3964_v46  ;;  %v3807_v51 = vadd.f32 %v3806_v43, %v3422_v34 }
 0x333   : > { %v3426_v6 = vpop.f32.mrf.mxu1  ;;  %v3836_v60 = vpop.f32.mrf.mxu0 }
 0x334   : > { %v3965_v10 = vadd.f32 %v5086_v55, %v3807_v51  ;;  %v3427_v0 = vadd.f32 %v8403_v32, %v3426_v6  ;;  %v5096_v6 = vld [vmem:[%s5255_s10 + $0x188] sm:$0xff] }
 0x335   : > { %v3428_v4 = vpop.f32.mrf.mxu1 }
 0x336   : > { %4029 = vst.msk [vmem:[%s8654_s25 + $0x140] sm:$0xff] %vm345_vm0, %v3965_v10  ;;  %v3812_v15 = vadd.f32 %v4619_v20, %v3427_v0 }
 0x337   : > { %v3431_v53 = vpop.f32.mrf.mxu1 }
 0x338   : > { %v3966_v1 = vadd.f32 %v5087_v26, %v3812_v15  ;;  %v3432_v17 = vadd.f32 %v8934_v39, %v3431_v53  ;;  %v5097_v53 = vld [vmem:[%s5255_s10 + $0x190] sm:$0xff] }
 0x339   : > { %v3433_v32 = vpop.f32.mrf.mxu1 }
 0x33a   : > { %4030 = vst.msk [vmem:[%s8654_s25 + $0x148] sm:$0xff] %vm345_vm0, %v3966_v1  ;;  %v3817_v58 = vadd.f32 %v3816_v7, %v3432_v17  ;;  %v4631_v25 = vpop.f32.mrf.mxu0 }
 0x33b   : > { %v3436_v56 = vpop.f32.mrf.mxu1 }
 0x33c   : > { %v3967_v37 = vadd.f32 %v5089_v23, %v3817_v58  ;;  %v3437_v2 = vadd.f32 %v8934_v39, %v3436_v56  ;;  %v3846_v20 = vpop.f32.mrf.mxu0  ;;  %v5098_v56 = vld [vmem:[%s5255_s10 + $0x198] sm:$0xff] }
 0x33d   : > { %v3438_v41 = vpop.f32.mrf.mxu1 }
 0x33e   : > { %4031 = vst.msk [vmem:[%s8654_s25 + $0x150] sm:$0xff] %vm345_vm0, %v3967_v37  ;;  %v3822_v59 = vadd.f32 %v4622_v42, %v3437_v2 }
 0x340   : > { %v3968_v18 = vadd.f32 %v5090_v44, %v3822_v59  ;;  %v5099_v44 = vld [vmem:[%s5255_s10 + $0x1a0] sm:$0xff] }
 0x341   : > { %v4634_v51 = vpop.f32.mrf.mxu0 }
 0x342   : > { %4032 = vst.msk [vmem:[%s8654_s25 + $0x158] sm:$0xff] %vm345_vm0, %v3968_v18  ;;  %v3441_v54 = vpop.f32.mrf.mxu1 }
 0x343   : > { %v3442_v57 = vadd.f32 %v8934_v39, %v3441_v54  ;;  %v3856_v42 = vpop.f32.mrf.mxu0 }
 0x344   : > { %v3443_v47 = vpop.f32.mrf.mxu1 }
 0x345   : > { %v3827_v8 = vadd.f32 %v3826_v24, %v3442_v57 }
 0x346   : > { %v4637_v32 = vpop.f32.mrf.mxu0 }
 0x347   : > { %v3969_v35 = vadd.f32 %v5091_v21, %v3827_v8  ;;  %v5100_v21 = vld [vmem:[%s5255_s10 + $0x1a8] sm:$0xff] }
 0x348   : > { %v3866_v41 = vpop.f32.mrf.mxu0 }
 0x349   : > { %v3446_v62 = vpop.f32.mrf.mxu1  ;;  %4033 = vst.msk [vmem:[%s8654_s25 + $0x160] sm:$0xff] %vm345_vm0, %v3969_v35 }
 0x34a   : > { %v3447_v30 = vadd.f32 %v8934_v39, %v3446_v62 }
 0x34b   : > { %v3448_v16 = vpop.f32.mrf.mxu1 }
 0x34c   : > { %v3832_v12 = vadd.f32 %v4625_v50, %v3447_v30 }
 0x34d   : > { %v4640_v47 = vpop.f32.mrf.mxu0 }
 0x34e   : > { %v3970_v38 = vadd.f32 %v5092_v9, %v3832_v12 }
 0x34f   : > { %v3451_v48 = vpop.f32.mrf.mxu1  ;;  %v3876_v16 = vpop.f32.mrf.mxu0 }
 0x350   : > { %4034 = vst.msk [vmem:[%s8654_s25 + $0x168] sm:$0xff] %vm345_vm0, %v3970_v38  ;;  %v3452_v11 = vadd.f32 %v8934_v39, %v3451_v48  ;;  %v5101_v38 = vld [vmem:[%s5255_s10 + $0x1b0] sm:$0xff] }
 0x351   : > { %v3453_v27 = vpop.f32.mrf.mxu1 }
 0x352   : > { %v3837_v52 = vadd.f32 %v3836_v60, %v3452_v11 }
 0x354   : > { %v3971_v28 = vadd.f32 %v5093_v3, %v3837_v52  ;;  %v4643_v60 = vpop.f32.mrf.mxu0 }
 0x356   : > { %4035 = vst.msk [vmem:[%s8654_s25 + $0x170] sm:$0xff] %vm345_vm0, %v3971_v28  ;;  %v3456_v14 = vpop.f32.mrf.mxu1  ;;  %v5102_v28 = vld [vmem:[%s5255_s10 + $0x1b8] sm:$0xff] }
 0x357   : > { %v3457_v45 = vadd.f32 %v8934_v39, %v3456_v14 }
 0x358   : > { %v3458_v31 = vpop.f32.mrf.mxu1 }
 0x359   : > { %v3842_v29 = vadd.f32 %v4628_v49, %v3457_v45  ;;  %v3886_v31 = vpop.f32.mrf.mxu0 }
 0x35b   : > { %v3972_v19 = vadd.f32 %v5094_v40, %v3842_v29 }
 0x35d   : > { %4036 = vst.msk [vmem:[%s8654_s25 + $0x178] sm:$0xff] %vm345_vm0, %v3972_v19 }
 0x35e   : > { %v3461_v13 = vpop.f32.mrf.mxu1 }
 0x35f   : > { %v3462_v5 = vadd.f32 %v8934_v39, %v3461_v13 }
 0x360   : > { %v3463_v33 = vpop.f32.mrf.mxu1 }
 0x361   : > { %v3847_v61 = vadd.f32 %v3846_v20, %v3462_v5  ;;  %v4646_v20 = vpop.f32.mrf.mxu0 }
 0x363   : > { %v3973_v63 = vadd.f32 %v5095_v22, %v3847_v61 }
 0x364   : > { %v3466_v46 = vpop.f32.mrf.mxu1 }
 0x365   : > { %4037 = vst.msk [vmem:[%s8654_s25 + $0x180] sm:$0xff] %vm345_vm0, %v3973_v63  ;;  %v3467_v34 = vadd.f32 %v8934_v39, %v3466_v46  ;;  %v5104_v63 = vld [vmem:[%s5255_s10 + $0x1c8] sm:$0xff] }
 0x366   : > { %v3468_v43 = vpop.f32.mrf.mxu1 }
 0x367   : > { %v3852_v36 = vadd.f32 %v4631_v25, %v3467_v34  ;;  %v5103_v25 = vld [vmem:[%s5255_s10 + $0x1c0] sm:$0xff]  ;;  %v3896_v43 = vpop.f32.mrf.mxu0 }
 0x369   : > { %v3974_v55 = vadd.f32 %v5096_v6, %v3852_v36 }
 0x36a   : > { %v3471_v10 = vpop.f32.mrf.mxu1 }
 0x36b   : > { %4038 = vst.msk [vmem:[%s8654_s25 + $0x188] sm:$0xff] %vm345_vm0, %v3974_v55  ;;  %v3472_v0 = vadd.f32 %v8934_v39, %v3471_v10  ;;  %v5105_v55 = vld [vmem:[%s5255_s10 + $0x1d0] sm:$0xff] }
 0x36c   : > { %v3473_v4 = vpop.f32.mrf.mxu1 }
 0x36d   : > { %v3857_v15 = vadd.f32 %v3856_v42, %v3472_v0  ;;  %v4649_v42 = vpop.f32.mrf.mxu0 }
 0x36f   : > { %v3975_v26 = vadd.f32 %v5097_v53, %v3857_v15  ;;  %v3476_v1 = vpop.f32.mrf.mxu1 }
 0x370   : > { %v3477_v17 = vadd.f32 %v8934_v39, %v3476_v1 }
 0x371   : > { %4039 = vst.msk [vmem:[%s8654_s25 + $0x190] sm:$0xff] %vm345_vm0, %v3975_v26  ;;  %v3478_v7 = vpop.f32.mrf.mxu1  ;;  %v5106_v26 = vld [vmem:[%s5255_s10 + $0x1d8] sm:$0xff] }
 0x372   : > { %v3862_v58 = vadd.f32 %v4634_v51, %v3477_v17  ;;  %v3906_v7 = vpop.f32.mrf.mxu0 }
 0x374   : > { %v3976_v23 = vadd.f32 %v5098_v56, %v3862_v58  ;;  %v3481_v37 = vpop.f32.mrf.mxu1 }
 0x375   : > { %v3482_v2 = vadd.f32 %v8934_v39, %v3481_v37 }
 0x376   : > { %4040 = vst.msk [vmem:[%s8654_s25 + $0x198] sm:$0xff] %vm345_vm0, %v3976_v23  ;;  %v3483_v59 = vpop.f32.mrf.mxu1  ;;  %v5107_v23 = vld [vmem:[%s5255_s10 + $0x1e0] sm:$0xff] }
 0x377   : > { %v3867_v50 = vadd.f32 %v3866_v41, %v3482_v2  ;;  %v4652_v41 = vpop.f32.mrf.mxu0 }
 0x379   : > { %v3977_v18 = vadd.f32 %v5099_v44, %v3867_v50 }
 0x37a   : > { %v3486_v54 = vpop.f32.mrf.mxu1 }
 0x37b   : > { %4041 = vst.msk [vmem:[%s8654_s25 + $0x1a0] sm:$0xff] %vm345_vm0, %v3977_v18  ;;  %v3487_v57 = vadd.f32 %v8934_v39, %v3486_v54  ;;  %v5108_v18 = vld [vmem:[%s5255_s10 + $0x1e8] sm:$0xff] }
 0x37c   : > { %v3488_v24 = vpop.f32.mrf.mxu1 }
 0x37d   : > { %v3872_v8 = vadd.f32 %v4637_v32, %v3487_v57  ;;  %v3916_v24 = vpop.f32.mrf.mxu0 }
 0x37f   : > { %v3978_v35 = vadd.f32 %v5100_v21, %v3872_v8  ;;  %v3491_v62 = vpop.f32.mrf.mxu1 }
 0x380   : > { %v3492_v30 = vadd.f32 %v8934_v39, %v3491_v62 }
 0x381   : > { %4042 = vst.msk [vmem:[%s8654_s25 + $0x1a8] sm:$0xff] %vm345_vm0, %v3978_v35  ;;  %v3493_v12 = vpop.f32.mrf.mxu1  ;;  %v5109_v35 = vld [vmem:[%s5255_s10 + $0x1f0] sm:$0xff] }
 0x382   : > { %v3877_v49 = vadd.f32 %v3876_v16, %v3492_v30 }
 0x383   : > { %v3496_v9 = vpop.f32.mrf.mxu1 }
 0x384   : > { %v3979_v48 = vadd.f32 %v5101_v38, %v3877_v49  ;;  %v3497_v11 = vadd.f32 %v8934_v39, %v3496_v9  ;;  %v5110_v49 = vld [vmem:[%s5255_s10 + $0x1f8] sm:$0xff] }
 0x385   : > { %v3498_v27 = vpop.f32.mrf.mxu1 }
 0x386   : > { %4043 = vst.msk [vmem:[%s8654_s25 + $0x1b0] sm:$0xff] %vm345_vm0, %v3979_v48  ;;  %v3882_v52 = vadd.f32 %v4640_v47, %v3497_v11 }
 0x387   : > { %v3501_v3 = vpop.f32.mrf.mxu1 }
 0x388   : > { %v3980_v14 = vadd.f32 %v5102_v28, %v3882_v52  ;;  %v3502_v45 = vadd.f32 %v8934_v39, %v3501_v3 }
 0x389   : > { %v3503_v29 = vpop.f32.mrf.mxu1 }
 0x38a   : > { %4044 = vst.msk [vmem:[%s8654_s25 + $0x1b8] sm:$0xff] %vm345_vm0, %v3980_v14  ;;  %v3887_v40 = vadd.f32 %v3886_v31, %v3502_v45 }
 0x38b   : > { %v3506_v19 = vpop.f32.mrf.mxu1 }
 0x38c   : > { %v3981_v13 = vadd.f32 %v5103_v25, %v3887_v40  ;;  %v3507_v5 = vadd.f32 %v8934_v39, %v3506_v19 }
 0x38d   : > { %v3508_v33 = vpop.f32.mrf.mxu1 }
 0x38e   : > { %4045 = vst.msk [vmem:[%s8654_s25 + $0x1c0] sm:$0xff] %vm345_vm0, %v3981_v13  ;;  %v3892_v61 = vadd.f32 %v4643_v60, %v3507_v5 }
 0x38f   : > { %v3511_v22 = vpop.f32.mrf.mxu1 }
 0x390   : > { %v3982_v46 = vadd.f32 %v5104_v63, %v3892_v61  ;;  %v3512_v34 = vadd.f32 %v8934_v39, %v3511_v22 }
 0x391   : > { %v3513_v36 = vpop.f32.mrf.mxu1 }
 0x392   : > { %4046 = vst.msk [vmem:[%s8654_s25 + $0x1c8] sm:$0xff] %vm345_vm0, %v3982_v46  ;;  %v3897_v51 = vadd.f32 %v3896_v43, %v3512_v34 }
 0x393   : > { %v3516_v6 = vpop.f32.mrf.mxu1 }
 0x394   : > { %v3983_v10 = vadd.f32 %v5105_v55, %v3897_v51  ;;  %v3517_v0 = vadd.f32 %v8934_v39, %v3516_v6 }
 0x395   : > { %v3518_v4 = vpop.f32.mrf.mxu1 }
 0x396   : > { %4047 = vst.msk [vmem:[%s8654_s25 + $0x1d0] sm:$0xff] %vm345_vm0, %v3983_v10  ;;  %v3902_v15 = vadd.f32 %v4646_v20, %v3517_v0 }
 0x397   : > { %v3521_v53 = vpop.f32.mrf.mxu1 }
 0x398   : > { %v3984_v1 = vadd.f32 %v5106_v26, %v3902_v15  ;;  %v3522_v17 = vadd.f32 %v8934_v39, %v3521_v53 }
 0x399   : > { %v3523_v32 = vpop.f32.mrf.mxu1 }
 0x39a   : > { %4048 = vst.msk [vmem:[%s8654_s25 + $0x1d8] sm:$0xff] %vm345_vm0, %v3984_v1  ;;  %v3907_v58 = vadd.f32 %v3906_v7, %v3522_v17 }
 0x39b   : > { %v3526_v56 = vpop.f32.mrf.mxu1 }
 0x39c   : > { %v3985_v37 = vadd.f32 %v5107_v23, %v3907_v58  ;;  %v3527_v2 = vadd.f32 %v8934_v39, %v3526_v56 }
 0x39d   : > { %v3528_v59 = vpop.f32.mrf.mxu1 }
 0x39e   : > { %4049 = vst.msk [vmem:[%s8654_s25 + $0x1e0] sm:$0xff] %vm345_vm0, %v3985_v37  ;;  %v3912_v50 = vadd.f32 %v4649_v42, %v3527_v2 }
 0x39f   : > { %v3531_v44 = vpop.f32.mrf.mxu1 }
 0x3a0   : > { %v3986_v54 = vadd.f32 %v5108_v18, %v3912_v50  ;;  %v3532_v57 = vadd.f32 %v8934_v39, %v3531_v44 }
 0x3a1   : > { %v3533_v47 = vpop.f32.mrf.mxu1 }
 0x3a2   : > { %4050 = vst.msk [vmem:[%s8654_s25 + $0x1e8] sm:$0xff] %vm345_vm0, %v3986_v54  ;;  %v3917_v8 = vadd.f32 %v3916_v24, %v3532_v57 }
 0x3a4   : > { %v3536_v21 = vpop.f32.mrf.mxu1  ;;  %v3987_v62 = vadd.f32 %v5109_v35, %v3917_v8 }
 0x3a5   : > { %v3537_v30 = vadd.f32 %v8934_v39, %v3536_v21 }
 0x3a6   : > { %v3538_v16 = vpop.f32.mrf.mxu1  ;;  %4051 = vst.msk [vmem:[%s8654_s25 + $0x1f0] sm:$0xff] %vm345_vm0, %v3987_v62 }
 0x3a7   : > { %v3922_v12 = vadd.f32 %v4652_v41, %v3537_v30 }
 0x3a9   : > { %v3988_v9 = vadd.f32 %v5110_v49, %v3922_v12 }
 0x3ab   : > { %4052 = vst.msk [vmem:[%s8654_s25 + $0x1f8] sm:$0xff] %vm345_vm0, %v3988_v9 }
 0x3ac PF: > { %s15_s18 = sadd.s32 1, %s5117_s18  }
 0x3ad   : > { %p12_p4 = scmp.ge.s32.totalorder %s15_s18, 4  }
 0x3af   :  { %14 = sbr.rel (!%p12_p4) target bundleno = 1 (0x1), region = 70 }

</bundles_post_ra>
